<compile_context>
chip_gen: v7x
topology: tpu7x:2x2x1
jax: 0.10.0
libtpu: 0.0.40
codegen_flags: <defaults>
</compile_context>

<pallas_src>
import functools

import jax
import jax.numpy as jnp
from jax.experimental import pallas as pl
from jax.experimental.pallas import tpu as pltpu

EPS = 1e-6
_INV_SQRT2 = 0.7071067811865476


def _round_up(a, b):
    return (a + b - 1) // b * b


def quantize_weight(w):
    """BitNet b1.58 per-tensor weight quant.

    Returns (ternary values in {-1,0,1}, inverse scale) so that the dequantized
    weight is `ternary * inv_scale`.
    """
    inv = jnp.clip(jnp.mean(jnp.abs(w)), 1e-5, None)
    tern = jnp.clip(jnp.round(w / inv), -1.0, 1.0)
    return tern, inv


def _rmsnorm_actquant_int(x):
    """SimpleRMSNorm + per-row int8 activation quant.

    Returns (integer-valued f32 codes in [-128, 127], per-row inverse scale)
    so the dequantized activation is `codes * inv_scale`.
    """
    ms = jnp.mean(x * x, axis=-1, keepdims=True)
    xn = x * jax.lax.rsqrt(ms + EPS)            # rsqrt -> EUP slot
    absmax = jnp.clip(jnp.max(jnp.abs(xn), axis=-1, keepdims=True), 1e-5, None)
    scale = 127.0 / absmax                      # (rows, 1) divide: negligible
    codes = jnp.clip(jnp.round(xn * scale), -128.0, 127.0)
    inv_scale = absmax * (1.0 / 127.0)
    return codes, inv_scale


def mlp_kernel(x_ref, w1_ref, w2_ref, wsc_ref, o_ref):
    # x_ref: (tm, D) bf16, w1_ref: (D, H) bf16 ternary, w2_ref: (H, D) bf16 ternary,
    # wsc_ref: (2,) f32 in SMEM (per-tensor weight inverse scales), o_ref: (tm, D) bf16.
    x = x_ref[...].astype(jnp.float32)

    # --- BitLinear #1 (bf16 MXU matmul on exact integer codes, f32 accumulate) ---
    xi, x_inv_s = _rmsnorm_actquant_int(x)
    h = jnp.dot(xi.astype(jnp.bfloat16), w1_ref[...],
                preferred_element_type=jnp.float32)
    h = h * (x_inv_s * wsc_ref[0])

    # --- exact erf GELU (torch nn.GELU default) ---
    h = 0.5 * h * (1.0 + jax.lax.erf(h * _INV_SQRT2))

    # --- BitLinear #2 ---
    hi, h_inv_s = _rmsnorm_actquant_int(h)
    o = jnp.dot(hi.astype(jnp.bfloat16), w2_ref[...],
                preferred_element_type=jnp.float32)
    o = o * (h_inv_s * wsc_ref[1])

    o_ref[...] = o.astype(o_ref.dtype)


def _pick_tm(m8, tm_max):
    """Row tile: >= 2 grid steps when possible (v7x megacore), minimal padding."""
    cap = min(tm_max, m8)
    if m8 >= 16:
        cap = min(cap, max(8, (m8 // 2) // 8 * 8))
    # Largest multiple-of-8 tile <= cap that divides the row count exactly
    # (zero padded rows); don't shrink below cap//2 just to avoid padding.
    for t in range(cap, max(8, cap // 2) - 1, -8):
        if m8 % t == 0:
            return t
    return cap


def _vmem_limit_bytes():
    """Per-generation VMEM limit: physical capacity minus headroom, capped."""
    try:
        cap = getattr(pltpu.get_tpu_info(), "vmem_capacity_bytes", None)
    except Exception:
        cap = None
    if not cap:
        return 32 * 1024 * 1024  # safe default everywhere
    return int(min(max(int(cap) - 16 * 1024 * 1024, 32 * 1024 * 1024),
                   100 * 1024 * 1024))


@functools.partial(jax.jit, static_argnames=("tm", "single_buffer_weights"))
def _mlp_forward_impl(x, w1_q, w2_q, w_scales, *, tm, single_buffer_weights):
    B, S, D = x.shape
    H = w1_q.shape[1]
    M = B * S

    m8 = _round_up(M, 8)
    tm_eff = _pick_tm(m8, tm)
    M_pad = _round_up(M, tm_eff)

    # Stream rows in bf16 (kernel is HBM-bound at small D/H); pad ragged tail.
    x2 = x.reshape(M, D).astype(jnp.bfloat16)
    if M_pad != M:
        x2 = jnp.pad(x2, ((0, M_pad - M), (0, 0)))

    if single_buffer_weights:
        w1_spec = pl.BlockSpec((D, H), lambda i: (0, 0),
                               pipeline_mode=pl.Buffered(1))
        w2_spec = pl.BlockSpec((H, D), lambda i: (0, 0),
                               pipeline_mode=pl.Buffered(1))
    else:
        w1_spec = pl.BlockSpec((D, H), lambda i: (0, 0))
        w2_spec = pl.BlockSpec((H, D), lambda i: (0, 0))

    flops = 4 * M_pad * D * H  # two matmuls, 2*M*D*H each
    bytes_accessed = (x2.size * 2 + w1_q.size * 2 + w2_q.size * 2
                      + M_pad * D * 2)

    out = pl.pallas_call(
        mlp_kernel,
        out_shape=jax.ShapeDtypeStruct((M_pad, D), jnp.bfloat16),
        grid_spec=pltpu.PrefetchScalarGridSpec(
            num_scalar_prefetch=0,
            grid=(M_pad // tm_eff,),
            in_specs=[
                pl.BlockSpec((tm_eff, D), lambda i: (i, 0)),
                w1_spec,
                w2_spec,
                pl.BlockSpec(memory_space=pltpu.MemorySpace.SMEM),
            ],
            out_specs=pl.BlockSpec((tm_eff, D), lambda i: (i, 0)),
        ),
        compiler_params=pltpu.CompilerParams(
            dimension_semantics=("parallel",),
            vmem_limit_bytes=_vmem_limit_bytes(),
        ),
        cost_estimate=pl.CostEstimate(
            flops=flops,
            transcendentals=M_pad * H,
            bytes_accessed=bytes_accessed,
        ),
    )(x2, w1_q, w2_q, w_scales)

    return out[:M].astype(x.dtype).reshape(B, S, D)


def mlp_forward(x, w1_q, w2_q, w_scales, *, tm=256):
    """x: (B, S, D) f32; w1_q: (D, H) bf16 ternary; w2_q: (H, D) bf16 ternary;
    w_scales: (2,) f32 per-tensor weight inverse scales."""
    # Prefer single-buffered (constant-index) weight blocks; fall back cleanly
    # if this Pallas build rejects pl.Buffered(1) at lowering time.
    try:
        return _mlp_forward_impl(x, w1_q, w2_q, w_scales, tm=tm,
                                 single_buffer_weights=True)
    except Exception:
        return _mlp_forward_impl(x, w1_q, w2_q, w_scales, tm=tm,
                                 single_buffer_weights=False)


def reference_forward(x, w1_mat, w2_mat):
    """Pure-JAX reference (BitLinear math with dequantized f32 weights)."""
    B, S, D = x.shape
    x2 = x.reshape(B * S, D).astype(jnp.float32)
    xi, xs = _rmsnorm_actquant_int(x2)
    h = jnp.dot(xi * xs, w1_mat, precision=jax.lax.Precision.HIGHEST)
    h = 0.5 * h * (1.0 + jax.lax.erf(h * _INV_SQRT2))
    hi, hs = _rmsnorm_actquant_int(h)
    o = jnp.dot(hi * hs, w2_mat, precision=jax.lax.Precision.HIGHEST)
    return o.reshape(B, S, D)


if __name__ == "__main__":
    # Small but lane-aligned shapes (D multiple of 128 keeps stores unmasked).
    batch, seq, embed_dim, mlp_multiplier = 2, 64, 128, 4
    hidden = embed_dim * mlp_multiplier  # 512
    dropout_level = 0.1  # nn.Dropout -> identity at inference

    key = jax.random.PRNGKey(0)
    kx, k1, k2 = jax.random.split(key, 3)

    x = jax.random.normal(kx, (batch, seq, embed_dim), dtype=jnp.float32)

    # nn.Linear-style init: U(-1/sqrt(fan_in), 1/sqrt(fan_in)), weight shape (out, in).
    lim1 = 1.0 / (embed_dim ** 0.5)
    lim2 = 1.0 / (hidden ** 0.5)
    w1_raw = jax.random.uniform(k1, (hidden, embed_dim), jnp.float32,
                                minval=-lim1, maxval=lim1)
    w2_raw = jax.random.uniform(k2, (embed_dim, hidden), jnp.float32,
                                minval=-lim2, maxval=lim2)
    # TODO(synk): BitLinear bias handling differs across bitnet versions; omitted
    # (the common BitLinear forward calls F.linear(x_q, w_q) without bias).

    # Static parameter prep (glue): per-tensor ternary weight quantization,
    # ternary values stored as bf16 ({-1,0,1} exact), transposed to (in, out);
    # the per-tensor inverse scales are applied post-matmul inside the kernel.
    t1, s1 = quantize_weight(w1_raw)
    t2, s2 = quantize_weight(w2_raw)
    w1_q = t1.T.astype(jnp.bfloat16)                 # (D, H)
    w2_q = t2.T.astype(jnp.bfloat16)                 # (H, D)
    w_scales = jnp.stack([s1, s2]).astype(jnp.float32)

    y = mlp_forward(x, w1_q, w2_q, w_scales, tm=256)
    y = jax.block_until_ready(y)

    # The reference consumes the same bf16-rounded input the kernel streams, so
    # the quantization codes match; the kernel additionally rounds its output
    # through bf16 on store (<= 2^-9 relative), hence the tolerances below.
    x_io = x.astype(jnp.bfloat16).astype(jnp.float32)
    y_ref = reference_forward(x_io, (t1 * s1).T, (t2 * s2).T)

    assert y.shape == (batch, seq, embed_dim)
    max_err = float(jnp.max(jnp.abs(y - y_ref)))
    assert jnp.allclose(y, y_ref, rtol=5e-3, atol=2e-3), (
        f"mismatch vs reference, max |err|={max_err}")

    print("KERNEL_OK")
</pallas_src>

<mosaic_0001>
module attributes {stable_mosaic.version = 11 : i64} {
  func.func @mlp_kernel(%arg0: i32, %arg1: memref<64x128xbf16, #tpu.memory_space<vmem>>, %arg2: memref<128x512xbf16, #tpu.memory_space<vmem>>, %arg3: memref<512x128xbf16, #tpu.memory_space<vmem>>, %arg4: memref<2xf32, #tpu.memory_space<smem>>, %arg5: memref<64x128xbf16, #tpu.memory_space<vmem>>) attributes {dimension_semantics = [#tpu.dimension_semantics<parallel>], iteration_bounds = array<i64: 2>, scalar_prefetch = 0 : i64, scratch_operands = 0 : i64, tpu.core_type = #tpu.core_type<tc>, window_params = [{transform_indices = @transform_0, window_bounds = array<i64: 64, 128>}, {pipeline_mode = #tpu.pipeline_mode<synchronous>, transform_indices = @transform_1, window_bounds = array<i64: 128, 512>}, {pipeline_mode = #tpu.pipeline_mode<synchronous>, transform_indices = @transform_2, window_bounds = array<i64: 512, 128>}, {transform_indices = @transform_3, window_bounds = array<i64: 2>}, {transform_indices = @transform_4, window_bounds = array<i64: 64, 128>}]} {
    %c0 = arith.constant 0 : index
    %c0_0 = arith.constant 0 : index
    %0 = vector.load %arg1[%c0, %c0_0] : memref<64x128xbf16, #tpu.memory_space<vmem>>, vector<64x128xbf16>
    %1 = arith.extf %0 : vector<64x128xbf16> to vector<64x128xf32>
    %2 = arith.mulf %1, %1 : vector<64x128xf32>
    %cst = arith.constant dense<0.000000e+00> : vector<64xf32>
    %3 = vector.multi_reduction <add>, %2, %cst [1] : vector<64x128xf32> to vector<64xf32>
    %4 = vector.shape_cast %3 : vector<64xf32> to vector<64x1xf32>
    %cst_1 = arith.constant 1.280000e+02 : f32
    %5 = vector.broadcast %cst_1 : f32 to vector<64x1xf32>
    %6 = arith.divf %4, %5 : vector<64x1xf32>
    %cst_2 = arith.constant 9.99999997E-7 : f32
    %7 = vector.broadcast %cst_2 : f32 to vector<64x1xf32>
    %8 = arith.addf %6, %7 : vector<64x1xf32>
    %9 = math.rsqrt %8 : vector<64x1xf32>
    %10 = vector.broadcast %9 : vector<64x1xf32> to vector<64x128xf32>
    %11 = arith.mulf %1, %10 : vector<64x128xf32>
    %12 = math.absf %11 : vector<64x128xf32>
    %cst_3 = arith.constant dense<0xFF800000> : vector<64xf32>
    %13 = vector.multi_reduction <maximumf>, %12, %cst_3 [1] : vector<64x128xf32> to vector<64xf32>
    %14 = vector.shape_cast %13 : vector<64xf32> to vector<64x1xf32>
    %cst_4 = arith.constant 9.99999974E-6 : f32
    %15 = vector.broadcast %cst_4 : f32 to vector<64x1xf32>
    %16 = arith.maximumf %15, %14 : vector<64x1xf32>
    %cst_5 = arith.constant 1.270000e+02 : f32
    %17 = vector.broadcast %cst_5 : f32 to vector<64x1xf32>
    %18 = arith.divf %17, %16 : vector<64x1xf32>
    %19 = vector.broadcast %18 : vector<64x1xf32> to vector<64x128xf32>
    %20 = arith.mulf %11, %19 : vector<64x128xf32>
    %21 = math.roundeven %20 : vector<64x128xf32>
    %cst_6 = arith.constant -1.280000e+02 : f32
    %cst_7 = arith.constant 1.270000e+02 : f32
    %22 = vector.broadcast %cst_6 : f32 to vector<64x128xf32>
    %23 = arith.maximumf %22, %21 : vector<64x128xf32>
    %24 = vector.broadcast %cst_7 : f32 to vector<64x128xf32>
    %25 = arith.minimumf %24, %23 : vector<64x128xf32>
    %cst_8 = arith.constant 0.00787401571 : f32
    %26 = vector.broadcast %cst_8 : f32 to vector<64x1xf32>
    %27 = arith.mulf %16, %26 : vector<64x1xf32>
    %28 = arith.truncf %25 : vector<64x128xf32> to vector<64x128xbf16>
    %c0_9 = arith.constant 0 : index
    %c0_10 = arith.constant 0 : index
    %29 = vector.load %arg2[%c0_9, %c0_10] : memref<128x512xbf16, #tpu.memory_space<vmem>>, vector<128x512xbf16>
    %cst_11 = arith.constant dense<0.000000e+00> : vector<64x512xf32>
    %30 = tpu.matmul %28, %29, %cst_11 {dimension_numbers = #tpu.dot_dimension_numbers<[1], [0], [0], [1], [0, 0, 1, 1], [], []>} : vector<64x128xbf16>, vector<128x512xbf16>, vector<64x512xf32> -> vector<64x512xf32>
    %c0_12 = arith.constant 0 : index
    %31 = memref.load %arg4[%c0_12] : memref<2xf32, #tpu.memory_space<smem>>
    %32 = vector.broadcast %31 : f32 to vector<64x1xf32>
    %33 = arith.mulf %27, %32 : vector<64x1xf32>
    %34 = vector.broadcast %33 : vector<64x1xf32> to vector<64x512xf32>
    %35 = arith.mulf %30, %34 : vector<64x512xf32>
    %cst_13 = arith.constant 5.000000e-01 : f32
    %36 = vector.broadcast %cst_13 : f32 to vector<64x512xf32>
    %37 = arith.mulf %36, %35 : vector<64x512xf32>
    %cst_14 = arith.constant 0.707106769 : f32
    %38 = vector.broadcast %cst_14 : f32 to vector<64x512xf32>
    %39 = arith.mulf %35, %38 : vector<64x512xf32>
    %40 = math.erf %39 : vector<64x512xf32>
    %cst_15 = arith.constant 1.000000e+00 : f32
    %41 = vector.broadcast %cst_15 : f32 to vector<64x512xf32>
    %42 = arith.addf %41, %40 : vector<64x512xf32>
    %43 = arith.mulf %37, %42 : vector<64x512xf32>
    %44 = arith.mulf %43, %43 : vector<64x512xf32>
    %cst_16 = arith.constant dense<0.000000e+00> : vector<64xf32>
    %45 = vector.multi_reduction <add>, %44, %cst_16 [1] : vector<64x512xf32> to vector<64xf32>
    %46 = vector.shape_cast %45 : vector<64xf32> to vector<64x1xf32>
    %cst_17 = arith.constant 5.120000e+02 : f32
    %47 = vector.broadcast %cst_17 : f32 to vector<64x1xf32>
    %48 = arith.divf %46, %47 : vector<64x1xf32>
    %cst_18 = arith.constant 9.99999997E-7 : f32
    %49 = vector.broadcast %cst_18 : f32 to vector<64x1xf32>
    %50 = arith.addf %48, %49 : vector<64x1xf32>
    %51 = math.rsqrt %50 : vector<64x1xf32>
    %52 = vector.broadcast %51 : vector<64x1xf32> to vector<64x512xf32>
    %53 = arith.mulf %43, %52 : vector<64x512xf32>
    %54 = math.absf %53 : vector<64x512xf32>
    %cst_19 = arith.constant dense<0xFF800000> : vector<64xf32>
    %55 = vector.multi_reduction <maximumf>, %54, %cst_19 [1] : vector<64x512xf32> to vector<64xf32>
    %56 = vector.shape_cast %55 : vector<64xf32> to vector<64x1xf32>
    %cst_20 = arith.constant 9.99999974E-6 : f32
    %57 = vector.broadcast %cst_20 : f32 to vector<64x1xf32>
    %58 = arith.maximumf %57, %56 : vector<64x1xf32>
    %cst_21 = arith.constant 1.270000e+02 : f32
    %59 = vector.broadcast %cst_21 : f32 to vector<64x1xf32>
    %60 = arith.divf %59, %58 : vector<64x1xf32>
    %61 = vector.broadcast %60 : vector<64x1xf32> to vector<64x512xf32>
    %62 = arith.mulf %53, %61 : vector<64x512xf32>
    %63 = math.roundeven %62 : vector<64x512xf32>
    %cst_22 = arith.constant -1.280000e+02 : f32
    %cst_23 = arith.constant 1.270000e+02 : f32
    %64 = vector.broadcast %cst_22 : f32 to vector<64x512xf32>
    %65 = arith.maximumf %64, %63 : vector<64x512xf32>
    %66 = vector.broadcast %cst_23 : f32 to vector<64x512xf32>
    %67 = arith.minimumf %66, %65 : vector<64x512xf32>
    %cst_24 = arith.constant 0.00787401571 : f32
    %68 = vector.broadcast %cst_24 : f32 to vector<64x1xf32>
    %69 = arith.mulf %58, %68 : vector<64x1xf32>
    %70 = arith.truncf %67 : vector<64x512xf32> to vector<64x512xbf16>
    %c0_25 = arith.constant 0 : index
    %c0_26 = arith.constant 0 : index
    %71 = vector.load %arg3[%c0_25, %c0_26] : memref<512x128xbf16, #tpu.memory_space<vmem>>, vector<512x128xbf16>
    %cst_27 = arith.constant dense<0.000000e+00> : vector<64x128xf32>
    %72 = tpu.matmul %70, %71, %cst_27 {dimension_numbers = #tpu.dot_dimension_numbers<[1], [0], [0], [1], [0, 0, 1, 1], [], []>} : vector<64x512xbf16>, vector<512x128xbf16>, vector<64x128xf32> -> vector<64x128xf32>
    %c1 = arith.constant 1 : index
    %73 = memref.load %arg4[%c1] : memref<2xf32, #tpu.memory_space<smem>>
    %74 = vector.broadcast %73 : f32 to vector<64x1xf32>
    %75 = arith.mulf %69, %74 : vector<64x1xf32>
    %76 = vector.broadcast %75 : vector<64x1xf32> to vector<64x128xf32>
    %77 = arith.mulf %72, %76 : vector<64x128xf32>
    %78 = arith.truncf %77 : vector<64x128xf32> to vector<64x128xbf16>
    %c0_28 = arith.constant 0 : index
    %c0_29 = arith.constant 0 : index
    %79 = vector.load %arg5[%c0_28, %c0_29] : memref<64x128xbf16, #tpu.memory_space<vmem>>, vector<64x128xbf16>
    tpu.vector_store %arg5[%c0_28, %c0_29], %78 {strides = array<i32>} : memref<64x128xbf16, #tpu.memory_space<vmem>>, vector<64x128xbf16>,
    return
  }
  func.func @transform_0(%arg0: i32) -> (i32, i32) {
    %c0_i32 = arith.constant 0 : i32
    %c0_i32_0 = arith.constant 0 : i32
    return %arg0, %c0_i32 : i32, i32
  }
  func.func @transform_1(%arg0: i32) -> (i32, i32) {
    %c0_i32 = arith.constant 0 : i32
    %c0_i32_0 = arith.constant 0 : i32
    %c0_i32_1 = arith.constant 0 : i32
    return %c0_i32, %c0_i32_0 : i32, i32
  }
  func.func @transform_2(%arg0: i32) -> (i32, i32) {
    %c0_i32 = arith.constant 0 : i32
    %c0_i32_0 = arith.constant 0 : i32
    %c0_i32_1 = arith.constant 0 : i32
    return %c0_i32, %c0_i32_0 : i32, i32
  }
  func.func @transform_3(%arg0: i32) -> i32 {
    %c0_i32 = arith.constant 0 : i32
    %c0_i32_0 = arith.constant 0 : i32
    return %c0_i32 : i32
  }
  func.func @transform_4(%arg0: i32) -> (i32, i32) {
    %c0_i32 = arith.constant 0 : i32
    %c0_i32_0 = arith.constant 0 : i32
    return %arg0, %c0_i32 : i32, i32
  }
}

module attributes {stable_mosaic.version = 11 : i64} {
  func.func @mlp_kernel(%arg0: i32, %arg1: memref<64x128xbf16, #tpu.memory_space<vmem>>, %arg2: memref<128x512xbf16, #tpu.memory_space<vmem>>, %arg3: memref<512x128xbf16, #tpu.memory_space<vmem>>, %arg4: memref<2xf32, #tpu.memory_space<smem>>, %arg5: memref<64x128xbf16, #tpu.memory_space<vmem>>) attributes {dimension_semantics = [#tpu.dimension_semantics<parallel>], iteration_bounds = array<i64: 2>, scalar_prefetch = 0 : i64, scratch_operands = 0 : i64, tpu.core_type = #tpu.core_type<tc>, window_params = [{transform_indices = @transform_0, window_bounds = array<i64: 64, 128>}, {pipeline_mode = #tpu.pipeline_mode<synchronous>, transform_indices = @transform_1, window_bounds = array<i64: 128, 512>}, {pipeline_mode = #tpu.pipeline_mode<synchronous>, transform_indices = @transform_2, window_bounds = array<i64: 512, 128>}, {transform_indices = @transform_3, window_bounds = array<i64: 2>}, {transform_indices = @transform_4, window_bounds = array<i64: 64, 128>}]} {
    %c0 = arith.constant 0 : index
    %c0_0 = arith.constant 0 : index
    %0 = vector.load %arg1[%c0, %c0_0] : memref<64x128xbf16, #tpu.memory_space<vmem>>, vector<64x128xbf16>
    %1 = arith.extf %0 : vector<64x128xbf16> to vector<64x128xf32>
    %2 = arith.mulf %1, %1 : vector<64x128xf32>
    %cst = arith.constant dense<0.000000e+00> : vector<64xf32>
    %3 = vector.multi_reduction <add>, %2, %cst [1] : vector<64x128xf32> to vector<64xf32>
    %4 = vector.shape_cast %3 : vector<64xf32> to vector<64x1xf32>
    %cst_1 = arith.constant 1.280000e+02 : f32
    %5 = vector.broadcast %cst_1 : f32 to vector<64x1xf32>
    %6 = arith.divf %4, %5 : vector<64x1xf32>
    %cst_2 = arith.constant 9.99999997E-7 : f32
    %7 = vector.broadcast %cst_2 : f32 to vector<64x1xf32>
    %8 = arith.addf %6, %7 : vector<64x1xf32>
    %9 = math.rsqrt %8 : vector<64x1xf32>
    %10 = vector.broadcast %9 : vector<64x1xf32> to vector<64x128xf32>
    %11 = arith.mulf %1, %10 : vector<64x128xf32>
    %12 = math.absf %11 : vector<64x128xf32>
    %cst_3 = arith.constant dense<0xFF800000> : vector<64xf32>
    %13 = vector.multi_reduction <maximumf>, %12, %cst_3 [1] : vector<64x128xf32> to vector<64xf32>
    %14 = vector.shape_cast %13 : vector<64xf32> to vector<64x1xf32>
    %cst_4 = arith.constant 9.99999974E-6 : f32
    %15 = vector.broadcast %cst_4 : f32 to vector<64x1xf32>
    %16 = arith.maximumf %15, %14 : vector<64x1xf32>
    %cst_5 = arith.constant 1.270000e+02 : f32
    %17 = vector.broadcast %cst_5 : f32 to vector<64x1xf32>
    %18 = arith.divf %17, %16 : vector<64x1xf32>
    %19 = vector.broadcast %18 : vector<64x1xf32> to vector<64x128xf32>
    %20 = arith.mulf %11, %19 : vector<64x128xf32>
    %21 = math.roundeven %20 : vector<64x128xf32>
    %cst_6 = arith.constant -1.280000e+02 : f32
    %cst_7 = arith.constant 1.270000e+02 : f32
    %22 = vector.broadcast %cst_6 : f32 to vector<64x128xf32>
    %23 = arith.maximumf %22, %21 : vector<64x128xf32>
    %24 = vector.broadcast %cst_7 : f32 to vector<64x128xf32>
    %25 = arith.minimumf %24, %23 : vector<64x128xf32>
    %cst_8 = arith.constant 0.00787401571 : f32
    %26 = vector.broadcast %cst_8 : f32 to vector<64x1xf32>
    %27 = arith.mulf %16, %26 : vector<64x1xf32>
    %28 = arith.truncf %25 : vector<64x128xf32> to vector<64x128xbf16>
    %c0_9 = arith.constant 0 : index
    %c0_10 = arith.constant 0 : index
    %29 = vector.load %arg2[%c0_9, %c0_10] : memref<128x512xbf16, #tpu.memory_space<vmem>>, vector<128x512xbf16>
    %cst_11 = arith.constant dense<0.000000e+00> : vector<64x512xf32>
    %30 = tpu.matmul %28, %29, %cst_11 {dimension_numbers = #tpu.dot_dimension_numbers<[1], [0], [0], [1], [0, 0, 1, 1], [], []>} : vector<64x128xbf16>, vector<128x512xbf16>, vector<64x512xf32> -> vector<64x512xf32>
    %c0_12 = arith.constant 0 : index
    %31 = memref.load %arg4[%c0_12] : memref<2xf32, #tpu.memory_space<smem>>
    %32 = vector.broadcast %31 : f32 to vector<64x1xf32>
    %33 = arith.mulf %27, %32 : vector<64x1xf32>
    %34 = vector.broadcast %33 : vector<64x1xf32> to vector<64x512xf32>
    %35 = arith.mulf %30, %34 : vector<64x512xf32>
    %cst_13 = arith.constant 5.000000e-01 : f32
    %36 = vector.broadcast %cst_13 : f32 to vector<64x512xf32>
    %37 = arith.mulf %36, %35 : vector<64x512xf32>
    %cst_14 = arith.constant 0.707106769 : f32
    %38 = vector.broadcast %cst_14 : f32 to vector<64x512xf32>
    %39 = arith.mulf %35, %38 : vector<64x512xf32>
    %40 = math.erf %39 : vector<64x512xf32>
    %cst_15 = arith.constant 1.000000e+00 : f32
    %41 = vector.broadcast %cst_15 : f32 to vector<64x512xf32>
    %42 = arith.addf %41, %40 : vector<64x512xf32>
    %43 = arith.mulf %37, %42 : vector<64x512xf32>
    %44 = arith.mulf %43, %43 : vector<64x512xf32>
    %cst_16 = arith.constant dense<0.000000e+00> : vector<64xf32>
    %45 = vector.multi_reduction <add>, %44, %cst_16 [1] : vector<64x512xf32> to vector<64xf32>
    %46 = vector.shape_cast %45 : vector<64xf32> to vector<64x1xf32>
    %cst_17 = arith.constant 5.120000e+02 : f32
    %47 = vector.broadcast %cst_17 : f32 to vector<64x1xf32>
    %48 = arith.divf %46, %47 : vector<64x1xf32>
    %cst_18 = arith.constant 9.99999997E-7 : f32
    %49 = vector.broadcast %cst_18 : f32 to vector<64x1xf32>
    %50 = arith.addf %48, %49 : vector<64x1xf32>
    %51 = math.rsqrt %50 : vector<64x1xf32>
    %52 = vector.broadcast %51 : vector<64x1xf32> to vector<64x512xf32>
    %53 = arith.mulf %43, %52 : vector<64x512xf32>
    %54 = math.absf %53 : vector<64x512xf32>
    %cst_19 = arith.constant dense<0xFF800000> : vector<64xf32>
    %55 = vector.multi_reduction <maximumf>, %54, %cst_19 [1] : vector<64x512xf32> to vector<64xf32>
    %56 = vector.shape_cast %55 : vector<64xf32> to vector<64x1xf32>
    %cst_20 = arith.constant 9.99999974E-6 : f32
    %57 = vector.broadcast %cst_20 : f32 to vector<64x1xf32>
    %58 = arith.maximumf %57, %56 : vector<64x1xf32>
    %cst_21 = arith.constant 1.270000e+02 : f32
    %59 = vector.broadcast %cst_21 : f32 to vector<64x1xf32>
    %60 = arith.divf %59, %58 : vector<64x1xf32>
    %61 = vector.broadcast %60 : vector<64x1xf32> to vector<64x512xf32>
    %62 = arith.mulf %53, %61 : vector<64x512xf32>
    %63 = math.roundeven %62 : vector<64x512xf32>
    %cst_22 = arith.constant -1.280000e+02 : f32
    %cst_23 = arith.constant 1.270000e+02 : f32
    %64 = vector.broadcast %cst_22 : f32 to vector<64x512xf32>
    %65 = arith.maximumf %64, %63 : vector<64x512xf32>
    %66 = vector.broadcast %cst_23 : f32 to vector<64x512xf32>
    %67 = arith.minimumf %66, %65 : vector<64x512xf32>
    %cst_24 = arith.constant 0.00787401571 : f32
    %68 = vector.broadcast %cst_24 : f32 to vector<64x1xf32>
    %69 = arith.mulf %58, %68 : vector<64x1xf32>
    %70 = arith.truncf %67 : vector<64x512xf32> to vector<64x512xbf16>
    %c0_25 = arith.constant 0 : index
    %c0_26 = arith.constant 0 : index
    %71 = vector.load %arg3[%c0_25, %c0_26] : memref<512x128xbf16, #tpu.memory_space<vmem>>, vector<512x128xbf16>
    %cst_27 = arith.constant dense<0.000000e+00> : vector<64x128xf32>
    %72 = tpu.matmul %70, %71, %cst_27 {dimension_numbers = #tpu.dot_dimension_numbers<[1], [0], [0], [1], [0, 0, 1, 1], [], []>} : vector<64x512xbf16>, vector<512x128xbf16>, vector<64x128xf32> -> vector<64x128xf32>
    %c1 = arith.constant 1 : index
    %73 = memref.load %arg4[%c1] : memref<2xf32, #tpu.memory_space<smem>>
    %74 = vector.broadcast %73 : f32 to vector<64x1xf32>
    %75 = arith.mulf %69, %74 : vector<64x1xf32>
    %76 = vector.broadcast %75 : vector<64x1xf32> to vector<64x128xf32>
    %77 = arith.mulf %72, %76 : vector<64x128xf32>
    %78 = arith.truncf %77 : vector<64x128xf32> to vector<64x128xbf16>
    %c0_28 = arith.constant 0 : index
    %c0_29 = arith.constant 0 : index
    %79 = vector.load %arg5[%c0_28, %c0_29] : memref<64x128xbf16, #tpu.memory_space<vmem>>, vector<64x128xbf16>
    tpu.vector_store %arg5[%c0_28, %c0_29], %78 {strides = array<i32>} : memref<64x128xbf16, #tpu.memory_space<vmem>>, vector<64x128xbf16>,
    return
  }
  func.func @transform_0(%arg0: i32) -> (i32, i32) {
    %c0_i32 = arith.constant 0 : i32
    %c0_i32_0 = arith.constant 0 : i32
    return %arg0, %c0_i32 : i32, i32
  }
  func.func @transform_1(%arg0: i32) -> (i32, i32) {
    %c0_i32 = arith.constant 0 : i32
    %c0_i32_0 = arith.constant 0 : i32
    %c0_i32_1 = arith.constant 0 : i32
    return %c0_i32, %c0_i32_0 : i32, i32
  }
  func.func @transform_2(%arg0: i32) -> (i32, i32) {
    %c0_i32 = arith.constant 0 : i32
    %c0_i32_0 = arith.constant 0 : i32
    %c0_i32_1 = arith.constant 0 : i32
    return %c0_i32, %c0_i32_0 : i32, i32
  }
  func.func @transform_3(%arg0: i32) -> i32 {
    %c0_i32 = arith.constant 0 : i32
    %c0_i32_0 = arith.constant 0 : i32
    return %c0_i32 : i32
  }
  func.func @transform_4(%arg0: i32) -> (i32, i32) {
    %c0_i32 = arith.constant 0 : i32
    %c0_i32_0 = arith.constant 0 : i32
    return %arg0, %c0_i32 : i32, i32
  }
}

</mosaic_0001>

<bundles_post_ra>
// kernel: _mlp_forward_impl.1
= control target key start
LH: loop header
LB: loop body
LE: loop exit
PB: predicated region body
PF: predicated region fallthrough
CT: control target
= control target key end

     0   :  { %9 = vsyncpa [#allocation3], 0  ;;  %s3308_s0 = inlined_call_operand.vmem [shape: bf16[128,128], index: 0, kind: input, shape index: {}]   ;;  %s3309_s1 = inlined_call_operand.hbm [shape: bf16[128,512], index: 1, kind: input, shape index: {}]   ;;  %s3310_s2 = inlined_call_operand.hbm [shape: bf16[512,128], index: 2, kind: input, shape index: {}]   ;;  %s3311_s3 = inlined_call_operand.vmem [shape: f32[2], index: 3, kind: input, shape index: {}]   ;;  %s3312_s4 = inlined_call_operand.vmem [shape: bf16[128,128], index: 4, kind: output, shape index: {}]  }
   0x1   :  { %10 = vsyncpa [#allocation6], 0 }
   0x2   :  { %11 = vsyncpa [#allocation4], 0  ;;  %s2522_s15 = smov 0  }
   0x3 LB: > { %s2489_s16 = smov [#allocation2]   ;;  %s1862_s18 = sadd.s32 4294967295, %s2487_s15   ;;  %s2487_s15 = sphi %s2522_s15, %s17_s15  }
   0x4   : > { %s149_s17 = sshll.u32 %s2489_s16, 4  ;;  %p1864_p0 = scmp.ge.s32.totalorder %s2487_s15, 1  ;;  %s2536_s17 = int_to_ptr.vmem [resolvable:$true] %s149_s17 }
   0x5   : > { %p137_p1 = scmp.lt.s32.totalorder %s2487_s15, 3  ;;  %p2532_p2 = scmp.eq.s32.totalorder %s1862_s18, 0 }
   0x6   : > { %s2490_s21 = smov [#allocation5]   ;;  %s176_s26 = sshll.u32 %s3311_s3, 4  ;;  %s2555_s26 = int_to_ptr.vmem [resolvable:$true] %s176_s26 }
   0x7   : > { %p2538_p3 = pnand %p1864_p0, %p137_p1  ;;  %s162_s22 = sshll.u32 %s2490_s21, 4  ;;  %s2544_s22 = int_to_ptr.vmem [resolvable:$true] %s162_s22 }
   0x8   : > { %s2374_s29 = scalar_lea.hbm %s3309_s1, 4096 }
   0x9   : > { %p2134_p4 = pneg %p2538_p3  ;;  %p2375_p6 = scmp.ne.s32.totalorder %s3309_s1, %s2374_s29 }
   0xa   : > { %p2381_p10 = scmp.lt.u32.totalorder %s2374_s29, %s3309_s1 }
   0xb   : > { %p2548_p5 = pnand %p2532_p2, %p2134_p4 }
   0xd   : > { %p2565_p7 = pneg %p2548_p5 }
   0xf   : > { %p2377_p8 = pnand %p2565_p7, %p2375_p6 }
  0x11   : > { %p2378_p9 = pneg %p2377_p8 }
  0x13   : > { %p2383_p11 = pnand %p2381_p10, %p2378_p9 }
  0x15   : > { %2386 = shalt.err (!%p2383_p11)
}
  0x16   : > { %s2387_s9 = scalar_lea.vmem %s2536_s17, 4096  ;;  %p2395_p1 = scmp.lt.s32.totalorder %s2536_s17, %s2536_s17 }
  0x17   : > { %p2388_p12 = scmp.ne.s32.totalorder %s2536_s17, %s2387_s9  ;;  %p2396_p4 = scmp.lt.s32.totalorder %s2387_s9, %s2387_s9 }
  0x19   : > { %p2390_p13 = pnand %p2388_p12, %p2565_p7  ;;  %p2397_p6 = por %p2396_p4, %p2395_p1 }
  0x1b   : > { %p2391_p0 = pneg %p2390_p13 }
  0x1d   : > { %p2398_p8 = pnand %p2397_p6, %p2391_p0 }
  0x1f   : > { %2401 = shalt.err (!%p2398_p8)
}
  0x20   : > { %s2491_s10 = smov 256   ;;  %s2492_s11 = smov 16  }
  0x21   : > { %2137 = dma.hbm_to_vmem [thread:$0]  (!%p2548_p5), %s3309_s1, 4096, %s2536_s17, [#allocation3], %s2491_s10, %s2491_s10, %s2492_s11  }
  0x22   : > { %s2402_s21 = scalar_lea.hbm %s3310_s2, 4096 }
  0x23   : > { %p2403_p9 = scmp.ne.s32.totalorder %s3310_s2, %s2402_s21  ;;  %p2409_p12 = scmp.lt.u32.totalorder %s2402_s21, %s3310_s2 }
  0x25   : > { %p2405_p10 = pnand %p2403_p9, %p2565_p7 }
  0x27   : > { %p2406_p11 = pneg %p2405_p10 }
  0x29   : > { %p2411_p13 = pnand %p2409_p12, %p2406_p11 }
  0x2b   : > { %2414 = shalt.err (!%p2411_p13)
}
  0x2c   : > { %s2415_s17 = scalar_lea.vmem %s2544_s22, 4096  ;;  %p2423_p6 = scmp.lt.s32.totalorder %s2544_s22, %s2544_s22 }
  0x2d   : > { %p2416_p0 = scmp.ne.s32.totalorder %s2544_s22, %s2415_s17  ;;  %p2424_p8 = scmp.lt.s32.totalorder %s2415_s17, %s2415_s17 }
  0x2f   : > { %p2418_p1 = pnand %p2416_p0, %p2565_p7  ;;  %p2425_p9 = por %p2424_p8, %p2423_p6 }
  0x31   : > { %p2419_p4 = pneg %p2418_p1 }
  0x33   : > { %p2426_p10 = pnand %p2425_p9, %p2419_p4 }
  0x35   : > { %2429 = shalt.err (!%p2426_p10)
}
  0x36   : > { %s2493_s29 = smov 64   ;;  %s2494_s30 = smov 4  }
  0x37   : > { %2140 = dma.hbm_to_vmem [thread:$0]  (!%p2548_p5), %s3310_s2, 4096, %s2544_s22, [#allocation6], %s2493_s29, %s2493_s29, %s2494_s30  }
  0x38   : > { %s2430_s8 = scalar_lea.vmem %s2555_s26, 16  ;;  %p2438_p0 = scmp.lt.s32.totalorder %s2555_s26, %s2555_s26 }
  0x39   : > { %p2431_p11 = scmp.ne.s32.totalorder %s2555_s26, %s2430_s8  ;;  %p2439_p1 = scmp.lt.s32.totalorder %s2430_s8, %s2430_s8 }
  0x3b   : > { %p2433_p12 = pnand %p2431_p11, %p2565_p7  ;;  %p2440_p4 = por %p2439_p1, %p2438_p0 }
  0x3d   : > { %p2434_p13 = pneg %p2433_p12 }
  0x3f   : > { %p2441_p6 = pnand %p2440_p4, %p2434_p13 }
  0x41   : > { %2444 = shalt.err (!%p2441_p6)
}
  0x42   : > { %s2495_s9 = smov [#allocation7]   ;;  %198 = sbr.rel (%p2538_p3) target bundleno = 1280 (0x500), region = 36 }
  0x43   : > { %2143 = dma.vmem_to_smem (!%p2548_p5), %s2555_s26, 16, %s2495_s9, [#allocation4]  }
  0x49   : > { %2450 = dma.done.wait (%p2532_p2), [#allocation3], 4096  }
  0x4a   : > { %2452 = vsyncadd (%p2532_p2), [#allocation3], 4294963200 }
  0x4b   : > { %2454 = dma.done.wait (%p2532_p2), [#allocation6], 4096  }
  0x4c   : > { %2456 = vsyncadd (%p2532_p2), [#allocation6], 4294963200 }
  0x4d   : > { %2458 = dma.done.wait (%p2532_p2), [#allocation4], 16  }
  0x4e   : > { %2460 = vsyncadd (%p2532_p2), [#allocation4], 4294967280 }
  0x4f   : > { %212 = sfence }
  0x50   : > { %s1873_s20 = sshll.u32 %s1862_s18, 3  ;;  %v2166_v20 = vld [vmem:[#allocation2 + $0x4] ss:$16 sps:$4 sm:$0xff]   ;;  %v2168_v21 = vld [vmem:[#allocation2 + $0xc] ss:$16 sps:$4 sm:$0xff]   ;;  %s749_s18 = sld [smem:[#allocation7]] }
  0x51   : > { %p234_p3 = scmp.lt.s32.totalorder %s1873_s20, 15  ;;  %v2170_v22 = vld [vmem:[#allocation2] ss:$16 sps:$4 sm:$0xff]   ;;  %v2171_v23 = vld [vmem:[#allocation2 + $0x8] ss:$16 sps:$4 sm:$0xff]   ;;  %603 = vmatprep.subr.bf16.mxu0 %v2166_v20  ;;  %676 = vmatprep.subr.bf16.mxu1 %v2168_v21  ;;  %s1941_s19 = sld [smem:[#allocation7 + $0x1]] }
  0x52   : > { %604 = vmatpush1.bf16.msra.mxu0 %v2170_v22  ;;  %677 = vmatpush1.bf16.msra.mxu1 %v2171_v23  ;;  %v2190_v20 = vld [vmem:[#allocation2 + $0x84] ss:$16 sps:$4 sm:$0xff]   ;;  %v2192_v21 = vld [vmem:[#allocation2 + $0x8c] ss:$16 sps:$4 sm:$0xff]   ;;  %v2194_v22 = vld [vmem:[#allocation2 + $0x80] ss:$16 sps:$4 sm:$0xff]  }
  0x53   : > { %s3328_s20 = smov (!%p234_p3, %s1873_s20), 15  ;;  %v2195_v23 = vld [vmem:[#allocation2 + $0x88] ss:$16 sps:$4 sm:$0xff]  }
  0x54   : > { %s1874_s22 = sshll.u32 %s3328_s20, 2 }
  0x55   : > { %s237_s6 = scalar_lea.vmem %s3308_s0, %s1874_s22  ;;  %s3281_s12 = scalar_lea.vmem %s3312_s4, %s1874_s22 }
  0x56   : > { %v1961_v0 = vld [vmem:[%s237_s6] sm:$0xff]   ;;  %v1996_v1 = vld [vmem:[%s237_s6 + $0x8] sm:$0xff]   ;;  %v1997_v6 = vld [vmem:[%s237_s6 + $0x10] sm:$0xff]  }
  0x57   : > { %v2642_v2 = vunpack.c.l.bf16 %v1961_v0  ;;  %v2644_v3 = vunpack.c.l.bf16 %v1996_v1  ;;  %v2646_v4 = vunpack.c.h.bf16 %v1961_v0  ;;  %v2648_v5 = vunpack.c.h.bf16 %v1996_v1  ;;  %v1998_v9 = vld [vmem:[%s237_s6 + $0x18] sm:$0xff]  }
  0x58   : > { %v2658_v12 = vunpack.c.l.bf16 %v1997_v6  ;;  %v2660_v13 = vunpack.c.h.bf16 %v1997_v6  ;;  %v2666_v16 = vunpack.c.l.bf16 %v1998_v9  ;;  %v2668_v17 = vunpack.c.h.bf16 %v1998_v9  ;;  %v2174_v9 = vld [vmem:[#allocation2 + $0x2c] ss:$16 sps:$4 sm:$0xff]  }
  0x59   : > { %v262_v7 = vmul.f32 %v2642_v2, %v2642_v2  ;;  %v264_v8 = vmul.f32 %v2644_v3, %v2644_v3  ;;  %v263_v10 = vmul.f32 %v2646_v4, %v2646_v4  ;;  %v265_v11 = vmul.f32 %v2648_v5, %v2648_v5  ;;  %678 = vmatprep.subr.bf16.mxu1 %v2174_v9 }
  0x5a   : > { %v266_v14 = vmul.f32 %v2658_v12, %v2658_v12  ;;  %v267_v15 = vmul.f32 %v2660_v13, %v2660_v13  ;;  %v268_v18 = vmul.f32 %v2666_v16, %v2666_v16  ;;  %v269_v19 = vmul.f32 %v2668_v17, %v2668_v17 }
  0x5b   : > { %270 = vadd.xlane.f32.xlu0 %v262_v7  ;;  %274 = vadd.xlane.f32.xlu1 %v264_v8  ;;  %v2172_v8 = vld [vmem:[#allocation2 + $0x24] ss:$16 sps:$4 sm:$0xff]  }
  0x5c   : > { %605 = vmatprep.subr.bf16.mxu0 %v2172_v8 }
  0x5f   : > { %272 = vadd.xlane.f32.xlu0 %v263_v10  ;;  %276 = vadd.xlane.f32.xlu1 %v265_v11  ;;  %v2176_v10 = vld [vmem:[#allocation2 + $0x20] ss:$16 sps:$4 sm:$0xff]   ;;  %v2177_v11 = vld [vmem:[#allocation2 + $0x28] ss:$16 sps:$4 sm:$0xff]  }
  0x60   : > { %606 = vmatpush1.bf16.msra.mxu0 %v2176_v10  ;;  %679 = vmatpush1.bf16.msra.mxu1 %v2177_v11 }
  0x63   : > { %278 = vadd.xlane.f32.xlu0 %v266_v14  ;;  %280 = vadd.xlane.f32.xlu1 %v267_v15  ;;  %v2182_v14 = vld [vmem:[#allocation2 + $0x40] ss:$16 sps:$4 sm:$0xff]   ;;  %v2183_v15 = vld [vmem:[#allocation2 + $0x48] ss:$16 sps:$4 sm:$0xff]  }
  0x67   : > { %282 = vadd.xlane.f32.xlu0 %v268_v18  ;;  %284 = vadd.xlane.f32.xlu1 %v269_v19  ;;  %v2188_v18 = vld [vmem:[#allocation2 + $0x60] ss:$16 sps:$4 sm:$0xff]   ;;  %v2189_v19 = vld [vmem:[#allocation2 + $0x68] ss:$16 sps:$4 sm:$0xff]  }
  0xe8   : > { %v271_v24 = vpop.xlane.xlu0 %270  ;;  %v275_v25 = vpop.xlane.xlu1 %274 }
  0xe9   : > { %v287_v26 = vmul.f32 0.0078125, %v271_v24  ;;  %v289_v27 = vmul.f32 0.0078125, %v275_v25  ;;  %v2196_v24 = vld [vmem:[#allocation2 + $0xa4] ss:$16 sps:$4 sm:$0xff]   ;;  %v2198_v25 = vld [vmem:[#allocation2 + $0xac] ss:$16 sps:$4 sm:$0xff]  }
  0xeb   : > { %v295_v28 = vadd.f32 1e-06, %v287_v26  ;;  %v297_v29 = vadd.f32 1e-06, %v289_v27  ;;  %v2200_v26 = vld [vmem:[#allocation2 + $0xa0] ss:$16 sps:$4 sm:$0xff]  }
  0xec   : > { %v273_v30 = vpop.xlane.xlu0 %272  ;;  %v277_v31 = vpop.xlane.xlu1 %276  ;;  %v2201_v27 = vld [vmem:[#allocation2 + $0xa8] ss:$16 sps:$4 sm:$0xff]  }
  0xed   : > { %2246 = vrsqrt.f32 %v295_v28  ;;  %v288_v32 = vmul.f32 0.0078125, %v273_v30  ;;  %v290_v33 = vmul.f32 0.0078125, %v277_v31  ;;  %v2202_v28 = vld [vmem:[#allocation2 + $0xc4] ss:$16 sps:$4 sm:$0xff]   ;;  %v2206_v30 = vld [vmem:[#allocation2 + $0xc0] ss:$16 sps:$4 sm:$0xff]  }
  0xee   : > { %2248 = vrsqrt.f32 %v297_v29  ;;  %v2204_v29 = vld [vmem:[#allocation2 + $0xcc] ss:$16 sps:$4 sm:$0xff]   ;;  %v2207_v31 = vld [vmem:[#allocation2 + $0xc8] ss:$16 sps:$4 sm:$0xff]  }
  0xef   : > { %v296_v34 = vadd.f32 1e-06, %v288_v32  ;;  %v298_v35 = vadd.f32 1e-06, %v290_v33  ;;  %v2208_v32 = vld [vmem:[#allocation2 + $0xe4] ss:$16 sps:$4 sm:$0xff]  }
  0xf0   : > { %v279_v36 = vpop.xlane.xlu0 %278  ;;  %v281_v37 = vpop.xlane.xlu1 %280  ;;  %v2210_v33 = vld [vmem:[#allocation2 + $0xec] ss:$16 sps:$4 sm:$0xff]  }
  0xf1   : > { %2250 = vrsqrt.f32 %v296_v34  ;;  %v291_v38 = vmul.f32 0.0078125, %v279_v36  ;;  %v292_v39 = vmul.f32 0.0078125, %v281_v37  ;;  %v2212_v34 = vld [vmem:[#allocation2 + $0xe0] ss:$16 sps:$4 sm:$0xff]   ;;  %v2496_v36 = vmov 0  }
  0xf2   : > { %2252 = vrsqrt.f32 %v298_v35  ;;  %v2213_v35 = vld [vmem:[#allocation2 + $0xe8] ss:$16 sps:$4 sm:$0xff]   ;;  %635 = vmatprep.mubr.bf16.mxu0 %v2496_v36  ;;  %708 = vmatprep.mubr.bf16.mxu1 %v2496_v36 }
  0xf3   : > { %v299_v40 = vadd.f32 1e-06, %v291_v38  ;;  %v300_v41 = vadd.f32 1e-06, %v292_v39 }
  0xf4   : > { %v283_v42 = vpop.xlane.xlu0 %282  ;;  %v285_v43 = vpop.xlane.xlu1 %284 }
  0xf5   : > { %2254 = vrsqrt.f32 %v299_v40  ;;  %v293_v44 = vmul.f32 0.0078125, %v283_v42  ;;  %v294_v45 = vmul.f32 0.0078125, %v285_v43 }
  0xf6   : > { %2256 = vrsqrt.f32 %v300_v41 }
  0xf7   : > { %v2247_v46 = vpop.eup %2246  ;;  %v301_v47 = vadd.f32 1e-06, %v293_v44  ;;  %v302_v48 = vadd.f32 1e-06, %v294_v45 }
  0xf8   : > { %v2249_v49 = vpop.eup %2248  ;;  %v2675_v50 = vmul.f32 %v2247_v46, %v2642_v2 }
  0xf9   : > { %2258 = vrsqrt.f32 %v301_v47  ;;  %v2678_v51 = vmul.f32 %v2249_v49, %v2644_v3 }
  0xfa   : > { %2260 = vrsqrt.f32 %v302_v48  ;;  %v319_v52 = vand.u32 2147483647, %v2675_v50 }
  0xfb   : > { %v2251_v53 = vpop.eup %2250  ;;  %v321_v55 = vand.u32 2147483647, %v2678_v51 }
  0xfc   : > { %v2253_v54 = vpop.eup %2252  ;;  %327 = vmax.xlane.f32.xlu0 %v319_v52  ;;  %v2683_v56 = vmul.f32 %v2251_v53, %v2646_v4 }
  0xfd   : > { %v2686_v57 = vmul.f32 %v2253_v54, %v2648_v5 }
  0xfe   : > { %v320_v58 = vand.u32 2147483647, %v2683_v56 }
  0xff   : > { %v2255_v59 = vpop.eup %2254  ;;  %v322_v61 = vand.u32 2147483647, %v2686_v57 }
 0x100   : > { %v2257_v60 = vpop.eup %2256  ;;  %331 = vmax.xlane.f32.xlu0 %v321_v55  ;;  %329 = vmax.xlane.f32.xlu1 %v320_v58  ;;  %v2691_v62 = vmul.f32 %v2255_v59, %v2658_v12  ;;  %v2178_v12 = vld [vmem:[#allocation2 + $0x44] ss:$16 sps:$4 sm:$0xff]  }
 0x101   : > { %v2694_v63 = vmul.f32 %v2257_v60, %v2660_v13  ;;  %v2180_v13 = vld [vmem:[#allocation2 + $0x4c] ss:$16 sps:$4 sm:$0xff]   ;;  %607 = vmatprep.subr.bf16.mxu0 %v2178_v12 }
 0x102   : > { %v323_v0 = vand.u32 2147483647, %v2691_v62  ;;  %680 = vmatprep.subr.bf16.mxu1 %v2180_v13  ;;  %608 = vmatpush1.bf16.msra.mxu0 %v2182_v14 }
 0x103   : > { %v2259_v1 = vpop.eup %2258  ;;  %v324_v3 = vand.u32 2147483647, %v2694_v63  ;;  %681 = vmatpush1.bf16.msra.mxu1 %v2183_v15 }
 0x104   : > { %v2261_v2 = vpop.eup %2260  ;;  %333 = vmax.xlane.f32.xlu1 %v322_v61  ;;  %335 = vmax.xlane.f32.xlu0 %v323_v0  ;;  %v2699_v4 = vmul.f32 %v2259_v1, %v2666_v16  ;;  %v2184_v16 = vld [vmem:[#allocation2 + $0x64] ss:$16 sps:$4 sm:$0xff]  }
 0x105   : > { %v2702_v5 = vmul.f32 %v2261_v2, %v2668_v17  ;;  %v2186_v17 = vld [vmem:[#allocation2 + $0x6c] ss:$16 sps:$4 sm:$0xff]   ;;  %609 = vmatprep.subr.bf16.mxu0 %v2184_v16 }
 0x106   : > { %v325_v6 = vand.u32 2147483647, %v2699_v4  ;;  %682 = vmatprep.subr.bf16.mxu1 %v2186_v17  ;;  %610 = vmatpush1.bf16.msra.mxu0 %v2188_v18 }
 0x107   : > { %v326_v7 = vand.u32 2147483647, %v2702_v5  ;;  %683 = vmatpush1.bf16.msra.mxu1 %v2189_v19  ;;  %611 = vmatprep.subr.bf16.mxu0 %v2190_v20 }
 0x108   : > { %337 = vmax.xlane.f32.xlu1 %v324_v3  ;;  %339 = vmax.xlane.f32.xlu0 %v325_v6 }
 0x109   : > { %684 = vmatprep.subr.bf16.mxu1 %v2192_v21 }
 0x10a   : > { %612 = vmatpush1.bf16.msra.mxu0 %v2194_v22 }
 0x10b   : > { %685 = vmatpush1.bf16.msra.mxu1 %v2195_v23  ;;  %613 = vmatprep.subr.bf16.mxu0 %v2196_v24 }
 0x10c   : > { %341 = vmax.xlane.f32.xlu1 %v326_v7  ;;  %686 = vmatprep.subr.bf16.mxu1 %v2198_v25 }
 0x10e   : > { %614 = vmatpush1.bf16.msra.mxu0 %v2200_v26 }
 0x10f   : > { %687 = vmatpush1.bf16.msra.mxu1 %v2201_v27  ;;  %615 = vmatprep.subr.bf16.mxu0 %v2202_v28 }
 0x110   : > { %688 = vmatprep.subr.bf16.mxu1 %v2204_v29 }
 0x112   : > { %616 = vmatpush1.bf16.msra.mxu0 %v2206_v30 }
 0x113   : > { %689 = vmatpush1.bf16.msra.mxu1 %v2207_v31  ;;  %617 = vmatprep.subr.bf16.mxu0 %v2208_v32 }
 0x114   : > { %690 = vmatprep.subr.bf16.mxu1 %v2210_v33 }
 0x116   : > { %618 = vmatpush1.bf16.msra.mxu0 %v2212_v34 }
 0x117   : > { %691 = vmatpush1.bf16.msra.mxu1 %v2213_v35 }
 0x189   : > { %v2708_v37 = vpop.xlane.xlu0 %327 }
 0x18a   : > { %v343_v38 = vmax.f32 %v2708_v37, 1e-05 }
 0x18c   : > { %2262 = vrcp.f32 %v343_v38 }
 0x18d   : > { %v2713_v39 = vpop.xlane.xlu1 %329  ;;  %v2715_v40 = vpop.xlane.xlu0 %331 }
 0x18e   : > { %v344_v41 = vmax.f32 %v2713_v39, 1e-05  ;;  %v345_v42 = vmax.f32 %v2715_v40, 1e-05 }
 0x190   : > { %2264 = vrcp.f32 %v344_v41 }
 0x191   : > { %2266 = vrcp.f32 %v345_v42  ;;  %v2723_v43 = vpop.xlane.xlu1 %333  ;;  %v2725_v44 = vpop.xlane.xlu0 %335 }
 0x192   : > { %v346_v45 = vmax.f32 %v2723_v43, 1e-05  ;;  %v347_v46 = vmax.f32 %v2725_v44, 1e-05 }
 0x194   : > { %2268 = vrcp.f32 %v346_v45 }
 0x195   : > { %2270 = vrcp.f32 %v347_v46  ;;  %v2733_v47 = vpop.xlane.xlu1 %337  ;;  %v2736_v53 = vpop.xlane.xlu0 %339 }
 0x196   : > { %v2263_v48 = vpop.eup %2262  ;;  %v348_v49 = vmax.f32 %v2733_v47, 1e-05  ;;  %v349_v59 = vmax.f32 %v2736_v53, 1e-05 }
 0x197   : > { %v352_v52 = vmul.f32 127.0, %v2263_v48 }
 0x198   : > { %2272 = vrcp.f32 %v348_v49  ;;  %v405_v39 = vmul.f32 0.007874016, %v349_v59 }
 0x199   : > { %v367_v54 = vmul.f32 %v352_v52, %v2675_v50  ;;  %v2741_v55 = vpop.xlane.xlu1 %341 }
 0x19a   : > { %v2265_v58 = vpop.eup %2264  ;;  %v350_v60 = vmax.f32 %v2741_v55, 1e-05 }
 0x19b   : > { %v2267_v61 = vpop.eup %2266  ;;  %v354_v0 = vmul.f32 127.0, %v2265_v58  ;;  %v2082_v1 = vround.rtne.f32 %v367_v54 }
 0x19c   : > { %v356_v2 = vmul.f32 127.0, %v2267_v61  ;;  %2274 = vrcp.f32 %v350_v60 }
 0x19d   : > { %v368_v3 = vmul.f32 %v354_v0, %v2683_v56  ;;  %2276 = vrcp.f32 %v349_v59  ;;  %v383_v50 = vmax.f32 %v2082_v1, -128.0  ;;  %v399_v0 = vmul.f32 0.007874016, %v343_v38 }
 0x19e   : > { %v2269_v6 = vpop.eup %2268  ;;  %v369_v8 = vmul.f32 %v356_v2, %v2678_v51  ;;  %v750_v1 = vstv %s749_s18 }
 0x19f   : > { %v2271_v7 = vpop.eup %2270  ;;  %v358_v9 = vmul.f32 127.0, %v2269_v6  ;;  %v2083_v10 = vround.rtne.f32 %v368_v3  ;;  %v391_v15 = vmin.f32 %v383_v50, 127.0  ;;  %v751_v2 = vmul.f32 %v750_v1, %v399_v0 }
 0x1a0   : > { %v360_v14 = vmul.f32 127.0, %v2271_v7  ;;  %v2084_v18 = vround.rtne.f32 %v369_v8  ;;  %v400_v3 = vmul.f32 0.007874016, %v344_v41  ;;  %v401_v6 = vmul.f32 0.007874016, %v345_v42 }
 0x1a1   : > { %v370_v11 = vmul.f32 %v358_v9, %v2686_v57  ;;  %v384_v12 = vmax.f32 %v2083_v10, -128.0  ;;  %v403_v8 = vmul.f32 0.007874016, %v347_v46  ;;  %v2782_v55 = vmul.f32 %v750_v1, %v405_v39 }
 0x1a2   : > { %v2273_v13 = vpop.eup %2272  ;;  %v371_v23 = vmul.f32 %v360_v14, %v2691_v62  ;;  %v385_v51 = vmax.f32 %v2084_v18, -128.0 }
 0x1a3   : > { %v362_v16 = vmul.f32 127.0, %v2273_v13  ;;  %v392_v17 = vmin.f32 %v384_v12, 127.0  ;;  %v2085_v56 = vround.rtne.f32 %v370_v11  ;;  %v404_v11 = vmul.f32 0.007874016, %v348_v49 }
 0x1a4   : > { %v393_v28 = vmin.f32 %v385_v51, 127.0  ;;  %v2086_v29 = vround.rtne.f32 %v371_v23  ;;  %v406_v12 = vmul.f32 0.007874016, %v350_v60  ;;  %v753_v13 = vmul.f32 %v750_v1, %v401_v6 }
 0x1a5   : > { %v372_v19 = vmul.f32 %v362_v16, %v2694_v63  ;;  %v407_v20 = vpack.c.bf16 %v392_v17, %v391_v15  ;;  %v386_v21 = vmax.f32 %v2085_v56, -128.0  ;;  %v2778_v17 = vmul.f32 %v750_v1, %v403_v8 }
 0x1a6   : > { %v2275_v22 = vpop.eup %2274  ;;  %v387_v32 = vmax.f32 %v2086_v29, -128.0  ;;  %v2780_v18 = vmul.f32 %v750_v1, %v404_v11  ;;  %v2784_v60 = vmul.f32 %v750_v1, %v406_v12 }
 0x1a7   : > { %636 = vmatmul.mubr.bf16.vlgmr.msra.gmra.mrb[0].mxu0 %v407_v20  ;;  %709 = vmatmul.mubr.bf16.vlgmr.msra.gmra.mrb[0].mxu1 %v407_v20  ;;  %v2277_v24 = vpop.eup %2276  ;;  %v366_v57 = vmul.f32 127.0, %v2275_v22  ;;  %v394_v25 = vmin.f32 %v386_v21, 127.0  ;;  %v2087_v26 = vround.rtne.f32 %v372_v19 }
 0x1a8   : > { %645 = vmatprep.mubr.bf16.mxu0 %v2496_v36  ;;  %718 = vmatprep.mubr.bf16.mxu1 %v2496_v36  ;;  %v364_v27 = vmul.f32 127.0, %v2277_v24  ;;  %v395_v35 = vmin.f32 %v387_v32, 127.0 }
 0x1a9   : > { %v374_v63 = vmul.f32 %v366_v57, %v2702_v5  ;;  %v408_v30 = vpack.c.bf16 %v394_v25, %v393_v28  ;;  %v388_v31 = vmax.f32 %v2087_v26, -128.0 }
 0x1aa   : > { %v373_v62 = vmul.f32 %v364_v27, %v2699_v4 }
 0x1ab   : > { %v396_v33 = vmin.f32 %v388_v31, 127.0  ;;  %v2089_v34 = vround.rtne.f32 %v374_v63 }
 0x1ac   : > { %v2088_v48 = vround.rtne.f32 %v373_v62 }
 0x1ad   : > { %v409_v52 = vpack.c.bf16 %v396_v33, %v395_v35  ;;  %v390_v54 = vmax.f32 %v2089_v34, -128.0 }
 0x1ae   : > { %v389_v5 = vmax.f32 %v2088_v48, -128.0 }
 0x1af   : > { %646 = vmatmul.mubr.bf16.gmra.mrb[4].mxu0 %v408_v30  ;;  %719 = vmatmul.mubr.bf16.gmra.mrb[4].mxu1 %v408_v30  ;;  %v398_v4 = vmin.f32 %v390_v54, 127.0 }
 0x1b0   : > { %655 = vmatprep.mubr.bf16.mxu0 %v2496_v36  ;;  %728 = vmatprep.mubr.bf16.mxu1 %v2496_v36  ;;  %v397_v58 = vmin.f32 %v389_v5, 127.0 }
 0x1b2   : > { %v410_v61 = vpack.c.bf16 %v398_v4, %v397_v58 }
 0x1b7   : > { %656 = vmatmul.mubr.bf16.gmra.mrb[8].mxu0 %v409_v52  ;;  %729 = vmatmul.mubr.bf16.gmra.mrb[8].mxu1 %v409_v52 }
 0x1b8   : > { %665 = vmatprep.mubr.bf16.mxu0 %v2496_v36  ;;  %738 = vmatprep.mubr.bf16.mxu1 %v2496_v36  ;;  %v402_v36 = vmul.f32 0.007874016, %v346_v45  ;;  %v752_v45 = vmul.f32 %v750_v1, %v400_v3 }
 0x1ba   : > { %v754_v14 = vmul.f32 %v750_v1, %v402_v36 }
 0x1bf   : > { %666 = vmatmul.mubr.bf16.gmra.mrb[12].mxu0 %v410_v61  ;;  %739 = vmatmul.mubr.bf16.gmra.mrb[12].mxu1 %v410_v61 }
 0x27a   : > { %v637_v50 = vpop.f32.mrb[0].mxu0  ;;  %v710_v7 = vpop.f32.mrb[0].mxu1 }
 0x27b   : > { %v759_v9 = vmul.f32 %v751_v2, %v637_v50  ;;  %v761_v10 = vmul.f32 %v751_v2, %v710_v7  ;;  %v639_v37 = vpop.f32.mrb[1].mxu0  ;;  %v712_v38 = vpop.f32.mrb[1].mxu1 }
 0x27c   : > { %v760_v40 = vmul.f32 %v751_v2, %v639_v37  ;;  %v762_v41 = vmul.f32 %v751_v2, %v712_v38  ;;  %v641_v42 = vpop.f32.mrb[2].mxu0  ;;  %v714_v43 = vpop.f32.mrb[2].mxu1 }
 0x27d   : > { %v823_v44 = vmul.f32 0.70710677, %v759_v9  ;;  %v825_v46 = vmul.f32 0.70710677, %v761_v10  ;;  %v763_v47 = vmul.f32 %v752_v45, %v641_v42  ;;  %v765_v49 = vmul.f32 %v752_v45, %v714_v43  ;;  %v643_v53 = vpop.f32.mrb[3].mxu0  ;;  %v716_v59 = vpop.f32.mrb[3].mxu1 }
 0x27e   : > { %v824_v15 = vmul.f32 0.70710677, %v760_v40  ;;  %v826_v16 = vmul.f32 0.70710677, %v762_v41  ;;  %v764_v56 = vmul.f32 %v752_v45, %v643_v53  ;;  %v766_v19 = vmul.f32 %v752_v45, %v716_v59 }
 0x27f   : > { %2278 = verf.f32 %v823_v44  ;;  %v827_v20 = vmul.f32 0.70710677, %v763_v47  ;;  %v791_v21 = vmul.f32 0.5, %v759_v9  ;;  %v829_v22 = vmul.f32 0.70710677, %v765_v49 }
 0x280   : > { %2280 = verf.f32 %v825_v46  ;;  %v828_v23 = vmul.f32 0.70710677, %v764_v56  ;;  %v2786_v24 = vmul.f32 0.5, %v761_v10  ;;  %v830_v57 = vmul.f32 0.70710677, %v766_v19 }
 0x281   : > { %2282 = verf.f32 %v824_v15  ;;  %v792_v28 = vmul.f32 0.5, %v760_v40  ;;  %v2788_v62 = vmul.f32 0.5, %v762_v41  ;;  %v795_v48 = vmul.f32 0.5, %v763_v47 }
 0x282   : > { %2284 = verf.f32 %v826_v16  ;;  %v647_v51 = vpop.f32.mrb[4].mxu0  ;;  %v720_v26 = vpop.f32.mrb[4].mxu1  ;;  %v2790_v52 = vmul.f32 0.5, %v765_v49  ;;  %v2792_v4 = vmul.f32 0.5, %v764_v56  ;;  %v2794_v6 = vmul.f32 0.5, %v766_v19 }
 0x283   : > { %2286 = verf.f32 %v827_v20  ;;  %v767_v25 = vmul.f32 %v753_v13, %v647_v51  ;;  %v649_v27 = vpop.f32.mrb[5].mxu0  ;;  %v769_v29 = vmul.f32 %v753_v13, %v720_v26  ;;  %v722_v30 = vpop.f32.mrb[5].mxu1 }
 0x284   : > { %2288 = verf.f32 %v829_v22  ;;  %v768_v63 = vmul.f32 %v753_v13, %v649_v27  ;;  %v651_v31 = vpop.f32.mrb[6].mxu0  ;;  %v770_v33 = vmul.f32 %v753_v13, %v722_v30  ;;  %v724_v34 = vpop.f32.mrb[6].mxu1 }
 0x285   : > { %2290 = verf.f32 %v828_v23  ;;  %v831_v32 = vmul.f32 0.70710677, %v767_v25  ;;  %v653_v35 = vpop.f32.mrb[7].mxu0  ;;  %v833_v54 = vmul.f32 0.70710677, %v769_v29  ;;  %v726_v5 = vpop.f32.mrb[7].mxu1  ;;  %v771_v0 = vmul.f32 %v754_v14, %v651_v31 }
 0x286   : > { %2292 = verf.f32 %v830_v57  ;;  %v832_v58 = vmul.f32 0.70710677, %v768_v63  ;;  %v834_v61 = vmul.f32 0.70710677, %v770_v33  ;;  %v773_v1 = vmul.f32 %v754_v14, %v724_v34 }
 0x287   : > { %2294 = verf.f32 %v831_v32  ;;  %v772_v2 = vmul.f32 %v754_v14, %v653_v35  ;;  %v2796_v36 = vmul.f32 0.5, %v767_v25  ;;  %v774_v50 = vmul.f32 %v754_v14, %v726_v5 }
 0x288   : > { %2296 = verf.f32 %v833_v54  ;;  %v2798_v9 = vmul.f32 0.5, %v769_v29  ;;  %v835_v10 = vmul.f32 0.70710677, %v771_v0  ;;  %v2800_v40 = vmul.f32 0.5, %v768_v63 }
 0x289   : > { %v2279_v3 = vpop.eup %2278  ;;  %2298 = verf.f32 %v832_v58  ;;  %v2802_v41 = vmul.f32 0.5, %v770_v33  ;;  %v837_v42 = vmul.f32 0.70710677, %v773_v1  ;;  %v2804_v44 = vmul.f32 0.5, %v771_v0 }
 0x28a   : > { %v2281_v7 = vpop.eup %2280  ;;  %v887_v8 = vadd.f32 1.0, %v2279_v3  ;;  %2300 = verf.f32 %v834_v61  ;;  %v657_v37 = vpop.f32.mrb[8].mxu0  ;;  %v836_v46 = vmul.f32 0.70710677, %v772_v2  ;;  %v2808_v49 = vmul.f32 0.5, %v773_v1 }
 0x28b   : > { %v730_v38 = vpop.f32.mrb[8].mxu1  ;;  %v2283_v11 = vpop.eup %2282  ;;  %v889_v39 = vadd.f32 1.0, %v2281_v7  ;;  %2302 = verf.f32 %v835_v10  ;;  %v2816_v22 = vmul.f32 0.5, %v772_v2  ;;  %v838_v25 = vmul.f32 0.70710677, %v774_v50 }
 0x28c   : > { %v659_v43 = vpop.f32.mrb[9].mxu0  ;;  %v2285_v45 = vpop.eup %2284  ;;  %v888_v12 = vadd.f32 1.0, %v2283_v11  ;;  %v2806_v16 = vmul.f32 %v887_v8, %v791_v21  ;;  %2304 = verf.f32 %v837_v42  ;;  %v775_v26 = vmul.f32 %v2778_v17, %v657_v37 }
 0x28d   : > { %v732_v13 = vpop.f32.mrb[9].mxu1  ;;  %v661_v14 = vpop.f32.mrb[10].mxu0  ;;  %v890_v47 = vadd.f32 1.0, %v2285_v45  ;;  %2306 = verf.f32 %v836_v46  ;;  %v2821_v21 = vmul.f32 %v889_v39, %v2786_v24  ;;  %v777_v30 = vmul.f32 %v2778_v17, %v730_v38 }
 0x28e   : > { %v2287_v15 = vpop.eup %2286  ;;  %v2810_v53 = vpop.f32.mrb[10].mxu1  ;;  %v2814_v19 = vmul.f32 %v888_v12, %v792_v28  ;;  %v2826_v28 = vmul.f32 0.5, %v774_v50  ;;  %v2831_v32 = vmul.f32 %v2806_v16, %v2806_v16  ;;  %2308 = verf.f32 %v838_v25 }
 0x28f   : > { %v2812_v59 = vpop.f32.mrb[11].mxu0  ;;  %v2289_v56 = vpop.eup %2288  ;;  %v891_v20 = vadd.f32 1.0, %v2287_v15  ;;  %v2834_v24 = vmul.f32 %v890_v47, %v2788_v62  ;;  %v839_v5 = vmul.f32 0.70710677, %v775_v26  ;;  %v2848_v2 = vmul.f32 0.5, %v775_v26 }
 0x290   : > { %v2818_v23 = vpop.f32.mrb[11].mxu1  ;;  %v2291_v51 = vpop.eup %2290  ;;  %v893_v57 = vadd.f32 1.0, %v2289_v56  ;;  %v2838_v35 = vmul.f32 %v2814_v19, %v2814_v19  ;;  %v841_v3 = vmul.f32 0.70710677, %v777_v30  ;;  %v776_v42 = vmul.f32 %v2778_v17, %v659_v43 }
 0x291   : > { %v2293_v27 = vpop.eup %2292  ;;  %v2824_v29 = vmul.f32 %v891_v20, %v795_v48  ;;  %v892_v63 = vadd.f32 1.0, %v2291_v51  ;;  %2310 = verf.f32 %v839_v5  ;;  %v2874_v15 = vmul.f32 0.5, %v777_v30 }
 0x292   : > { %v2295_v31 = vpop.eup %2294  ;;  %v894_v33 = vadd.f32 1.0, %v2293_v27  ;;  %v2841_v48 = vmul.f32 %v893_v57, %v2790_v52  ;;  %v667_v58 = vpop.f32.mrb[12].mxu0  ;;  %2312 = verf.f32 %v841_v3  ;;  %v778_v47 = vmul.f32 %v2778_v17, %v732_v13 }
 0x293   : > { %v2297_v34 = vpop.eup %2296  ;;  %v895_v54 = vadd.f32 1.0, %v2295_v31  ;;  %v2843_v61 = vpop.f32.mrb[12].mxu1  ;;  %v2846_v1 = vmul.f32 %v892_v63, %v2792_v4  ;;  %v2854_v52 = vmul.f32 %v2824_v29, %v2824_v29  ;;  %v779_v56 = vmul.f32 %v2780_v18, %v661_v14 }
 0x294   : > { %v2299_v0 = vpop.eup %2298  ;;  %v897_v62 = vadd.f32 1.0, %v2297_v34  ;;  %v669_v50 = vpop.f32.mrb[13].mxu0  ;;  %v2864_v11 = vmul.f32 %v894_v33, %v2794_v6  ;;  %v840_v57 = vmul.f32 0.70710677, %v776_v42  ;;  %v842_v13 = vmul.f32 0.70710677, %v778_v47 }
 0x295   : > { %v2850_v7 = vpop.f32.mrb[13].mxu1  ;;  %v2301_v8 = vpop.eup %2300  ;;  %v2857_v10 = vmul.f32 %v895_v54, %v2796_v36  ;;  %v896_v37 = vadd.f32 1.0, %v2299_v0  ;;  %v2880_v20 = vmul.f32 %v2846_v1, %v2846_v1  ;;  %v808_v63 = vmul.f32 0.5, %v776_v42 }
 0x296   : > { %v2859_v38 = vpop.f32.mrb[14].mxu0  ;;  %v2861_v4 = vpop.f32.mrb[14].mxu1  ;;  %v898_v39 = vadd.f32 1.0, %v2301_v8  ;;  %v2883_v43 = vmul.f32 %v897_v62, %v2798_v9  ;;  %2314 = verf.f32 %v840_v57  ;;  %v843_v30 = vmul.f32 0.70710677, %v779_v56 }
 0x297   : > { %v2867_v45 = vpop.f32.mrb[15].mxu0  ;;  %v2869_v12 = vpop.f32.mrb[15].mxu1  ;;  %v2872_v36 = vmul.f32 %v896_v37, %v2800_v40  ;;  %v2887_v40 = vmul.f32 %v2857_v10, %v2857_v10  ;;  %2316 = verf.f32 %v842_v13  ;;  %v781_v31 = vmul.f32 %v2780_v18, %v2810_v53 }
 0x298   : > { %v2303_v46 = vpop.eup %2302  ;;  %v2890_v26 = vmul.f32 %v898_v39, %v2802_v41  ;;  %v810_v34 = vmul.f32 0.5, %v778_v47  ;;  %v782_v54 = vmul.f32 %v2780_v18, %v2818_v23  ;;  %v811_v0 = vmul.f32 0.5, %v779_v56 }
 0x299   : > { %v2305_v6 = vpop.eup %2304  ;;  %v899_v51 = vadd.f32 1.0, %v2303_v46  ;;  %v2897_v9 = vmul.f32 %v2872_v36, %v2872_v36  ;;  %2318 = verf.f32 %v843_v30  ;;  %v845_v62 = vmul.f32 0.70710677, %v781_v31 }
 0x29a   : > { %v2307_v25 = vpop.eup %2306  ;;  %v901_v17 = vadd.f32 1.0, %v2305_v6  ;;  %v785_v42 = vmul.f32 %v2782_v55, %v2843_v61  ;;  %v784_v46 = vmul.f32 %v2782_v55, %v669_v50  ;;  %v2925_v56 = vmul.f32 0.5, %v782_v54 }
 0x29b   : > { %v2893_v14 = vmul.f32 %v899_v51, %v2804_v44  ;;  %v900_v27 = vadd.f32 1.0, %v2307_v25  ;;  %v2309_v33 = vpop.eup %2308  ;;  %v780_v44 = vmul.f32 %v2780_v18, %v2812_v59  ;;  %2320 = verf.f32 %v845_v62 }
 0x29c   : > { %v2909_v5 = vmul.f32 %v901_v17, %v2808_v49  ;;  %v902_v3 = vadd.f32 1.0, %v2309_v33  ;;  %v2311_v37 = vpop.eup %2310  ;;  %v846_v18 = vmul.f32 0.70710677, %v782_v54  ;;  %v783_v49 = vmul.f32 %v2782_v55, %v667_v58 }
 0x29d   : > { %v2902_v41 = vmul.f32 %v900_v27, %v2816_v22  ;;  %v2913_v53 = vmul.f32 %v2893_v14, %v2893_v14  ;;  %v2915_v22 = vmul.f32 0.5, %v781_v31  ;;  %v844_v8 = vmul.f32 0.70710677, %v780_v44  ;;  %v2313_v23 = vpop.eup %2312 }
 0x29e   : > { %v903_v39 = vadd.f32 1.0, %v2311_v37  ;;  %v812_v47 = vmul.f32 0.5, %v780_v44  ;;  %v847_v6 = vmul.f32 0.70710677, %v783_v49  ;;  %v2928_v51 = vmul.f32 %v902_v3, %v2826_v28 }
 0x29f   : > { %v2919_v59 = vmul.f32 %v2902_v41, %v2902_v41  ;;  %2322 = verf.f32 %v844_v8  ;;  %v905_v58 = vadd.f32 1.0, %v2313_v23  ;;  %v849_v25 = vmul.f32 0.70710677, %v785_v42 }
 0x2a0   : > { %2324 = verf.f32 %v846_v18  ;;  %v2931_v57 = vmul.f32 %v903_v39, %v2848_v2  ;;  %v815_v17 = vmul.f32 0.5, %v783_v49  ;;  %v848_v13 = vmul.f32 0.70710677, %v784_v46  ;;  %v2315_v50 = vpop.eup %2314 }
 0x2a1   : > { %2326 = verf.f32 %v847_v6  ;;  %v786_v61 = vmul.f32 %v2782_v55, %v2850_v7  ;;  %v817_v27 = vmul.f32 0.5, %v785_v42  ;;  %v787_v30 = vmul.f32 %v2784_v60, %v2859_v38  ;;  %v2317_v31 = vpop.eup %2316 }
 0x2a2   : > { %2328 = verf.f32 %v849_v25  ;;  %v789_v28 = vmul.f32 %v2784_v60, %v2861_v4  ;;  %v904_v2 = vadd.f32 1.0, %v2315_v50  ;;  %v816_v33 = vmul.f32 0.5, %v784_v46 }
 0x2a3   : > { %2330 = verf.f32 %v848_v13  ;;  %v850_v44 = vmul.f32 0.70710677, %v786_v61  ;;  %v2941_v54 = vmul.f32 %v2931_v57, %v2931_v57  ;;  %v2944_v55 = vmul.f32 %v905_v58, %v2874_v15  ;;  %v2319_v3 = vpop.eup %2318 }
 0x2a4   : > { %v906_v7 = vadd.f32 1.0, %v2317_v31  ;;  %v851_v62 = vmul.f32 0.70710677, %v787_v30  ;;  %v2946_v8 = vmul.f32 %v904_v2, %v808_v63  ;;  %v853_v38 = vmul.f32 0.70710677, %v789_v28 }
 0x2a5   : > { %2332 = verf.f32 %v850_v44  ;;  %v788_v4 = vmul.f32 %v2784_v60, %v2867_v45  ;;  %v907_v37 = vadd.f32 1.0, %v2319_v3  ;;  %v2950_v18 = vmul.f32 0.5, %v786_v61  ;;  %v2321_v23 = vpop.eup %2320 }
 0x2a6   : > { %2334 = verf.f32 %v851_v62  ;;  %v790_v49 = vmul.f32 %v2784_v60, %v2869_v12  ;;  %v819_v15 = vmul.f32 0.5, %v787_v30  ;;  %v2954_v39 = vmul.f32 0.5, %v789_v28 }
 0x2a7   : > { %2336 = verf.f32 %v853_v38  ;;  %v852_v42 = vmul.f32 0.70710677, %v788_v4  ;;  %v2956_v46 = vmul.f32 %v906_v7, %v810_v34  ;;  %v2958_v6 = vmul.f32 %v907_v37, %v811_v0 }
 0x2a8   : > { %v909_v58 = vadd.f32 1.0, %v2321_v23  ;;  %v854_v45 = vmul.f32 0.70710677, %v790_v49  ;;  %v968_v13 = vmul.f32 %v2946_v8, %v2946_v8  ;;  %v820_v50 = vmul.f32 0.5, %v788_v4 }
 0x2a9   : > { %v2323_v63 = vpop.eup %2322  ;;  %2338 = verf.f32 %v852_v42  ;;  %v2962_v60 = vmul.f32 0.5, %v790_v49  ;;  %v953_v12 = vmul.f32 %v2821_v21, %v2821_v21  ;;  %v954_v34 = vmul.f32 %v2834_v24, %v2834_v24 }
 0x2aa   : > { %v2325_v25 = vpop.eup %2324  ;;  %v908_v61 = vadd.f32 1.0, %v2323_v63  ;;  %2340 = verf.f32 %v854_v45  ;;  %v971_v30 = vmul.f32 %v2958_v6, %v2958_v6  ;;  %v2971_v28 = vmul.f32 %v909_v58, %v2915_v22 }
 0x2ab   : > { %v2327_v0 = vpop.eup %2326  ;;  %v983_v2 = vadd.f32 %v2838_v35, %v2831_v32  ;;  %v910_v7 = vadd.f32 1.0, %v2325_v25  ;;  %v957_v3 = vmul.f32 %v2841_v48, %v2841_v48  ;;  %v988_v38 = vadd.f32 %v2880_v20, %v2854_v52 }
 0x2ac   : > { %v2973_v31 = vmul.f32 %v908_v61, %v812_v47  ;;  %v2329_v44 = vpop.eup %2328  ;;  %v911_v62 = vadd.f32 1.0, %v2327_v0  ;;  %v958_v22 = vmul.f32 %v2864_v11, %v2864_v11  ;;  %v961_v47 = vmul.f32 %v2883_v43, %v2883_v43 }
 0x2ad   : > { %v2331_v4 = vpop.eup %2330  ;;  %v913_v37 = vadd.f32 1.0, %v2329_v44  ;;  %v984_v49 = vadd.f32 %v983_v2, %v953_v12  ;;  %v989_v35 = vadd.f32 %v988_v38, %v957_v3  ;;  %v993_v42 = vadd.f32 %v2897_v9, %v2887_v40 }
 0x2ae   : > { %v2985_v23 = vmul.f32 %v911_v62, %v815_v17  ;;  %v912_v32 = vadd.f32 1.0, %v2331_v4  ;;  %v972_v52 = vmul.f32 %v2973_v31, %v2973_v31  ;;  %v962_v45 = vmul.f32 %v2890_v26, %v2890_v26 }
 0x2af   : > { %v2333_v63 = vpop.eup %2332  ;;  %v2991_v20 = vmul.f32 %v913_v37, %v817_v27  ;;  %v985_v58 = vadd.f32 %v984_v49, %v954_v34  ;;  %v990_v12 = vadd.f32 %v989_v35, %v958_v22  ;;  %v965_v0 = vmul.f32 %v2909_v5, %v2909_v5 }
 0x2b0   : > { %v2335_v25 = vpop.eup %2334  ;;  %v2995_v61 = vmul.f32 %v912_v32, %v816_v33  ;;  %v914_v17 = vadd.f32 1.0, %v2333_v63  ;;  %v994_v9 = vadd.f32 %v993_v42, %v961_v47  ;;  %v966_v27 = vmul.f32 %v2928_v51, %v2928_v51 }
 0x2b1   : > { %v2337_v2 = vpop.eup %2336  ;;  %v915_v40 = vadd.f32 1.0, %v2335_v25  ;;  %986 = vadd.xlane.f32.xlu0 %v985_v58  ;;  %v998_v34 = vadd.f32 %v2919_v59, %v2913_v53  ;;  %v975_v44 = vmul.f32 %v2985_v23, %v2985_v23  ;;  %991 = vadd.xlane.f32.xlu1 %v990_v12  ;;  %v969_v3 = vmul.f32 %v2944_v55, %v2944_v55 }
 0x2b2   : > { %v976_v33 = vmul.f32 %v2995_v61, %v2995_v61  ;;  %v917_v62 = vadd.f32 1.0, %v2337_v2  ;;  %v995_v37 = vadd.f32 %v994_v9, %v962_v45  ;;  %v1003_v22 = vadd.f32 %v968_v13, %v2941_v54 }
 0x2b3   : > { %v2339_v38 = vpop.eup %2338  ;;  %v3009_v4 = vmul.f32 %v915_v40, %v819_v15  ;;  %v999_v49 = vadd.f32 %v998_v34, %v965_v0  ;;  %v3013_v53 = vmul.f32 %v910_v7, %v2925_v56  ;;  %v3016_v59 = vmul.f32 %v914_v17, %v2950_v18 }
 0x2b4   : > { %v2341_v47 = vpop.eup %2340  ;;  %v916_v32 = vadd.f32 1.0, %v2339_v38  ;;  %v970_v35 = vmul.f32 %v2956_v46, %v2956_v46  ;;  %v3021_v42 = vmul.f32 %v917_v62, %v2954_v39  ;;  %v1004_v58 = vadd.f32 %v1003_v22, %v969_v3  ;;  %v2216_v62 = vld [vmem:[#allocation5] sm:$0xff]   ;;  %v2218_v38 = vld [vmem:[#allocation5 + $0x48] sm:$0xff]  }
 0x2b5   : > { %v918_v15 = vadd.f32 1.0, %v2341_v47  ;;  %996 = vadd.xlane.f32.xlu0 %v995_v37  ;;  %v1000_v63 = vadd.f32 %v999_v49, %v966_v27  ;;  %v979_v54 = vmul.f32 %v3009_v4, %v3009_v4  ;;  %v973_v56 = vmul.f32 %v2971_v28, %v2971_v28  ;;  %v2217_v3 = vld [vmem:[#allocation5 + $0x80] sm:$0xff]   ;;  %v2219_v37 = vld [vmem:[#allocation5 + $0xc8] sm:$0xff]  }
 0x2b6   : > { %v3025_v13 = vmul.f32 %v916_v32, %v820_v50  ;;  %v1008_v18 = vadd.f32 %v972_v52, %v971_v30  ;;  %v1005_v7 = vadd.f32 %v1004_v58, %v970_v35  ;;  %v977_v45 = vmul.f32 %v2991_v20, %v2991_v20 }
 0x2b7   : > { %1001 = vadd.xlane.f32.xlu1 %v1000_v63  ;;  %v1013_v39 = vadd.f32 %v976_v33, %v975_v44  ;;  %v3034_v17 = vmul.f32 %v918_v15, %v2962_v60  ;;  %v974_v50 = vmul.f32 %v3013_v53, %v3013_v53  ;;  %v978_v30 = vmul.f32 %v3016_v59, %v3016_v59  ;;  %v2214_v44 = vld [vmem:[#allocation5 + $0x40] sm:$0xff]  }
 0x2b8   : > { %v980_v25 = vmul.f32 %v3025_v13, %v3025_v13  ;;  %v1009_v12 = vadd.f32 %v1008_v18, %v973_v56  ;;  %v981_v2 = vmul.f32 %v3021_v42, %v3021_v42  ;;  %v2215_v33 = vld [vmem:[#allocation5 + $0xc0] sm:$0xff]   ;;  %2002 = vmatprep.subr.bf16.mxu0 %v2214_v44 }
 0x2b9   : > { %1006 = vadd.xlane.f32.xlu0 %v1005_v7  ;;  %v1014_v52 = vadd.f32 %v1013_v39, %v977_v45  ;;  %v982_v60 = vmul.f32 %v3034_v17, %v3034_v17  ;;  %2042 = vmatprep.subr.bf16.mxu1 %v2215_v33 }
 0x2ba   : > { %v1010_v0 = vadd.f32 %v1009_v12, %v974_v50  ;;  %v1018_v40 = vadd.f32 %v980_v25, %v979_v54  ;;  %2003 = vmatpush3.bf16.msra.mxu0 %v2216_v62  ;;  %2043 = vmatpush3.bf16.msra.mxu1 %v2217_v3 }
 0x2bb   : > { %v1015_v9 = vadd.f32 %v1014_v52, %v978_v30  ;;  %2004 = vmatprep.subr.bf16.mxu0 %v2218_v38  ;;  %2044 = vmatprep.subr.bf16.mxu1 %v2219_v37 }
 0x2bc   : > { %1011 = vadd.xlane.f32.xlu1 %v1010_v0  ;;  %v1019_v27 = vadd.f32 %v1018_v40, %v981_v2 }
 0x2bd   : > { %1016 = vadd.xlane.f32.xlu0 %v1015_v9 }
 0x2be   : > { %v1020_v34 = vadd.f32 %v1019_v27, %v982_v60 }
 0x2c0   : > { %1021 = vadd.xlane.f32.xlu1 %v1020_v34 }
 0x33e   : > { %v987_v49 = vpop.xlane.xlu0 %986  ;;  %v992_v47 = vpop.xlane.xlu1 %991 }
 0x33f   : > { %v1024_v22 = vmul.f32 0.001953125, %v987_v49  ;;  %v1025_v32 = vmul.f32 0.001953125, %v992_v47 }
 0x341   : > { %v1032_v35 = vadd.f32 1e-06, %v1024_v22  ;;  %v1033_v15 = vadd.f32 1e-06, %v1025_v32 }
 0x342   : > { %v997_v63 = vpop.xlane.xlu0 %996 }
 0x343   : > { %2342 = vrsqrt.f32 %v1032_v35  ;;  %v1026_v58 = vmul.f32 0.001953125, %v997_v63 }
 0x344   : > { %2344 = vrsqrt.f32 %v1033_v15  ;;  %v1002_v54 = vpop.xlane.xlu1 %1001 }
 0x345   : > { %v1034_v56 = vadd.f32 1e-06, %v1026_v58  ;;  %v1027_v18 = vmul.f32 0.001953125, %v1002_v54 }
 0x346   : > { %v1007_v7 = vpop.xlane.xlu0 %1006 }
 0x347   : > { %2346 = vrsqrt.f32 %v1034_v56  ;;  %v1035_v45 = vadd.f32 1e-06, %v1027_v18  ;;  %v1028_v39 = vmul.f32 0.001953125, %v1007_v7  ;;  %v2221_v18 = vld [vmem:[#allocation5 + $0x88] sm:$0xff]   ;;  %v2222_v7 = vld [vmem:[#allocation5 + $0x50] sm:$0xff]  }
 0x348   : > { %2045 = vmatpush3.bf16.msra.mxu1 %v2221_v18 }
 0x349   : > { %2348 = vrsqrt.f32 %v1035_v45  ;;  %v1036_v25 = vadd.f32 1e-06, %v1028_v39  ;;  %v1012_v50 = vpop.xlane.xlu1 %1011  ;;  %v2224_v45 = vld [vmem:[#allocation5 + $0x10] sm:$0xff]  }
 0x34a   : > { %v1029_v12 = vmul.f32 0.001953125, %v1012_v50  ;;  %v1017_v30 = vpop.xlane.xlu0 %1016  ;;  %v2225_v39 = vld [vmem:[#allocation5 + $0x90] sm:$0xff]   ;;  %v2227_v50 = vld [vmem:[#allocation5 + $0xd8] sm:$0xff]  }
 0x34b   : > { %2350 = vrsqrt.f32 %v1036_v25  ;;  %v1030_v52 = vmul.f32 0.001953125, %v1017_v30  ;;  %v2226_v25 = vld [vmem:[#allocation5 + $0x58] sm:$0xff]  }
 0x34c   : > { %v1037_v0 = vadd.f32 1e-06, %v1029_v12  ;;  %v2228_v12 = vld [vmem:[#allocation5 + $0x18] sm:$0xff]  }
 0x34d   : > { %v2343_v2 = vpop.eup %2342  ;;  %v1038_v40 = vadd.f32 1e-06, %v1030_v52  ;;  %v1022_v9 = vpop.xlane.xlu1 %1021  ;;  %v2229_v30 = vld [vmem:[#allocation5 + $0x98] sm:$0xff]   ;;  %v2230_v52 = vld [vmem:[#allocation5 + $0x60] sm:$0xff]  }
 0x34e   : > { %v2345_v60 = vpop.eup %2344  ;;  %2352 = vrsqrt.f32 %v1037_v0  ;;  %v1031_v27 = vmul.f32 0.001953125, %v1022_v9  ;;  %v3045_v34 = vmul.f32 %v2343_v2, %v2806_v16  ;;  %v3048_v44 = vmul.f32 %v2343_v2, %v2814_v19  ;;  %v2231_v0 = vld [vmem:[#allocation5 + $0xe0] sm:$0xff]   ;;  %v2234_v9 = vld [vmem:[#allocation5 + $0x68] sm:$0xff]  }
 0x34f   : > { %2354 = vrsqrt.f32 %v1038_v40  ;;  %v3051_v33 = vmul.f32 %v2343_v2, %v2821_v21  ;;  %v3054_v62 = vmul.f32 %v2343_v2, %v2834_v24  ;;  %v3057_v3 = vmul.f32 %v2345_v60, %v2824_v29  ;;  %v2232_v2 = vld [vmem:[#allocation5 + $0x20] sm:$0xff]  }
 0x350   : > { %v1039_v38 = vadd.f32 1e-06, %v1031_v27  ;;  %v3060_v37 = vmul.f32 %v2345_v60, %v2846_v1  ;;  %v3063_v16 = vmul.f32 %v2345_v60, %v2841_v48  ;;  %2482 = vmaxabs.init.f32.vacc3 %v3045_v34, %v3048_v44  ;;  %v2233_v40 = vld [vmem:[#allocation5 + $0xa0] sm:$0xff]   ;;  %v2236_v27 = vld [vmem:[#allocation5 + $0x28] sm:$0xff]  }
 0x351   : > { %v2347_v49 = vpop.eup %2346  ;;  %v3068_v19 = vmul.f32 %v2345_v60, %v2864_v11  ;;  %v2235_v60 = vld [vmem:[#allocation5 + $0xe8] sm:$0xff]  }
 0x352   : > { %2356 = vrsqrt.f32 %v1039_v38  ;;  %v3071_v24 = vmul.f32 %v2347_v49, %v2857_v10  ;;  %v3074_v29 = vmul.f32 %v2347_v49, %v2872_v36  ;;  %2479 = vmaxabs.init.f32.vacc2 %v3057_v3, %v3060_v37  ;;  %v2237_v38 = vld [vmem:[#allocation5 + $0xa8] sm:$0xff]  }
 0x353   : > { %v2349_v21 = vpop.eup %2348  ;;  %v3079_v48 = vmul.f32 %v2347_v49, %v2883_v43  ;;  %v3082_v1 = vmul.f32 %v2347_v49, %v2890_v26  ;;  %2483 = vmaxabs.f32.vacc3 %v3051_v33, %v3054_v62  ;;  %v2238_v49 = vld [vmem:[#allocation5 + $0x70] sm:$0xff]  }
 0x354   : > { %v3085_v11 = vmul.f32 %v2349_v21, %v2893_v14  ;;  %v3088_v47 = vmul.f32 %v2349_v21, %v2902_v41  ;;  %2476 = vmaxabs.init.f32.vacc1 %v3071_v24, %v3074_v29  ;;  %v3095_v36 = vmul.f32 %v2349_v21, %v2909_v5 }
 0x355   : > { %v2351_v22 = vpop.eup %2350  ;;  %v2484_v10 = vmovacc.low.even.vacc3  ;;  %v3098_v43 = vmul.f32 %v2349_v21, %v2928_v51  ;;  %2480 = vmaxabs.f32.vacc2 %v3063_v16, %v3068_v19  ;;  %v2239_v21 = vld [vmem:[#allocation5 + $0xf0] sm:$0xff]  }
 0x356   : > { %v3103_v41 = vmul.f32 %v2351_v22, %v2931_v57  ;;  %v3106_v32 = vmul.f32 %v2351_v22, %v2946_v8  ;;  %v3109_v15 = vmul.f32 %v2351_v22, %v2944_v55  ;;  %2473 = vmaxabs.init.f32.vacc0 %v3085_v11, %v3088_v47 }
 0x357   : > { %1115 = vmax.xlane.f32.xlu0 %v2484_v10  ;;  %v2481_v14 = vmovacc.low.even.vacc2  ;;  %v3114_v5 = vmul.f32 %v2351_v22, %v2956_v46  ;;  %2477 = vmaxabs.f32.vacc1 %v3079_v48, %v3082_v1  ;;  %v2240_v22 = vld [vmem:[#allocation5 + $0x30] sm:$0xff]  }
 0x358   : > { %v2353_v26 = vpop.eup %2352  ;;  %2470 = vmaxabs.init.f32.vacc3 %v3103_v41, %v3106_v32  ;;  %2474 = vmaxabs.f32.vacc0 %v3095_v36, %v3098_v43  ;;  %v2241_v10 = vld [vmem:[#allocation5 + $0xb0] sm:$0xff]  }
 0x359   : > { %v2355_v35 = vpop.eup %2354  ;;  %1120 = vmax.xlane.f32.xlu1 %v2481_v14  ;;  %v2478_v51 = vmovacc.low.even.vacc1  ;;  %v3119_v57 = vmul.f32 %v2353_v26, %v2958_v6  ;;  %v3122_v8 = vmul.f32 %v2353_v26, %v2973_v31  ;;  %v3127_v55 = vmul.f32 %v2353_v26, %v2971_v28  ;;  %v2243_v14 = vld [vmem:[#allocation5 + $0xf8] sm:$0xff]  }
 0x35a   : > { %v3130_v46 = vmul.f32 %v2353_v26, %v3013_v53  ;;  %v3133_v58 = vmul.f32 %v2355_v35, %v2985_v23  ;;  %v2475_v6 = vmovacc.low.even.vacc0  ;;  %v3138_v31 = vmul.f32 %v2355_v35, %v2995_v61  ;;  %v2242_v26 = vld [vmem:[#allocation5 + $0x78] sm:$0xff]  }
 0x35b   : > { %1125 = vmax.xlane.f32.xlu0 %v2478_v51  ;;  %2467 = vmaxabs.init.f32.vacc2 %v3119_v57, %v3122_v8  ;;  %v3143_v28 = vmul.f32 %v2355_v35, %v2991_v20  ;;  %v3146_v54 = vmul.f32 %v2355_v35, %v3016_v59  ;;  %2471 = vmaxabs.f32.vacc3 %v3109_v15, %v3114_v5  ;;  %v2244_v35 = vld [vmem:[#allocation5 + $0x38] sm:$0xff]  }
 0x35c   : > { %v2357_v63 = vpop.eup %2356  ;;  %2464 = vmaxabs.init.f32.vacc1 %v3133_v58, %v3138_v31  ;;  %v2245_v51 = vld [vmem:[#allocation5 + $0xb8] sm:$0xff]  }
 0x35d   : > { %1130 = vmax.xlane.f32.xlu1 %v2475_v6  ;;  %v2472_v23 = vmovacc.low.even.vacc3  ;;  %v3151_v53 = vmul.f32 %v2357_v63, %v3009_v4  ;;  %v3154_v61 = vmul.f32 %v2357_v63, %v3025_v13  ;;  %v3159_v20 = vmul.f32 %v2357_v63, %v3021_v42  ;;  %v2220_v13 = vld [vmem:[#allocation5 + $0x8] sm:$0xff]  }
 0x35e   : > { %2468 = vmaxabs.f32.vacc2 %v3127_v55, %v3130_v46  ;;  %v3164_v56 = vmul.f32 %v2357_v63, %v3034_v17  ;;  %2465 = vmaxabs.f32.vacc1 %v3143_v28, %v3146_v54  ;;  %2005 = vmatpush3.bf16.msra.mxu0 %v2220_v13  ;;  %v2223_v17 = vld [vmem:[#allocation5 + $0xd0] sm:$0xff]  }
 0x35f   : > { %1135 = vmax.xlane.f32.xlu0 %v2472_v23  ;;  %2461 = vmaxabs.init.f32.vacc0 %v3151_v53, %v3154_v61  ;;  %2006 = vmatprep.subr.bf16.mxu0 %v2222_v7 }
 0x360   : > { %v2469_v59 = vmovacc.low.even.vacc2  ;;  %v2466_v4 = vmovacc.low.even.vacc1  ;;  %2046 = vmatprep.subr.bf16.mxu1 %v2223_v17 }
 0x361   : > { %2462 = vmaxabs.f32.vacc0 %v3159_v20, %v3164_v56  ;;  %2047 = vmatpush3.bf16.msra.mxu1 %v2225_v39 }
 0x362   : > { %1140 = vmax.xlane.f32.xlu1 %v2469_v59  ;;  %2007 = vmatpush3.bf16.msra.mxu0 %v2224_v45 }
 0x363   : > { %1145 = vmax.xlane.f32.xlu0 %v2466_v4  ;;  %v2463_v42 = vmovacc.low.even.vacc0  ;;  %2008 = vmatprep.subr.bf16.mxu0 %v2226_v25 }
 0x364   : > { %2048 = vmatprep.subr.bf16.mxu1 %v2227_v50 }
 0x365   : > { %2049 = vmatpush3.bf16.msra.mxu1 %v2229_v30 }
 0x366   : > { %1150 = vmax.xlane.f32.xlu1 %v2463_v42  ;;  %2009 = vmatpush3.bf16.msra.mxu0 %v2228_v12 }
 0x367   : > { %2010 = vmatprep.subr.bf16.mxu0 %v2230_v52  ;;  %2050 = vmatprep.subr.bf16.mxu1 %v2231_v0 }
 0x369   : > { %2051 = vmatpush3.bf16.msra.mxu1 %v2233_v40 }
 0x36a   : > { %2011 = vmatpush3.bf16.msra.mxu0 %v2232_v2  ;;  %2052 = vmatprep.subr.bf16.mxu1 %v2235_v60 }
 0x36b   : > { %2012 = vmatprep.subr.bf16.mxu0 %v2234_v9 }
 0x36d   : > { %2053 = vmatpush3.bf16.msra.mxu1 %v2237_v38 }
 0x36e   : > { %2013 = vmatpush3.bf16.msra.mxu0 %v2236_v27  ;;  %2054 = vmatprep.subr.bf16.mxu1 %v2239_v21 }
 0x36f   : > { %2014 = vmatprep.subr.bf16.mxu0 %v2238_v49 }
 0x371   : > { %2055 = vmatpush3.bf16.msra.mxu1 %v2241_v10 }
 0x372   : > { %2015 = vmatpush3.bf16.msra.mxu0 %v2240_v22  ;;  %2056 = vmatprep.subr.bf16.mxu1 %v2243_v14 }
 0x373   : > { %2016 = vmatprep.subr.bf16.mxu0 %v2242_v26 }
 0x375   : > { %2057 = vmatpush3.bf16.msra.mxu1 %v2245_v51 }
 0x376   : > { %2017 = vmatpush3.bf16.msra.mxu0 %v2244_v35 }
 0x3e4   : > { %v3172_v63 = vpop.xlane.xlu0 %1115 }
 0x3e5   : > { %v1152_v6 = vmax.f32 %v3172_v63, 1e-05 }
 0x3e6   : > { %v3175_v23 = vpop.xlane.xlu1 %1120 }
 0x3e7   : > { %2358 = vrcp.f32 %v1152_v6  ;;  %v1153_v59 = vmax.f32 %v3175_v23, 1e-05 }
 0x3e8   : > { %v3182_v4 = vpop.xlane.xlu0 %1125 }
 0x3e9   : > { %2360 = vrcp.f32 %v1153_v59  ;;  %v1154_v13 = vmax.f32 %v3182_v4, 1e-05 }
 0x3ea   : > { %v3185_v18 = vpop.xlane.xlu1 %1130 }
 0x3eb   : > { %v3316_v42 = vmax.f32 %v3185_v18, 1e-05  ;;  %2362 = vrcp.f32 %v1154_v13 }
 0x3ec   : > { %v3190_v7 = vpop.xlane.xlu0 %1135 }
 0x3ed   : > { %2364 = vrcp.f32 %v3316_v42  ;;  %v3315_v17 = vmax.f32 %v3190_v7, 1e-05 }
 0x3ef   : > { %2366 = vrcp.f32 %v3315_v17  ;;  %v3197_v39 = vpop.xlane.xlu1 %1140 }
 0x3f0   : > { %v3314_v50 = vmax.f32 %v3197_v39, 1e-05  ;;  %v3204_v2 = vpop.xlane.xlu0 %1145 }
 0x3f1   : > { %v2359_v45 = vpop.eup %2358  ;;  %v3313_v40 = vmax.f32 %v3204_v2, 1e-05 }
 0x3f2   : > { %v1161_v25 = vmul.f32 127.0, %v2359_v45  ;;  %2368 = vrcp.f32 %v3314_v50 }
 0x3f3   : > { %v2361_v12 = vpop.eup %2360  ;;  %2370 = vrcp.f32 %v3313_v40 }
 0x3f4   : > { %v1176_v30 = vmul.f32 %v1161_v25, %v3045_v34  ;;  %v1178_v52 = vmul.f32 %v1161_v25, %v3051_v33  ;;  %v1163_v0 = vmul.f32 127.0, %v2361_v12  ;;  %v1177_v9 = vmul.f32 %v1161_v25, %v3048_v44  ;;  %v3212_v34 = vpop.xlane.xlu1 %1150 }
 0x3f5   : > { %v2363_v33 = vpop.eup %2362  ;;  %v1179_v10 = vmul.f32 %v1161_v25, %v3054_v62  ;;  %v3317_v44 = vmax.f32 %v3212_v34, 1e-05 }
 0x3f6   : > { %v2090_v60 = vround.rtne.f32 %v1176_v30  ;;  %v2092_v27 = vround.rtne.f32 %v1178_v52  ;;  %v1180_v38 = vmul.f32 %v1163_v0, %v3057_v3  ;;  %v1182_v49 = vmul.f32 %v1163_v0, %v3063_v16 }
 0x3f7   : > { %v2365_v26 = vpop.eup %2364  ;;  %v1181_v35 = vmul.f32 %v1163_v0, %v3060_v37  ;;  %v2091_v51 = vround.rtne.f32 %v1177_v9  ;;  %v1183_v12 = vmul.f32 %v1163_v0, %v3068_v19  ;;  %v1165_v52 = vmul.f32 127.0, %v2363_v33 }
 0x3f8   : > { %v2094_v21 = vround.rtne.f32 %v1180_v38  ;;  %v2096_v22 = vround.rtne.f32 %v1182_v49  ;;  %v1240_v14 = vmax.f32 %v2090_v60, -128.0  ;;  %v1242_v3 = vmax.f32 %v2092_v27, -128.0 }
 0x3f9   : > { %v2367_v30 = vpop.eup %2366  ;;  %2372 = vrcp.f32 %v3317_v44  ;;  %v2095_v38 = vround.rtne.f32 %v1181_v35  ;;  %v1241_v49 = vmax.f32 %v2091_v51, -128.0  ;;  %v1167_v62 = vmul.f32 127.0, %v2365_v26 }
 0x3fa   : > { %v1244_v45 = vmax.f32 %v2094_v21, -128.0  ;;  %v1246_v16 = vmax.f32 %v2096_v22, -128.0  ;;  %v3220_v25 = vmul.f32 127.0, %v2367_v30  ;;  %v2093_v60 = vround.rtne.f32 %v1179_v10 }
 0x3fb   : > { %v2097_v40 = vround.rtne.f32 %v1183_v12  ;;  %v1245_v50 = vmax.f32 %v2095_v38, -128.0  ;;  %v1273_v37 = vmin.f32 %v1241_v49, 127.0  ;;  %v1272_v9 = vmin.f32 %v1240_v14, 127.0 }
 0x3fc   : > { %v1276_v27 = vmin.f32 %v1244_v45, 127.0  ;;  %v2369_v21 = vpop.eup %2368  ;;  %v1243_v22 = vmax.f32 %v2093_v60, -128.0  ;;  %v1274_v19 = vmin.f32 %v1242_v3, 127.0  ;;  %v1278_v0 = vmin.f32 %v1246_v16, 127.0 }
 0x3fd   : > { %v1247_v17 = vmax.f32 %v2097_v40, -128.0  ;;  %v3222_v33 = vmul.f32 127.0, %v2369_v21  ;;  %v1277_v42 = vmin.f32 %v1245_v50, 127.0  ;;  %v1185_v35 = vmul.f32 %v1165_v52, %v3074_v29  ;;  %v2371_v12 = vpop.eup %2370 }
 0x3fe   : > { %v1312_v44 = vpack.c.bf16 %v1276_v27, %v1272_v9  ;;  %v1275_v26 = vmin.f32 %v1243_v22, 127.0  ;;  %v1314_v30 = vpack.c.bf16 %v1278_v0, %v1274_v19  ;;  %v1189_v10 = vmul.f32 %v1167_v62, %v3088_v47 }
 0x3ff   : > { %v1279_v51 = vmin.f32 %v1247_v17, 127.0  ;;  %v1313_v38 = vpack.c.bf16 %v1277_v42, %v1273_v37  ;;  %v2099_v14 = vround.rtne.f32 %v1185_v35  ;;  %v1187_v45 = vmul.f32 %v1165_v52, %v3082_v1 }
 0x400   : > { %v1191_v40 = vmul.f32 %v1167_v62, %v3098_v43  ;;  %v3228_v3 = vmul.f32 127.0, %v2371_v12  ;;  %v2103_v49 = vround.rtne.f32 %v1189_v10  ;;  %v1184_v50 = vmul.f32 %v1165_v52, %v3071_v24 }
 0x401   : > { %v1315_v16 = vpack.c.bf16 %v1279_v51, %v1275_v26  ;;  %1616 = vmatprep.mubr.bf16.mxu0 %v1313_v38  ;;  %v1249_v29 = vmax.f32 %v2099_v14, -128.0  ;;  %v2101_v60 = vround.rtne.f32 %v1187_v45  ;;  %v1188_v9 = vmul.f32 %v1167_v62, %v3085_v11 }
 0x402   : > { %v2105_v17 = vround.rtne.f32 %v1191_v40  ;;  %1617 = vmatmul.mubr.bf16.vlgmr.msra.gmra.mrb[16].mxu0 %v1312_v44  ;;  %v1253_v47 = vmax.f32 %v2103_v49, -128.0  ;;  %v2098_v42 = vround.rtne.f32 %v1184_v50  ;;  %v1186_v1 = vmul.f32 %v1165_v52, %v3079_v48 }
 0x403   : > { %1681 = vmatprep.mubr.bf16.mxu1 %v1315_v16  ;;  %v1190_v43 = vmul.f32 %v1167_v62, %v3095_v36  ;;  %v2373_v37 = vpop.eup %2372  ;;  %v1281_v27 = vmin.f32 %v1249_v29, 127.0  ;;  %v1251_v21 = vmax.f32 %v2101_v60, -128.0  ;;  %v2102_v24 = vround.rtne.f32 %v1188_v9 }
 0x404   : > { %1682 = vmatmul.mubr.bf16.vlgmr.msra.gmra.mrb[16].mxu1 %v1314_v30  ;;  %v1255_v22 = vmax.f32 %v2105_v17, -128.0  ;;  %v3234_v19 = vmul.f32 127.0, %v2373_v37  ;;  %v1285_v0 = vmin.f32 %v1253_v47, 127.0  ;;  %v1248_v35 = vmax.f32 %v2098_v42, -128.0 }
 0x405   : > { %v2100_v26 = vround.rtne.f32 %v1186_v1  ;;  %v1283_v11 = vmin.f32 %v1251_v21, 127.0  ;;  %v1252_v44 = vmax.f32 %v2102_v24, -128.0  ;;  %v2104_v10 = vround.rtne.f32 %v1190_v43 }
 0x406   : > { %v1287_v51 = vmin.f32 %v1255_v22, 127.0  ;;  %v1317_v12 = vpack.c.bf16 %v1285_v0, %v1281_v27  ;;  %v1280_v38 = vmin.f32 %v1248_v35, 127.0  ;;  %v1193_v36 = vmul.f32 %v3220_v25, %v3106_v32 }
 0x407   : > { %v1250_v48 = vmax.f32 %v2100_v26, -128.0  ;;  %v1284_v62 = vmin.f32 %v1252_v44, 127.0  ;;  %v1254_v30 = vmax.f32 %v2104_v10, -128.0  ;;  %v1197_v14 = vmul.f32 %v3222_v33, %v3122_v8 }
 0x408   : > { %v1319_v52 = vpack.c.bf16 %v1287_v51, %v1283_v11  ;;  %1624 = vmatprep.mubr.bf16.mxu0 %v1317_v12  ;;  %v2107_v40 = vround.rtne.f32 %v1193_v36  ;;  %v1195_v16 = vmul.f32 %v3220_v25, %v3114_v5  ;;  %v1199_v49 = vmul.f32 %v3222_v33, %v3130_v46 }
 0x409   : > { %v1282_v45 = vmin.f32 %v1250_v48, 127.0  ;;  %v1316_v50 = vpack.c.bf16 %v1284_v62, %v1280_v38  ;;  %v1286_v29 = vmin.f32 %v1254_v30, 127.0  ;;  %v2111_v60 = vround.rtne.f32 %v1197_v14 }
 0x40a   : > { %1689 = vmatprep.mubr.bf16.mxu1 %v1319_v52  ;;  %v1192_v32 = vmul.f32 %v3220_v25, %v3103_v41  ;;  %v1257_v17 = vmax.f32 %v2107_v40, -128.0  ;;  %v2109_v9 = vround.rtne.f32 %v1195_v16  ;;  %v2113_v47 = vround.rtne.f32 %v1199_v49 }
 0x40b   : > { %v1196_v8 = vmul.f32 %v3222_v33, %v3119_v57  ;;  %1625 = vmatmul.mubr.bf16.gmra.mrb[20].mxu0 %v1316_v50  ;;  %v1318_v42 = vpack.c.bf16 %v1286_v29, %v1282_v45  ;;  %v1261_v1 = vmax.f32 %v2111_v60, -128.0  ;;  %v1194_v46 = vmul.f32 %v3220_v25, %v3109_v15 }
 0x40c   : > { %v2106_v5 = vround.rtne.f32 %v1192_v32  ;;  %v1289_v43 = vmin.f32 %v1257_v17, 127.0  ;;  %v1259_v37 = vmax.f32 %v2109_v9, -128.0  ;;  %v1263_v27 = vmax.f32 %v2113_v47, -128.0 }
 0x40d   : > { %v2110_v21 = vround.rtne.f32 %v1196_v8  ;;  %1690 = vmatmul.mubr.bf16.gmra.mrb[20].mxu1 %v1318_v42  ;;  %v1293_v22 = vmin.f32 %v1261_v1, 127.0  ;;  %v1198_v24 = vmul.f32 %v3222_v33, %v3127_v55  ;;  %v2108_v0 = vround.rtne.f32 %v1194_v46 }
 0x40e   : > { %v1256_v41 = vmax.f32 %v2106_v5, -128.0  ;;  %v1291_v35 = vmin.f32 %v1259_v37, 127.0  ;;  %v1295_v57 = vmin.f32 %v1263_v27, 127.0  ;;  %v1201_v11 = vmul.f32 %v3228_v3, %v3138_v31 }
 0x40f   : > { %v1260_v26 = vmax.f32 %v2110_v21, -128.0  ;;  %v1321_v51 = vpack.c.bf16 %v1293_v22, %v1289_v43  ;;  %v2112_v15 = vround.rtne.f32 %v1198_v24  ;;  %v1258_v25 = vmax.f32 %v2108_v0, -128.0 }
 0x410   : > { %v1288_v44 = vmin.f32 %v1256_v41, 127.0  ;;  %v1323_v10 = vpack.c.bf16 %v1295_v57, %v1291_v35  ;;  %v1205_v38 = vmul.f32 %v3234_v19, %v3154_v61  ;;  %v2115_v48 = vround.rtne.f32 %v1201_v11 }
 0x411   : > { %v1292_v12 = vmin.f32 %v1260_v26, 127.0  ;;  %1632 = vmatprep.mubr.bf16.mxu0 %v1321_v51  ;;  %v1262_v36 = vmax.f32 %v2112_v15, -128.0  ;;  %v1290_v55 = vmin.f32 %v1258_v25, 127.0  ;;  %v1203_v33 = vmul.f32 %v3228_v3, %v3146_v54 }
 0x412   : > { %v1207_v52 = vmul.f32 %v3234_v19, %v3164_v56  ;;  %1697 = vmatprep.mubr.bf16.mxu1 %v1323_v10  ;;  %v2119_v62 = vround.rtne.f32 %v1205_v38  ;;  %v1265_v30 = vmax.f32 %v2115_v48, -128.0  ;;  %v1200_v14 = vmul.f32 %v3228_v3, %v3133_v58 }
 0x413   : > { %v1320_v31 = vpack.c.bf16 %v1292_v12, %v1288_v44  ;;  %v1294_v45 = vmin.f32 %v1262_v36, 127.0  ;;  %v2117_v40 = vround.rtne.f32 %v1203_v33  ;;  %v1204_v16 = vmul.f32 %v3234_v19, %v3151_v53 }
 0x414   : > { %v2121_v61 = vround.rtne.f32 %v1207_v52  ;;  %v1269_v49 = vmax.f32 %v2119_v62, -128.0  ;;  %v1297_v50 = vmin.f32 %v1265_v30, 127.0  ;;  %v2114_v54 = vround.rtne.f32 %v1200_v14 }
 0x415   : > { %1633 = vmatmul.mubr.bf16.gmra.mrb[24].mxu0 %v1320_v31  ;;  %v1202_v56 = vmul.f32 %v3228_v3, %v3143_v28  ;;  %v1322_v29 = vpack.c.bf16 %v1294_v45, %v1290_v55  ;;  %v1267_v60 = vmax.f32 %v2117_v40, -128.0  ;;  %v2118_v17 = vround.rtne.f32 %v1204_v16 }
 0x416   : > { %v1271_v32 = vmax.f32 %v2121_v61, -128.0  ;;  %v1301_v9 = vmin.f32 %v1269_v49, 127.0  ;;  %v1264_v47 = vmax.f32 %v2114_v54, -128.0  ;;  %v1206_v58 = vmul.f32 %v3234_v19, %v3159_v20 }
 0x417   : > { %v2116_v8 = vround.rtne.f32 %v1202_v56  ;;  %1698 = vmatmul.mubr.bf16.gmra.mrb[24].mxu1 %v1322_v29  ;;  %v1299_v42 = vmin.f32 %v1267_v60, 127.0  ;;  %v1268_v1 = vmax.f32 %v2118_v17, -128.0  ;;  %v1304_v19 = vmul.f32 0.007874016, %v1152_v6 }
 0x418   : > { %v1303_v53 = vmin.f32 %v1271_v32, 127.0  ;;  %v1325_v5 = vpack.c.bf16 %v1301_v9, %v1297_v50  ;;  %v2120_v46 = vround.rtne.f32 %v1206_v58  ;;  %v1296_v27 = vmin.f32 %v1264_v47, 127.0 }
 0x419   : > { %v1266_v43 = vmax.f32 %v2116_v8, -128.0  ;;  %v1300_v28 = vmin.f32 %v1268_v1, 127.0  ;;  %v3270_v57 = vstv %s1941_s19  ;;  %v1305_v44 = vmul.f32 0.007874016, %v1153_v59 }
 0x41a   : > { %v1327_v37 = vpack.c.bf16 %v1303_v53, %v1299_v42  ;;  %1640 = vmatprep.mubr.bf16.mxu0 %v1325_v5  ;;  %v1270_v3 = vmax.f32 %v2120_v46, -128.0  ;;  %v1716_v48 = vmul.f32 %v3270_v57, %v1304_v19  ;;  %v1306_v59 = vmul.f32 0.007874016, %v1154_v13 }
 0x41b   : > { %v1324_v21 = vpack.c.bf16 %v1300_v28, %v1296_v27  ;;  %v1298_v22 = vmin.f32 %v1266_v43, 127.0  ;;  %v1717_v36 = vmul.f32 %v3270_v57, %v1305_v44  ;;  %v3322_v16 = vmax.f32 %v3185_v18, 1e-05 }
 0x41c   : > { %1705 = vmatprep.mubr.bf16.mxu1 %v1327_v37  ;;  %v1302_v41 = vmin.f32 %v1270_v3, 127.0  ;;  %v1718_v60 = vmul.f32 %v3270_v57, %v1306_v59  ;;  %v3323_v53 = vmax.f32 %v3190_v7, 1e-05  ;;  %v3324_v28 = vmax.f32 %v3197_v39, 1e-05 }
 0x41d   : > { %1641 = vmatmul.mubr.bf16.gmra.mrb[28].mxu0 %v1324_v21  ;;  %v1307_v49 = vmul.f32 0.007874016, %v3322_v16  ;;  %v3325_v39 = vmax.f32 %v3204_v2, 1e-05 }
 0x41e   : > { %v1326_v24 = vpack.c.bf16 %v1302_v41, %v1298_v22  ;;  %v1308_v1 = vmul.f32 0.007874016, %v3323_v53  ;;  %v1309_v3 = vmul.f32 0.007874016, %v3324_v28 }
 0x41f   : > { %v1719_v4 = vmul.f32 %v3270_v57, %v1307_v49 }
 0x420   : > { %1706 = vmatmul.mubr.bf16.gmra.mrb[28].mxu1 %v1326_v24  ;;  %v1720_v24 = vmul.f32 %v3270_v57, %v1308_v1 }
 0x4d5   : > { %v2018_v20 = vpop.f32.mrb[16].mxu0 }
 0x4d6   : > { %v2019_v35 = vpop.f32.mrb[17].mxu0 }
 0x4d7   : > { %v2058_v0 = vpop.f32.mrb[16].mxu1  ;;  %v2020_v26 = vadd.f32 %v2019_v35, %v2018_v20  ;;  %v2021_v51 = vpop.f32.mrb[18].mxu0 }
 0x4d8   : > { %v2059_v11 = vpop.f32.mrb[17].mxu1  ;;  %v2022_v10 = vpop.f32.mrb[19].mxu0 }
 0x4d9   : > { %v2060_v15 = vadd.f32 %v2059_v11, %v2058_v0  ;;  %v2061_v25 = vpop.f32.mrb[18].mxu1  ;;  %v2023_v12 = vadd.f32 %v2022_v10, %v2021_v51  ;;  %v1721_v0 = vmul.f32 %v3270_v57, %v1309_v3 }
 0x4da   : > { %v2062_v38 = vpop.f32.mrb[19].mxu1 }
 0x4db   : > { %v1684_v63 = vadd.f32 %v2060_v15, %v2020_v26  ;;  %v2063_v6 = vadd.f32 %v2062_v38, %v2061_v25  ;;  %v1310_v25 = vmul.f32 0.007874016, %v3325_v39 }
 0x4dd   : > { %v1724_v55 = vmul.f32 %v1716_v48, %v1684_v63  ;;  %v1687_v33 = vadd.f32 %v2063_v6, %v2023_v12  ;;  %v3326_v6 = vmax.f32 %v3212_v34, 1e-05 }
 0x4de   : > { %v2024_v31 = vpop.f32.mrb[20].mxu0 }
 0x4df   : > { %v1725_v52 = vmul.f32 %v1717_v36, %v1687_v33  ;;  %v2025_v23 = vpop.f32.mrb[21].mxu0  ;;  %v1311_v36 = vmul.f32 0.007874016, %v3326_v6 }
 0x4e0   : > { %v2064_v30 = vpop.f32.mrb[20].mxu1  ;;  %v2026_v14 = vadd.f32 %v2025_v23, %v2024_v31  ;;  %v2027_v45 = vpop.f32.mrb[22].mxu0  ;;  %v1722_v31 = vmul.f32 %v3270_v57, %v1310_v25 }
 0x4e1   : > { %v1979_v62 = vpack.c.bf16 %v1725_v52, %v1724_v55  ;;  %v2065_v40 = vpop.f32.mrb[21].mxu1  ;;  %v2028_v61 = vpop.f32.mrb[23].mxu0  ;;  %v1723_v2 = vmul.f32 %v3270_v57, %v1311_v36 }
 0x4e2   : > { %v2066_v50 = vadd.f32 %v2065_v40, %v2064_v30  ;;  %v2067_v54 = vpop.f32.mrb[22].mxu1  ;;  %v2029_v56 = vadd.f32 %v2028_v61, %v2027_v45 }
 0x4e3   : > { %1980 = vst [vmem:[%s3281_s12] sm:$0xff] %v1979_v62   ;;  %v2068_v29 = vpop.f32.mrb[23].mxu1 }
 0x4e4   : > { %v1692_v32 = vadd.f32 %v2066_v50, %v2026_v14  ;;  %v2069_v17 = vadd.f32 %v2068_v29, %v2067_v54 }
 0x4e6   : > { %v1726_v13 = vmul.f32 %v1718_v60, %v1692_v32  ;;  %v1695_v9 = vadd.f32 %v2069_v17, %v2029_v56 }
 0x4e8   : > { %v2030_v47 = vpop.f32.mrb[24].mxu0  ;;  %v1727_v58 = vmul.f32 %v1719_v4, %v1695_v9 }
 0x4e9   : > { %v2031_v8 = vpop.f32.mrb[25].mxu0 }
 0x4ea   : > { %v2032_v42 = vadd.f32 %v2031_v8, %v2030_v47  ;;  %v2033_v18 = vpop.f32.mrb[26].mxu0  ;;  %v1984_v5 = vpack.c.bf16 %v1727_v58, %v1726_v13  ;;  %v2070_v46 = vpop.f32.mrb[24].mxu1 }
 0x4eb   : > { %v2034_v43 = vpop.f32.mrb[27].mxu0  ;;  %v2071_v37 = vpop.f32.mrb[25].mxu1 }
 0x4ec   : > { %v2035_v27 = vadd.f32 %v2034_v43, %v2033_v18  ;;  %1999 = vst [vmem:[%s3281_s12 + $0x8] sm:$0xff] %v1984_v5   ;;  %v2072_v21 = vadd.f32 %v2071_v37, %v2070_v46  ;;  %v2073_v22 = vpop.f32.mrb[26].mxu1 }
 0x4ed   : > { %v2074_v41 = vpop.f32.mrb[27].mxu1 }
 0x4ee   : > { %v1700_v20 = vadd.f32 %v2072_v21, %v2032_v42  ;;  %v2075_v19 = vadd.f32 %v2074_v41, %v2073_v22 }
 0x4f0   : > { %v1728_v7 = vmul.f32 %v1720_v24, %v1700_v20  ;;  %v1703_v35 = vadd.f32 %v2075_v19, %v2035_v27  ;;  %v2036_v26 = vpop.f32.mrb[28].mxu0 }
 0x4f1   : > { %v2037_v11 = vpop.f32.mrb[29].mxu0 }
 0x4f2   : > { %v1729_v51 = vmul.f32 %v1721_v0, %v1703_v35  ;;  %v2038_v44 = vadd.f32 %v2037_v11, %v2036_v26  ;;  %v2039_v15 = vpop.f32.mrb[30].mxu0 }
 0x4f3   : > { %v2076_v10 = vpop.f32.mrb[28].mxu1  ;;  %v2040_v12 = vpop.f32.mrb[31].mxu0 }
 0x4f4   : > { %v1989_v38 = vpack.c.bf16 %v1729_v51, %v1728_v7  ;;  %v2077_v48 = vpop.f32.mrb[29].mxu1  ;;  %v2041_v63 = vadd.f32 %v2040_v12, %v2039_v15 }
 0x4f5   : > { %v2078_v55 = vadd.f32 %v2077_v48, %v2076_v10  ;;  %v2079_v33 = vpop.f32.mrb[30].mxu1 }
 0x4f6   : > { %2000 = vst [vmem:[%s3281_s12 + $0x10] sm:$0xff] %v1989_v38   ;;  %v2080_v52 = vpop.f32.mrb[31].mxu1 }
 0x4f7   : > { %v1708_v23 = vadd.f32 %v2078_v55, %v2038_v44  ;;  %v2081_v59 = vadd.f32 %v2080_v52, %v2079_v33 }
 0x4f9   : > { %v1730_v62 = vmul.f32 %v1722_v31, %v1708_v23  ;;  %v1711_v30 = vadd.f32 %v2081_v59, %v2041_v63 }
 0x4fb   : > { %v1731_v14 = vmul.f32 %v1723_v2, %v1711_v30 }
 0x4fd   : > { %v1994_v45 = vpack.c.bf16 %v1731_v14, %v1730_v62 }
 0x4ff   : > { %2001 = vst [vmem:[%s3281_s12 + $0x18] sm:$0xff] %v1994_v45  }
 0x500 PF: > { %s17_s15 = sadd.s32 1, %s2487_s15  }
 0x501   : > { %p14_p2 = scmp.ge.s32.totalorder %s17_s15, 4  }
 0x503   :  { %16 = sbr.rel (!%p14_p2) target bundleno = 3 (0x3), region = 80 }
 0x50a   :  { %1794 = vsyncpa [#allocation3], 1 }
 0x50b   :  { %1796 = vsyncpa [#allocation3 + $0x1], 1 }
 0x50c   :  { %1797 = vsyncpa [#allocation6], 1 }
 0x50d   :  { %1798 = vsyncpa [#allocation4], 1 }
 0x50e   :  { %1800 = vsyncpa [#allocation4 + $0x1], 1 }

// kernel: _mlp_forward_impl.1
= control target key start
LH: loop header
LB: loop body
LE: loop exit
PB: predicated region body
PF: predicated region fallthrough
CT: control target
= control target key end

     0   :  { %9 = vsyncpa [#allocation3], 0  ;;  %s3308_s0 = inlined_call_operand.vmem [shape: bf16[128,128], index: 0, kind: input, shape index: {}]   ;;  %s3309_s1 = inlined_call_operand.hbm [shape: bf16[128,512], index: 1, kind: input, shape index: {}]   ;;  %s3310_s2 = inlined_call_operand.hbm [shape: bf16[512,128], index: 2, kind: input, shape index: {}]   ;;  %s3311_s3 = inlined_call_operand.vmem [shape: f32[2], index: 3, kind: input, shape index: {}]   ;;  %s3312_s4 = inlined_call_operand.vmem [shape: bf16[128,128], index: 4, kind: output, shape index: {}]  }
   0x1   :  { %10 = vsyncpa [#allocation6], 0 }
   0x2   :  { %11 = vsyncpa [#allocation4], 0  ;;  %s2522_s15 = smov 0  }
   0x3 LB: > { %s2489_s16 = smov [#allocation2]   ;;  %s1862_s18 = sadd.s32 4294967295, %s2487_s15   ;;  %s2487_s15 = sphi %s2522_s15, %s17_s15  }
   0x4   : > { %s149_s17 = sshll.u32 %s2489_s16, 4  ;;  %p1864_p0 = scmp.ge.s32.totalorder %s2487_s15, 1  ;;  %s2536_s17 = int_to_ptr.vmem [resolvable:$true] %s149_s17 }
   0x5   : > { %p137_p1 = scmp.lt.s32.totalorder %s2487_s15, 3  ;;  %p2532_p2 = scmp.eq.s32.totalorder %s1862_s18, 0 }
   0x6   : > { %s2490_s21 = smov [#allocation5]   ;;  %s176_s26 = sshll.u32 %s3311_s3, 4  ;;  %s2555_s26 = int_to_ptr.vmem [resolvable:$true] %s176_s26 }
   0x7   : > { %p2538_p3 = pnand %p1864_p0, %p137_p1  ;;  %s162_s22 = sshll.u32 %s2490_s21, 4  ;;  %s2544_s22 = int_to_ptr.vmem [resolvable:$true] %s162_s22 }
   0x8   : > { %s2374_s29 = scalar_lea.hbm %s3309_s1, 4096 }
   0x9   : > { %p2134_p4 = pneg %p2538_p3  ;;  %p2375_p6 = scmp.ne.s32.totalorder %s3309_s1, %s2374_s29 }
   0xa   : > { %p2381_p10 = scmp.lt.u32.totalorder %s2374_s29, %s3309_s1 }
   0xb   : > { %p2548_p5 = pnand %p2532_p2, %p2134_p4 }
   0xd   : > { %p2565_p7 = pneg %p2548_p5 }
   0xf   : > { %p2377_p8 = pnand %p2565_p7, %p2375_p6 }
  0x11   : > { %p2378_p9 = pneg %p2377_p8 }
  0x13   : > { %p2383_p11 = pnand %p2381_p10, %p2378_p9 }
  0x15   : > { %2386 = shalt.err (!%p2383_p11)
}
  0x16   : > { %s2387_s9 = scalar_lea.vmem %s2536_s17, 4096  ;;  %p2395_p1 = scmp.lt.s32.totalorder %s2536_s17, %s2536_s17 }
  0x17   : > { %p2388_p12 = scmp.ne.s32.totalorder %s2536_s17, %s2387_s9  ;;  %p2396_p4 = scmp.lt.s32.totalorder %s2387_s9, %s2387_s9 }
  0x19   : > { %p2390_p13 = pnand %p2388_p12, %p2565_p7  ;;  %p2397_p6 = por %p2396_p4, %p2395_p1 }
  0x1b   : > { %p2391_p0 = pneg %p2390_p13 }
  0x1d   : > { %p2398_p8 = pnand %p2397_p6, %p2391_p0 }
  0x1f   : > { %2401 = shalt.err (!%p2398_p8)
}
  0x20   : > { %s2491_s10 = smov 256   ;;  %s2492_s11 = smov 16  }
  0x21   : > { %2137 = dma.hbm_to_vmem [thread:$0]  (!%p2548_p5), %s3309_s1, 4096, %s2536_s17, [#allocation3], %s2491_s10, %s2491_s10, %s2492_s11  }
  0x22   : > { %s2402_s21 = scalar_lea.hbm %s3310_s2, 4096 }
  0x23   : > { %p2403_p9 = scmp.ne.s32.totalorder %s3310_s2, %s2402_s21  ;;  %p2409_p12 = scmp.lt.u32.totalorder %s2402_s21, %s3310_s2 }
  0x25   : > { %p2405_p10 = pnand %p2403_p9, %p2565_p7 }
  0x27   : > { %p2406_p11 = pneg %p2405_p10 }
  0x29   : > { %p2411_p13 = pnand %p2409_p12, %p2406_p11 }
  0x2b   : > { %2414 = shalt.err (!%p2411_p13)
}
  0x2c   : > { %s2415_s17 = scalar_lea.vmem %s2544_s22, 4096  ;;  %p2423_p6 = scmp.lt.s32.totalorder %s2544_s22, %s2544_s22 }
  0x2d   : > { %p2416_p0 = scmp.ne.s32.totalorder %s2544_s22, %s2415_s17  ;;  %p2424_p8 = scmp.lt.s32.totalorder %s2415_s17, %s2415_s17 }
  0x2f   : > { %p2418_p1 = pnand %p2416_p0, %p2565_p7  ;;  %p2425_p9 = por %p2424_p8, %p2423_p6 }
  0x31   : > { %p2419_p4 = pneg %p2418_p1 }
  0x33   : > { %p2426_p10 = pnand %p2425_p9, %p2419_p4 }
  0x35   : > { %2429 = shalt.err (!%p2426_p10)
}
  0x36   : > { %s2493_s29 = smov 64   ;;  %s2494_s30 = smov 4  }
  0x37   : > { %2140 = dma.hbm_to_vmem [thread:$0]  (!%p2548_p5), %s3310_s2, 4096, %s2544_s22, [#allocation6], %s2493_s29, %s2493_s29, %s2494_s30  }
  0x38   : > { %s2430_s8 = scalar_lea.vmem %s2555_s26, 16  ;;  %p2438_p0 = scmp.lt.s32.totalorder %s2555_s26, %s2555_s26 }
  0x39   : > { %p2431_p11 = scmp.ne.s32.totalorder %s2555_s26, %s2430_s8  ;;  %p2439_p1 = scmp.lt.s32.totalorder %s2430_s8, %s2430_s8 }
  0x3b   : > { %p2433_p12 = pnand %p2431_p11, %p2565_p7  ;;  %p2440_p4 = por %p2439_p1, %p2438_p0 }
  0x3d   : > { %p2434_p13 = pneg %p2433_p12 }
  0x3f   : > { %p2441_p6 = pnand %p2440_p4, %p2434_p13 }
  0x41   : > { %2444 = shalt.err (!%p2441_p6)
}
  0x42   : > { %s2495_s9 = smov [#allocation7]   ;;  %198 = sbr.rel (%p2538_p3) target bundleno = 1280 (0x500), region = 36 }
  0x43   : > { %2143 = dma.vmem_to_smem (!%p2548_p5), %s2555_s26, 16, %s2495_s9, [#allocation4]  }
  0x49   : > { %2450 = dma.done.wait (%p2532_p2), [#allocation3], 4096  }
  0x4a   : > { %2452 = vsyncadd (%p2532_p2), [#allocation3], 4294963200 }
  0x4b   : > { %2454 = dma.done.wait (%p2532_p2), [#allocation6], 4096  }
  0x4c   : > { %2456 = vsyncadd (%p2532_p2), [#allocation6], 4294963200 }
  0x4d   : > { %2458 = dma.done.wait (%p2532_p2), [#allocation4], 16  }
  0x4e   : > { %2460 = vsyncadd (%p2532_p2), [#allocation4], 4294967280 }
  0x4f   : > { %212 = sfence }
  0x50   : > { %s1873_s20 = sshll.u32 %s1862_s18, 3  ;;  %v2166_v20 = vld [vmem:[#allocation2 + $0x4] ss:$16 sps:$4 sm:$0xff]   ;;  %v2168_v21 = vld [vmem:[#allocation2 + $0xc] ss:$16 sps:$4 sm:$0xff]   ;;  %s749_s18 = sld [smem:[#allocation7]] }
  0x51   : > { %p234_p3 = scmp.lt.s32.totalorder %s1873_s20, 15  ;;  %v2170_v22 = vld [vmem:[#allocation2] ss:$16 sps:$4 sm:$0xff]   ;;  %v2171_v23 = vld [vmem:[#allocation2 + $0x8] ss:$16 sps:$4 sm:$0xff]   ;;  %603 = vmatprep.subr.bf16.mxu0 %v2166_v20  ;;  %676 = vmatprep.subr.bf16.mxu1 %v2168_v21  ;;  %s1941_s19 = sld [smem:[#allocation7 + $0x1]] }
  0x52   : > { %604 = vmatpush1.bf16.msra.mxu0 %v2170_v22  ;;  %677 = vmatpush1.bf16.msra.mxu1 %v2171_v23  ;;  %v2190_v20 = vld [vmem:[#allocation2 + $0x84] ss:$16 sps:$4 sm:$0xff]   ;;  %v2192_v21 = vld [vmem:[#allocation2 + $0x8c] ss:$16 sps:$4 sm:$0xff]   ;;  %v2194_v22 = vld [vmem:[#allocation2 + $0x80] ss:$16 sps:$4 sm:$0xff]  }
  0x53   : > { %s3328_s20 = smov (!%p234_p3, %s1873_s20), 15  ;;  %v2195_v23 = vld [vmem:[#allocation2 + $0x88] ss:$16 sps:$4 sm:$0xff]  }
  0x54   : > { %s1874_s22 = sshll.u32 %s3328_s20, 2 }
  0x55   : > { %s237_s6 = scalar_lea.vmem %s3308_s0, %s1874_s22  ;;  %s3281_s12 = scalar_lea.vmem %s3312_s4, %s1874_s22 }
  0x56   : > { %v1961_v0 = vld [vmem:[%s237_s6] sm:$0xff]   ;;  %v1996_v1 = vld [vmem:[%s237_s6 + $0x8] sm:$0xff]   ;;  %v1997_v6 = vld [vmem:[%s237_s6 + $0x10] sm:$0xff]  }
  0x57   : > { %v2642_v2 = vunpack.c.l.bf16 %v1961_v0  ;;  %v2644_v3 = vunpack.c.l.bf16 %v1996_v1  ;;  %v2646_v4 = vunpack.c.h.bf16 %v1961_v0  ;;  %v2648_v5 = vunpack.c.h.bf16 %v1996_v1  ;;  %v1998_v9 = vld [vmem:[%s237_s6 + $0x18] sm:$0xff]  }
  0x58   : > { %v2658_v12 = vunpack.c.l.bf16 %v1997_v6  ;;  %v2660_v13 = vunpack.c.h.bf16 %v1997_v6  ;;  %v2666_v16 = vunpack.c.l.bf16 %v1998_v9  ;;  %v2668_v17 = vunpack.c.h.bf16 %v1998_v9  ;;  %v2174_v9 = vld [vmem:[#allocation2 + $0x2c] ss:$16 sps:$4 sm:$0xff]  }
  0x59   : > { %v262_v7 = vmul.f32 %v2642_v2, %v2642_v2  ;;  %v264_v8 = vmul.f32 %v2644_v3, %v2644_v3  ;;  %v263_v10 = vmul.f32 %v2646_v4, %v2646_v4  ;;  %v265_v11 = vmul.f32 %v2648_v5, %v2648_v5  ;;  %678 = vmatprep.subr.bf16.mxu1 %v2174_v9 }
  0x5a   : > { %v266_v14 = vmul.f32 %v2658_v12, %v2658_v12  ;;  %v267_v15 = vmul.f32 %v2660_v13, %v2660_v13  ;;  %v268_v18 = vmul.f32 %v2666_v16, %v2666_v16  ;;  %v269_v19 = vmul.f32 %v2668_v17, %v2668_v17 }
  0x5b   : > { %270 = vadd.xlane.f32.xlu0 %v262_v7  ;;  %274 = vadd.xlane.f32.xlu1 %v264_v8  ;;  %v2172_v8 = vld [vmem:[#allocation2 + $0x24] ss:$16 sps:$4 sm:$0xff]  }
  0x5c   : > { %605 = vmatprep.subr.bf16.mxu0 %v2172_v8 }
  0x5f   : > { %272 = vadd.xlane.f32.xlu0 %v263_v10  ;;  %276 = vadd.xlane.f32.xlu1 %v265_v11  ;;  %v2176_v10 = vld [vmem:[#allocation2 + $0x20] ss:$16 sps:$4 sm:$0xff]   ;;  %v2177_v11 = vld [vmem:[#allocation2 + $0x28] ss:$16 sps:$4 sm:$0xff]  }
  0x60   : > { %606 = vmatpush1.bf16.msra.mxu0 %v2176_v10  ;;  %679 = vmatpush1.bf16.msra.mxu1 %v2177_v11 }
  0x63   : > { %278 = vadd.xlane.f32.xlu0 %v266_v14  ;;  %280 = vadd.xlane.f32.xlu1 %v267_v15  ;;  %v2182_v14 = vld [vmem:[#allocation2 + $0x40] ss:$16 sps:$4 sm:$0xff]   ;;  %v2183_v15 = vld [vmem:[#allocation2 + $0x48] ss:$16 sps:$4 sm:$0xff]  }
  0x67   : > { %282 = vadd.xlane.f32.xlu0 %v268_v18  ;;  %284 = vadd.xlane.f32.xlu1 %v269_v19  ;;  %v2188_v18 = vld [vmem:[#allocation2 + $0x60] ss:$16 sps:$4 sm:$0xff]   ;;  %v2189_v19 = vld [vmem:[#allocation2 + $0x68] ss:$16 sps:$4 sm:$0xff]  }
  0xe8   : > { %v271_v24 = vpop.xlane.xlu0 %270  ;;  %v275_v25 = vpop.xlane.xlu1 %274 }
  0xe9   : > { %v287_v26 = vmul.f32 0.0078125, %v271_v24  ;;  %v289_v27 = vmul.f32 0.0078125, %v275_v25  ;;  %v2196_v24 = vld [vmem:[#allocation2 + $0xa4] ss:$16 sps:$4 sm:$0xff]   ;;  %v2198_v25 = vld [vmem:[#allocation2 + $0xac] ss:$16 sps:$4 sm:$0xff]  }
  0xeb   : > { %v295_v28 = vadd.f32 1e-06, %v287_v26  ;;  %v297_v29 = vadd.f32 1e-06, %v289_v27  ;;  %v2200_v26 = vld [vmem:[#allocation2 + $0xa0] ss:$16 sps:$4 sm:$0xff]  }
  0xec   : > { %v273_v30 = vpop.xlane.xlu0 %272  ;;  %v277_v31 = vpop.xlane.xlu1 %276  ;;  %v2201_v27 = vld [vmem:[#allocation2 + $0xa8] ss:$16 sps:$4 sm:$0xff]  }
  0xed   : > { %2246 = vrsqrt.f32 %v295_v28  ;;  %v288_v32 = vmul.f32 0.0078125, %v273_v30  ;;  %v290_v33 = vmul.f32 0.0078125, %v277_v31  ;;  %v2202_v28 = vld [vmem:[#allocation2 + $0xc4] ss:$16 sps:$4 sm:$0xff]   ;;  %v2206_v30 = vld [vmem:[#allocation2 + $0xc0] ss:$16 sps:$4 sm:$0xff]  }
  0xee   : > { %2248 = vrsqrt.f32 %v297_v29  ;;  %v2204_v29 = vld [vmem:[#allocation2 + $0xcc] ss:$16 sps:$4 sm:$0xff]   ;;  %v2207_v31 = vld [vmem:[#allocation2 + $0xc8] ss:$16 sps:$4 sm:$0xff]  }
  0xef   : > { %v296_v34 = vadd.f32 1e-06, %v288_v32  ;;  %v298_v35 = vadd.f32 1e-06, %v290_v33  ;;  %v2208_v32 = vld [vmem:[#allocation2 + $0xe4] ss:$16 sps:$4 sm:$0xff]  }
  0xf0   : > { %v279_v36 = vpop.xlane.xlu0 %278  ;;  %v281_v37 = vpop.xlane.xlu1 %280  ;;  %v2210_v33 = vld [vmem:[#allocation2 + $0xec] ss:$16 sps:$4 sm:$0xff]  }
  0xf1   : > { %2250 = vrsqrt.f32 %v296_v34  ;;  %v291_v38 = vmul.f32 0.0078125, %v279_v36  ;;  %v292_v39 = vmul.f32 0.0078125, %v281_v37  ;;  %v2212_v34 = vld [vmem:[#allocation2 + $0xe0] ss:$16 sps:$4 sm:$0xff]   ;;  %v2496_v36 = vmov 0  }
  0xf2   : > { %2252 = vrsqrt.f32 %v298_v35  ;;  %v2213_v35 = vld [vmem:[#allocation2 + $0xe8] ss:$16 sps:$4 sm:$0xff]   ;;  %635 = vmatprep.mubr.bf16.mxu0 %v2496_v36  ;;  %708 = vmatprep.mubr.bf16.mxu1 %v2496_v36 }
  0xf3   : > { %v299_v40 = vadd.f32 1e-06, %v291_v38  ;;  %v300_v41 = vadd.f32 1e-06, %v292_v39 }
  0xf4   : > { %v283_v42 = vpop.xlane.xlu0 %282  ;;  %v285_v43 = vpop.xlane.xlu1 %284 }
  0xf5   : > { %2254 = vrsqrt.f32 %v299_v40  ;;  %v293_v44 = vmul.f32 0.0078125, %v283_v42  ;;  %v294_v45 = vmul.f32 0.0078125, %v285_v43 }
  0xf6   : > { %2256 = vrsqrt.f32 %v300_v41 }
  0xf7   : > { %v2247_v46 = vpop.eup %2246  ;;  %v301_v47 = vadd.f32 1e-06, %v293_v44  ;;  %v302_v48 = vadd.f32 1e-06, %v294_v45 }
  0xf8   : > { %v2249_v49 = vpop.eup %2248  ;;  %v2675_v50 = vmul.f32 %v2247_v46, %v2642_v2 }
  0xf9   : > { %2258 = vrsqrt.f32 %v301_v47  ;;  %v2678_v51 = vmul.f32 %v2249_v49, %v2644_v3 }
  0xfa   : > { %2260 = vrsqrt.f32 %v302_v48  ;;  %v319_v52 = vand.u32 2147483647, %v2675_v50 }
  0xfb   : > { %v2251_v53 = vpop.eup %2250  ;;  %v321_v55 = vand.u32 2147483647, %v2678_v51 }
  0xfc   : > { %v2253_v54 = vpop.eup %2252  ;;  %327 = vmax.xlane.f32.xlu0 %v319_v52  ;;  %v2683_v56 = vmul.f32 %v2251_v53, %v2646_v4 }
  0xfd   : > { %v2686_v57 = vmul.f32 %v2253_v54, %v2648_v5 }
  0xfe   : > { %v320_v58 = vand.u32 2147483647, %v2683_v56 }
  0xff   : > { %v2255_v59 = vpop.eup %2254  ;;  %v322_v61 = vand.u32 2147483647, %v2686_v57 }
 0x100   : > { %v2257_v60 = vpop.eup %2256  ;;  %331 = vmax.xlane.f32.xlu0 %v321_v55  ;;  %329 = vmax.xlane.f32.xlu1 %v320_v58  ;;  %v2691_v62 = vmul.f32 %v2255_v59, %v2658_v12  ;;  %v2178_v12 = vld [vmem:[#allocation2 + $0x44] ss:$16 sps:$4 sm:$0xff]  }
 0x101   : > { %v2694_v63 = vmul.f32 %v2257_v60, %v2660_v13  ;;  %v2180_v13 = vld [vmem:[#allocation2 + $0x4c] ss:$16 sps:$4 sm:$0xff]   ;;  %607 = vmatprep.subr.bf16.mxu0 %v2178_v12 }
 0x102   : > { %v323_v0 = vand.u32 2147483647, %v2691_v62  ;;  %680 = vmatprep.subr.bf16.mxu1 %v2180_v13  ;;  %608 = vmatpush1.bf16.msra.mxu0 %v2182_v14 }
 0x103   : > { %v2259_v1 = vpop.eup %2258  ;;  %v324_v3 = vand.u32 2147483647, %v2694_v63  ;;  %681 = vmatpush1.bf16.msra.mxu1 %v2183_v15 }
 0x104   : > { %v2261_v2 = vpop.eup %2260  ;;  %333 = vmax.xlane.f32.xlu1 %v322_v61  ;;  %335 = vmax.xlane.f32.xlu0 %v323_v0  ;;  %v2699_v4 = vmul.f32 %v2259_v1, %v2666_v16  ;;  %v2184_v16 = vld [vmem:[#allocation2 + $0x64] ss:$16 sps:$4 sm:$0xff]  }
 0x105   : > { %v2702_v5 = vmul.f32 %v2261_v2, %v2668_v17  ;;  %v2186_v17 = vld [vmem:[#allocation2 + $0x6c] ss:$16 sps:$4 sm:$0xff]   ;;  %609 = vmatprep.subr.bf16.mxu0 %v2184_v16 }
 0x106   : > { %v325_v6 = vand.u32 2147483647, %v2699_v4  ;;  %682 = vmatprep.subr.bf16.mxu1 %v2186_v17  ;;  %610 = vmatpush1.bf16.msra.mxu0 %v2188_v18 }
 0x107   : > { %v326_v7 = vand.u32 2147483647, %v2702_v5  ;;  %683 = vmatpush1.bf16.msra.mxu1 %v2189_v19  ;;  %611 = vmatprep.subr.bf16.mxu0 %v2190_v20 }
 0x108   : > { %337 = vmax.xlane.f32.xlu1 %v324_v3  ;;  %339 = vmax.xlane.f32.xlu0 %v325_v6 }
 0x109   : > { %684 = vmatprep.subr.bf16.mxu1 %v2192_v21 }
 0x10a   : > { %612 = vmatpush1.bf16.msra.mxu0 %v2194_v22 }
 0x10b   : > { %685 = vmatpush1.bf16.msra.mxu1 %v2195_v23  ;;  %613 = vmatprep.subr.bf16.mxu0 %v2196_v24 }
 0x10c   : > { %341 = vmax.xlane.f32.xlu1 %v326_v7  ;;  %686 = vmatprep.subr.bf16.mxu1 %v2198_v25 }
 0x10e   : > { %614 = vmatpush1.bf16.msra.mxu0 %v2200_v26 }
 0x10f   : > { %687 = vmatpush1.bf16.msra.mxu1 %v2201_v27  ;;  %615 = vmatprep.subr.bf16.mxu0 %v2202_v28 }
 0x110   : > { %688 = vmatprep.subr.bf16.mxu1 %v2204_v29 }
 0x112   : > { %616 = vmatpush1.bf16.msra.mxu0 %v2206_v30 }
 0x113   : > { %689 = vmatpush1.bf16.msra.mxu1 %v2207_v31  ;;  %617 = vmatprep.subr.bf16.mxu0 %v2208_v32 }
 0x114   : > { %690 = vmatprep.subr.bf16.mxu1 %v2210_v33 }
 0x116   : > { %618 = vmatpush1.bf16.msra.mxu0 %v2212_v34 }
 0x117   : > { %691 = vmatpush1.bf16.msra.mxu1 %v2213_v35 }
 0x189   : > { %v2708_v37 = vpop.xlane.xlu0 %327 }
 0x18a   : > { %v343_v38 = vmax.f32 %v2708_v37, 1e-05 }
 0x18c   : > { %2262 = vrcp.f32 %v343_v38 }
 0x18d   : > { %v2713_v39 = vpop.xlane.xlu1 %329  ;;  %v2715_v40 = vpop.xlane.xlu0 %331 }
 0x18e   : > { %v344_v41 = vmax.f32 %v2713_v39, 1e-05  ;;  %v345_v42 = vmax.f32 %v2715_v40, 1e-05 }
 0x190   : > { %2264 = vrcp.f32 %v344_v41 }
 0x191   : > { %2266 = vrcp.f32 %v345_v42  ;;  %v2723_v43 = vpop.xlane.xlu1 %333  ;;  %v2725_v44 = vpop.xlane.xlu0 %335 }
 0x192   : > { %v346_v45 = vmax.f32 %v2723_v43, 1e-05  ;;  %v347_v46 = vmax.f32 %v2725_v44, 1e-05 }
 0x194   : > { %2268 = vrcp.f32 %v346_v45 }
 0x195   : > { %2270 = vrcp.f32 %v347_v46  ;;  %v2733_v47 = vpop.xlane.xlu1 %337  ;;  %v2736_v53 = vpop.xlane.xlu0 %339 }
 0x196   : > { %v2263_v48 = vpop.eup %2262  ;;  %v348_v49 = vmax.f32 %v2733_v47, 1e-05  ;;  %v349_v59 = vmax.f32 %v2736_v53, 1e-05 }
 0x197   : > { %v352_v52 = vmul.f32 127.0, %v2263_v48 }
 0x198   : > { %2272 = vrcp.f32 %v348_v49  ;;  %v405_v39 = vmul.f32 0.007874016, %v349_v59 }
 0x199   : > { %v367_v54 = vmul.f32 %v352_v52, %v2675_v50  ;;  %v2741_v55 = vpop.xlane.xlu1 %341 }
 0x19a   : > { %v2265_v58 = vpop.eup %2264  ;;  %v350_v60 = vmax.f32 %v2741_v55, 1e-05 }
 0x19b   : > { %v2267_v61 = vpop.eup %2266  ;;  %v354_v0 = vmul.f32 127.0, %v2265_v58  ;;  %v2082_v1 = vround.rtne.f32 %v367_v54 }
 0x19c   : > { %v356_v2 = vmul.f32 127.0, %v2267_v61  ;;  %2274 = vrcp.f32 %v350_v60 }
 0x19d   : > { %v368_v3 = vmul.f32 %v354_v0, %v2683_v56  ;;  %2276 = vrcp.f32 %v349_v59  ;;  %v383_v50 = vmax.f32 %v2082_v1, -128.0  ;;  %v399_v0 = vmul.f32 0.007874016, %v343_v38 }
 0x19e   : > { %v2269_v6 = vpop.eup %2268  ;;  %v369_v8 = vmul.f32 %v356_v2, %v2678_v51  ;;  %v750_v1 = vstv %s749_s18 }
 0x19f   : > { %v2271_v7 = vpop.eup %2270  ;;  %v358_v9 = vmul.f32 127.0, %v2269_v6  ;;  %v2083_v10 = vround.rtne.f32 %v368_v3  ;;  %v391_v15 = vmin.f32 %v383_v50, 127.0  ;;  %v751_v2 = vmul.f32 %v750_v1, %v399_v0 }
 0x1a0   : > { %v360_v14 = vmul.f32 127.0, %v2271_v7  ;;  %v2084_v18 = vround.rtne.f32 %v369_v8  ;;  %v400_v3 = vmul.f32 0.007874016, %v344_v41  ;;  %v401_v6 = vmul.f32 0.007874016, %v345_v42 }
 0x1a1   : > { %v370_v11 = vmul.f32 %v358_v9, %v2686_v57  ;;  %v384_v12 = vmax.f32 %v2083_v10, -128.0  ;;  %v403_v8 = vmul.f32 0.007874016, %v347_v46  ;;  %v2782_v55 = vmul.f32 %v750_v1, %v405_v39 }
 0x1a2   : > { %v2273_v13 = vpop.eup %2272  ;;  %v371_v23 = vmul.f32 %v360_v14, %v2691_v62  ;;  %v385_v51 = vmax.f32 %v2084_v18, -128.0 }
 0x1a3   : > { %v362_v16 = vmul.f32 127.0, %v2273_v13  ;;  %v392_v17 = vmin.f32 %v384_v12, 127.0  ;;  %v2085_v56 = vround.rtne.f32 %v370_v11  ;;  %v404_v11 = vmul.f32 0.007874016, %v348_v49 }
 0x1a4   : > { %v393_v28 = vmin.f32 %v385_v51, 127.0  ;;  %v2086_v29 = vround.rtne.f32 %v371_v23  ;;  %v406_v12 = vmul.f32 0.007874016, %v350_v60  ;;  %v753_v13 = vmul.f32 %v750_v1, %v401_v6 }
 0x1a5   : > { %v372_v19 = vmul.f32 %v362_v16, %v2694_v63  ;;  %v407_v20 = vpack.c.bf16 %v392_v17, %v391_v15  ;;  %v386_v21 = vmax.f32 %v2085_v56, -128.0  ;;  %v2778_v17 = vmul.f32 %v750_v1, %v403_v8 }
 0x1a6   : > { %v2275_v22 = vpop.eup %2274  ;;  %v387_v32 = vmax.f32 %v2086_v29, -128.0  ;;  %v2780_v18 = vmul.f32 %v750_v1, %v404_v11  ;;  %v2784_v60 = vmul.f32 %v750_v1, %v406_v12 }
 0x1a7   : > { %636 = vmatmul.mubr.bf16.vlgmr.msra.gmra.mrb[0].mxu0 %v407_v20  ;;  %709 = vmatmul.mubr.bf16.vlgmr.msra.gmra.mrb[0].mxu1 %v407_v20  ;;  %v2277_v24 = vpop.eup %2276  ;;  %v366_v57 = vmul.f32 127.0, %v2275_v22  ;;  %v394_v25 = vmin.f32 %v386_v21, 127.0  ;;  %v2087_v26 = vround.rtne.f32 %v372_v19 }
 0x1a8   : > { %645 = vmatprep.mubr.bf16.mxu0 %v2496_v36  ;;  %718 = vmatprep.mubr.bf16.mxu1 %v2496_v36  ;;  %v364_v27 = vmul.f32 127.0, %v2277_v24  ;;  %v395_v35 = vmin.f32 %v387_v32, 127.0 }
 0x1a9   : > { %v374_v63 = vmul.f32 %v366_v57, %v2702_v5  ;;  %v408_v30 = vpack.c.bf16 %v394_v25, %v393_v28  ;;  %v388_v31 = vmax.f32 %v2087_v26, -128.0 }
 0x1aa   : > { %v373_v62 = vmul.f32 %v364_v27, %v2699_v4 }
 0x1ab   : > { %v396_v33 = vmin.f32 %v388_v31, 127.0  ;;  %v2089_v34 = vround.rtne.f32 %v374_v63 }
 0x1ac   : > { %v2088_v48 = vround.rtne.f32 %v373_v62 }
 0x1ad   : > { %v409_v52 = vpack.c.bf16 %v396_v33, %v395_v35  ;;  %v390_v54 = vmax.f32 %v2089_v34, -128.0 }
 0x1ae   : > { %v389_v5 = vmax.f32 %v2088_v48, -128.0 }
 0x1af   : > { %646 = vmatmul.mubr.bf16.gmra.mrb[4].mxu0 %v408_v30  ;;  %719 = vmatmul.mubr.bf16.gmra.mrb[4].mxu1 %v408_v30  ;;  %v398_v4 = vmin.f32 %v390_v54, 127.0 }
 0x1b0   : > { %655 = vmatprep.mubr.bf16.mxu0 %v2496_v36  ;;  %728 = vmatprep.mubr.bf16.mxu1 %v2496_v36  ;;  %v397_v58 = vmin.f32 %v389_v5, 127.0 }
 0x1b2   : > { %v410_v61 = vpack.c.bf16 %v398_v4, %v397_v58 }
 0x1b7   : > { %656 = vmatmul.mubr.bf16.gmra.mrb[8].mxu0 %v409_v52  ;;  %729 = vmatmul.mubr.bf16.gmra.mrb[8].mxu1 %v409_v52 }
 0x1b8   : > { %665 = vmatprep.mubr.bf16.mxu0 %v2496_v36  ;;  %738 = vmatprep.mubr.bf16.mxu1 %v2496_v36  ;;  %v402_v36 = vmul.f32 0.007874016, %v346_v45  ;;  %v752_v45 = vmul.f32 %v750_v1, %v400_v3 }
 0x1ba   : > { %v754_v14 = vmul.f32 %v750_v1, %v402_v36 }
 0x1bf   : > { %666 = vmatmul.mubr.bf16.gmra.mrb[12].mxu0 %v410_v61  ;;  %739 = vmatmul.mubr.bf16.gmra.mrb[12].mxu1 %v410_v61 }
 0x27a   : > { %v637_v50 = vpop.f32.mrb[0].mxu0  ;;  %v710_v7 = vpop.f32.mrb[0].mxu1 }
 0x27b   : > { %v759_v9 = vmul.f32 %v751_v2, %v637_v50  ;;  %v761_v10 = vmul.f32 %v751_v2, %v710_v7  ;;  %v639_v37 = vpop.f32.mrb[1].mxu0  ;;  %v712_v38 = vpop.f32.mrb[1].mxu1 }
 0x27c   : > { %v760_v40 = vmul.f32 %v751_v2, %v639_v37  ;;  %v762_v41 = vmul.f32 %v751_v2, %v712_v38  ;;  %v641_v42 = vpop.f32.mrb[2].mxu0  ;;  %v714_v43 = vpop.f32.mrb[2].mxu1 }
 0x27d   : > { %v823_v44 = vmul.f32 0.70710677, %v759_v9  ;;  %v825_v46 = vmul.f32 0.70710677, %v761_v10  ;;  %v763_v47 = vmul.f32 %v752_v45, %v641_v42  ;;  %v765_v49 = vmul.f32 %v752_v45, %v714_v43  ;;  %v643_v53 = vpop.f32.mrb[3].mxu0  ;;  %v716_v59 = vpop.f32.mrb[3].mxu1 }
 0x27e   : > { %v824_v15 = vmul.f32 0.70710677, %v760_v40  ;;  %v826_v16 = vmul.f32 0.70710677, %v762_v41  ;;  %v764_v56 = vmul.f32 %v752_v45, %v643_v53  ;;  %v766_v19 = vmul.f32 %v752_v45, %v716_v59 }
 0x27f   : > { %2278 = verf.f32 %v823_v44  ;;  %v827_v20 = vmul.f32 0.70710677, %v763_v47  ;;  %v791_v21 = vmul.f32 0.5, %v759_v9  ;;  %v829_v22 = vmul.f32 0.70710677, %v765_v49 }
 0x280   : > { %2280 = verf.f32 %v825_v46  ;;  %v828_v23 = vmul.f32 0.70710677, %v764_v56  ;;  %v2786_v24 = vmul.f32 0.5, %v761_v10  ;;  %v830_v57 = vmul.f32 0.70710677, %v766_v19 }
 0x281   : > { %2282 = verf.f32 %v824_v15  ;;  %v792_v28 = vmul.f32 0.5, %v760_v40  ;;  %v2788_v62 = vmul.f32 0.5, %v762_v41  ;;  %v795_v48 = vmul.f32 0.5, %v763_v47 }
 0x282   : > { %2284 = verf.f32 %v826_v16  ;;  %v647_v51 = vpop.f32.mrb[4].mxu0  ;;  %v720_v26 = vpop.f32.mrb[4].mxu1  ;;  %v2790_v52 = vmul.f32 0.5, %v765_v49  ;;  %v2792_v4 = vmul.f32 0.5, %v764_v56  ;;  %v2794_v6 = vmul.f32 0.5, %v766_v19 }
 0x283   : > { %2286 = verf.f32 %v827_v20  ;;  %v767_v25 = vmul.f32 %v753_v13, %v647_v51  ;;  %v649_v27 = vpop.f32.mrb[5].mxu0  ;;  %v769_v29 = vmul.f32 %v753_v13, %v720_v26  ;;  %v722_v30 = vpop.f32.mrb[5].mxu1 }
 0x284   : > { %2288 = verf.f32 %v829_v22  ;;  %v768_v63 = vmul.f32 %v753_v13, %v649_v27  ;;  %v651_v31 = vpop.f32.mrb[6].mxu0  ;;  %v770_v33 = vmul.f32 %v753_v13, %v722_v30  ;;  %v724_v34 = vpop.f32.mrb[6].mxu1 }
 0x285   : > { %2290 = verf.f32 %v828_v23  ;;  %v831_v32 = vmul.f32 0.70710677, %v767_v25  ;;  %v653_v35 = vpop.f32.mrb[7].mxu0  ;;  %v833_v54 = vmul.f32 0.70710677, %v769_v29  ;;  %v726_v5 = vpop.f32.mrb[7].mxu1  ;;  %v771_v0 = vmul.f32 %v754_v14, %v651_v31 }
 0x286   : > { %2292 = verf.f32 %v830_v57  ;;  %v832_v58 = vmul.f32 0.70710677, %v768_v63  ;;  %v834_v61 = vmul.f32 0.70710677, %v770_v33  ;;  %v773_v1 = vmul.f32 %v754_v14, %v724_v34 }
 0x287   : > { %2294 = verf.f32 %v831_v32  ;;  %v772_v2 = vmul.f32 %v754_v14, %v653_v35  ;;  %v2796_v36 = vmul.f32 0.5, %v767_v25  ;;  %v774_v50 = vmul.f32 %v754_v14, %v726_v5 }
 0x288   : > { %2296 = verf.f32 %v833_v54  ;;  %v2798_v9 = vmul.f32 0.5, %v769_v29  ;;  %v835_v10 = vmul.f32 0.70710677, %v771_v0  ;;  %v2800_v40 = vmul.f32 0.5, %v768_v63 }
 0x289   : > { %v2279_v3 = vpop.eup %2278  ;;  %2298 = verf.f32 %v832_v58  ;;  %v2802_v41 = vmul.f32 0.5, %v770_v33  ;;  %v837_v42 = vmul.f32 0.70710677, %v773_v1  ;;  %v2804_v44 = vmul.f32 0.5, %v771_v0 }
 0x28a   : > { %v2281_v7 = vpop.eup %2280  ;;  %v887_v8 = vadd.f32 1.0, %v2279_v3  ;;  %2300 = verf.f32 %v834_v61  ;;  %v657_v37 = vpop.f32.mrb[8].mxu0  ;;  %v836_v46 = vmul.f32 0.70710677, %v772_v2  ;;  %v2808_v49 = vmul.f32 0.5, %v773_v1 }
 0x28b   : > { %v730_v38 = vpop.f32.mrb[8].mxu1  ;;  %v2283_v11 = vpop.eup %2282  ;;  %v889_v39 = vadd.f32 1.0, %v2281_v7  ;;  %2302 = verf.f32 %v835_v10  ;;  %v2816_v22 = vmul.f32 0.5, %v772_v2  ;;  %v838_v25 = vmul.f32 0.70710677, %v774_v50 }
 0x28c   : > { %v659_v43 = vpop.f32.mrb[9].mxu0  ;;  %v2285_v45 = vpop.eup %2284  ;;  %v888_v12 = vadd.f32 1.0, %v2283_v11  ;;  %v2806_v16 = vmul.f32 %v887_v8, %v791_v21  ;;  %2304 = verf.f32 %v837_v42  ;;  %v775_v26 = vmul.f32 %v2778_v17, %v657_v37 }
 0x28d   : > { %v732_v13 = vpop.f32.mrb[9].mxu1  ;;  %v661_v14 = vpop.f32.mrb[10].mxu0  ;;  %v890_v47 = vadd.f32 1.0, %v2285_v45  ;;  %2306 = verf.f32 %v836_v46  ;;  %v2821_v21 = vmul.f32 %v889_v39, %v2786_v24  ;;  %v777_v30 = vmul.f32 %v2778_v17, %v730_v38 }
 0x28e   : > { %v2287_v15 = vpop.eup %2286  ;;  %v2810_v53 = vpop.f32.mrb[10].mxu1  ;;  %v2814_v19 = vmul.f32 %v888_v12, %v792_v28  ;;  %v2826_v28 = vmul.f32 0.5, %v774_v50  ;;  %v2831_v32 = vmul.f32 %v2806_v16, %v2806_v16  ;;  %2308 = verf.f32 %v838_v25 }
 0x28f   : > { %v2812_v59 = vpop.f32.mrb[11].mxu0  ;;  %v2289_v56 = vpop.eup %2288  ;;  %v891_v20 = vadd.f32 1.0, %v2287_v15  ;;  %v2834_v24 = vmul.f32 %v890_v47, %v2788_v62  ;;  %v839_v5 = vmul.f32 0.70710677, %v775_v26  ;;  %v2848_v2 = vmul.f32 0.5, %v775_v26 }
 0x290   : > { %v2818_v23 = vpop.f32.mrb[11].mxu1  ;;  %v2291_v51 = vpop.eup %2290  ;;  %v893_v57 = vadd.f32 1.0, %v2289_v56  ;;  %v2838_v35 = vmul.f32 %v2814_v19, %v2814_v19  ;;  %v841_v3 = vmul.f32 0.70710677, %v777_v30  ;;  %v776_v42 = vmul.f32 %v2778_v17, %v659_v43 }
 0x291   : > { %v2293_v27 = vpop.eup %2292  ;;  %v2824_v29 = vmul.f32 %v891_v20, %v795_v48  ;;  %v892_v63 = vadd.f32 1.0, %v2291_v51  ;;  %2310 = verf.f32 %v839_v5  ;;  %v2874_v15 = vmul.f32 0.5, %v777_v30 }
 0x292   : > { %v2295_v31 = vpop.eup %2294  ;;  %v894_v33 = vadd.f32 1.0, %v2293_v27  ;;  %v2841_v48 = vmul.f32 %v893_v57, %v2790_v52  ;;  %v667_v58 = vpop.f32.mrb[12].mxu0  ;;  %2312 = verf.f32 %v841_v3  ;;  %v778_v47 = vmul.f32 %v2778_v17, %v732_v13 }
 0x293   : > { %v2297_v34 = vpop.eup %2296  ;;  %v895_v54 = vadd.f32 1.0, %v2295_v31  ;;  %v2843_v61 = vpop.f32.mrb[12].mxu1  ;;  %v2846_v1 = vmul.f32 %v892_v63, %v2792_v4  ;;  %v2854_v52 = vmul.f32 %v2824_v29, %v2824_v29  ;;  %v779_v56 = vmul.f32 %v2780_v18, %v661_v14 }
 0x294   : > { %v2299_v0 = vpop.eup %2298  ;;  %v897_v62 = vadd.f32 1.0, %v2297_v34  ;;  %v669_v50 = vpop.f32.mrb[13].mxu0  ;;  %v2864_v11 = vmul.f32 %v894_v33, %v2794_v6  ;;  %v840_v57 = vmul.f32 0.70710677, %v776_v42  ;;  %v842_v13 = vmul.f32 0.70710677, %v778_v47 }
 0x295   : > { %v2850_v7 = vpop.f32.mrb[13].mxu1  ;;  %v2301_v8 = vpop.eup %2300  ;;  %v2857_v10 = vmul.f32 %v895_v54, %v2796_v36  ;;  %v896_v37 = vadd.f32 1.0, %v2299_v0  ;;  %v2880_v20 = vmul.f32 %v2846_v1, %v2846_v1  ;;  %v808_v63 = vmul.f32 0.5, %v776_v42 }
 0x296   : > { %v2859_v38 = vpop.f32.mrb[14].mxu0  ;;  %v2861_v4 = vpop.f32.mrb[14].mxu1  ;;  %v898_v39 = vadd.f32 1.0, %v2301_v8  ;;  %v2883_v43 = vmul.f32 %v897_v62, %v2798_v9  ;;  %2314 = verf.f32 %v840_v57  ;;  %v843_v30 = vmul.f32 0.70710677, %v779_v56 }
 0x297   : > { %v2867_v45 = vpop.f32.mrb[15].mxu0  ;;  %v2869_v12 = vpop.f32.mrb[15].mxu1  ;;  %v2872_v36 = vmul.f32 %v896_v37, %v2800_v40  ;;  %v2887_v40 = vmul.f32 %v2857_v10, %v2857_v10  ;;  %2316 = verf.f32 %v842_v13  ;;  %v781_v31 = vmul.f32 %v2780_v18, %v2810_v53 }
 0x298   : > { %v2303_v46 = vpop.eup %2302  ;;  %v2890_v26 = vmul.f32 %v898_v39, %v2802_v41  ;;  %v810_v34 = vmul.f32 0.5, %v778_v47  ;;  %v782_v54 = vmul.f32 %v2780_v18, %v2818_v23  ;;  %v811_v0 = vmul.f32 0.5, %v779_v56 }
 0x299   : > { %v2305_v6 = vpop.eup %2304  ;;  %v899_v51 = vadd.f32 1.0, %v2303_v46  ;;  %v2897_v9 = vmul.f32 %v2872_v36, %v2872_v36  ;;  %2318 = verf.f32 %v843_v30  ;;  %v845_v62 = vmul.f32 0.70710677, %v781_v31 }
 0x29a   : > { %v2307_v25 = vpop.eup %2306  ;;  %v901_v17 = vadd.f32 1.0, %v2305_v6  ;;  %v785_v42 = vmul.f32 %v2782_v55, %v2843_v61  ;;  %v784_v46 = vmul.f32 %v2782_v55, %v669_v50  ;;  %v2925_v56 = vmul.f32 0.5, %v782_v54 }
 0x29b   : > { %v2893_v14 = vmul.f32 %v899_v51, %v2804_v44  ;;  %v900_v27 = vadd.f32 1.0, %v2307_v25  ;;  %v2309_v33 = vpop.eup %2308  ;;  %v780_v44 = vmul.f32 %v2780_v18, %v2812_v59  ;;  %2320 = verf.f32 %v845_v62 }
 0x29c   : > { %v2909_v5 = vmul.f32 %v901_v17, %v2808_v49  ;;  %v902_v3 = vadd.f32 1.0, %v2309_v33  ;;  %v2311_v37 = vpop.eup %2310  ;;  %v846_v18 = vmul.f32 0.70710677, %v782_v54  ;;  %v783_v49 = vmul.f32 %v2782_v55, %v667_v58 }
 0x29d   : > { %v2902_v41 = vmul.f32 %v900_v27, %v2816_v22  ;;  %v2913_v53 = vmul.f32 %v2893_v14, %v2893_v14  ;;  %v2915_v22 = vmul.f32 0.5, %v781_v31  ;;  %v844_v8 = vmul.f32 0.70710677, %v780_v44  ;;  %v2313_v23 = vpop.eup %2312 }
 0x29e   : > { %v903_v39 = vadd.f32 1.0, %v2311_v37  ;;  %v812_v47 = vmul.f32 0.5, %v780_v44  ;;  %v847_v6 = vmul.f32 0.70710677, %v783_v49  ;;  %v2928_v51 = vmul.f32 %v902_v3, %v2826_v28 }
 0x29f   : > { %v2919_v59 = vmul.f32 %v2902_v41, %v2902_v41  ;;  %2322 = verf.f32 %v844_v8  ;;  %v905_v58 = vadd.f32 1.0, %v2313_v23  ;;  %v849_v25 = vmul.f32 0.70710677, %v785_v42 }
 0x2a0   : > { %2324 = verf.f32 %v846_v18  ;;  %v2931_v57 = vmul.f32 %v903_v39, %v2848_v2  ;;  %v815_v17 = vmul.f32 0.5, %v783_v49  ;;  %v848_v13 = vmul.f32 0.70710677, %v784_v46  ;;  %v2315_v50 = vpop.eup %2314 }
 0x2a1   : > { %2326 = verf.f32 %v847_v6  ;;  %v786_v61 = vmul.f32 %v2782_v55, %v2850_v7  ;;  %v817_v27 = vmul.f32 0.5, %v785_v42  ;;  %v787_v30 = vmul.f32 %v2784_v60, %v2859_v38  ;;  %v2317_v31 = vpop.eup %2316 }
 0x2a2   : > { %2328 = verf.f32 %v849_v25  ;;  %v789_v28 = vmul.f32 %v2784_v60, %v2861_v4  ;;  %v904_v2 = vadd.f32 1.0, %v2315_v50  ;;  %v816_v33 = vmul.f32 0.5, %v784_v46 }
 0x2a3   : > { %2330 = verf.f32 %v848_v13  ;;  %v850_v44 = vmul.f32 0.70710677, %v786_v61  ;;  %v2941_v54 = vmul.f32 %v2931_v57, %v2931_v57  ;;  %v2944_v55 = vmul.f32 %v905_v58, %v2874_v15  ;;  %v2319_v3 = vpop.eup %2318 }
 0x2a4   : > { %v906_v7 = vadd.f32 1.0, %v2317_v31  ;;  %v851_v62 = vmul.f32 0.70710677, %v787_v30  ;;  %v2946_v8 = vmul.f32 %v904_v2, %v808_v63  ;;  %v853_v38 = vmul.f32 0.70710677, %v789_v28 }
 0x2a5   : > { %2332 = verf.f32 %v850_v44  ;;  %v788_v4 = vmul.f32 %v2784_v60, %v2867_v45  ;;  %v907_v37 = vadd.f32 1.0, %v2319_v3  ;;  %v2950_v18 = vmul.f32 0.5, %v786_v61  ;;  %v2321_v23 = vpop.eup %2320 }
 0x2a6   : > { %2334 = verf.f32 %v851_v62  ;;  %v790_v49 = vmul.f32 %v2784_v60, %v2869_v12  ;;  %v819_v15 = vmul.f32 0.5, %v787_v30  ;;  %v2954_v39 = vmul.f32 0.5, %v789_v28 }
 0x2a7   : > { %2336 = verf.f32 %v853_v38  ;;  %v852_v42 = vmul.f32 0.70710677, %v788_v4  ;;  %v2956_v46 = vmul.f32 %v906_v7, %v810_v34  ;;  %v2958_v6 = vmul.f32 %v907_v37, %v811_v0 }
 0x2a8   : > { %v909_v58 = vadd.f32 1.0, %v2321_v23  ;;  %v854_v45 = vmul.f32 0.70710677, %v790_v49  ;;  %v968_v13 = vmul.f32 %v2946_v8, %v2946_v8  ;;  %v820_v50 = vmul.f32 0.5, %v788_v4 }
 0x2a9   : > { %v2323_v63 = vpop.eup %2322  ;;  %2338 = verf.f32 %v852_v42  ;;  %v2962_v60 = vmul.f32 0.5, %v790_v49  ;;  %v953_v12 = vmul.f32 %v2821_v21, %v2821_v21  ;;  %v954_v34 = vmul.f32 %v2834_v24, %v2834_v24 }
 0x2aa   : > { %v2325_v25 = vpop.eup %2324  ;;  %v908_v61 = vadd.f32 1.0, %v2323_v63  ;;  %2340 = verf.f32 %v854_v45  ;;  %v971_v30 = vmul.f32 %v2958_v6, %v2958_v6  ;;  %v2971_v28 = vmul.f32 %v909_v58, %v2915_v22 }
 0x2ab   : > { %v2327_v0 = vpop.eup %2326  ;;  %v983_v2 = vadd.f32 %v2838_v35, %v2831_v32  ;;  %v910_v7 = vadd.f32 1.0, %v2325_v25  ;;  %v957_v3 = vmul.f32 %v2841_v48, %v2841_v48  ;;  %v988_v38 = vadd.f32 %v2880_v20, %v2854_v52 }
 0x2ac   : > { %v2973_v31 = vmul.f32 %v908_v61, %v812_v47  ;;  %v2329_v44 = vpop.eup %2328  ;;  %v911_v62 = vadd.f32 1.0, %v2327_v0  ;;  %v958_v22 = vmul.f32 %v2864_v11, %v2864_v11  ;;  %v961_v47 = vmul.f32 %v2883_v43, %v2883_v43 }
 0x2ad   : > { %v2331_v4 = vpop.eup %2330  ;;  %v913_v37 = vadd.f32 1.0, %v2329_v44  ;;  %v984_v49 = vadd.f32 %v983_v2, %v953_v12  ;;  %v989_v35 = vadd.f32 %v988_v38, %v957_v3  ;;  %v993_v42 = vadd.f32 %v2897_v9, %v2887_v40 }
 0x2ae   : > { %v2985_v23 = vmul.f32 %v911_v62, %v815_v17  ;;  %v912_v32 = vadd.f32 1.0, %v2331_v4  ;;  %v972_v52 = vmul.f32 %v2973_v31, %v2973_v31  ;;  %v962_v45 = vmul.f32 %v2890_v26, %v2890_v26 }
 0x2af   : > { %v2333_v63 = vpop.eup %2332  ;;  %v2991_v20 = vmul.f32 %v913_v37, %v817_v27  ;;  %v985_v58 = vadd.f32 %v984_v49, %v954_v34  ;;  %v990_v12 = vadd.f32 %v989_v35, %v958_v22  ;;  %v965_v0 = vmul.f32 %v2909_v5, %v2909_v5 }
 0x2b0   : > { %v2335_v25 = vpop.eup %2334  ;;  %v2995_v61 = vmul.f32 %v912_v32, %v816_v33  ;;  %v914_v17 = vadd.f32 1.0, %v2333_v63  ;;  %v994_v9 = vadd.f32 %v993_v42, %v961_v47  ;;  %v966_v27 = vmul.f32 %v2928_v51, %v2928_v51 }
 0x2b1   : > { %v2337_v2 = vpop.eup %2336  ;;  %v915_v40 = vadd.f32 1.0, %v2335_v25  ;;  %986 = vadd.xlane.f32.xlu0 %v985_v58  ;;  %v998_v34 = vadd.f32 %v2919_v59, %v2913_v53  ;;  %v975_v44 = vmul.f32 %v2985_v23, %v2985_v23  ;;  %991 = vadd.xlane.f32.xlu1 %v990_v12  ;;  %v969_v3 = vmul.f32 %v2944_v55, %v2944_v55 }
 0x2b2   : > { %v976_v33 = vmul.f32 %v2995_v61, %v2995_v61  ;;  %v917_v62 = vadd.f32 1.0, %v2337_v2  ;;  %v995_v37 = vadd.f32 %v994_v9, %v962_v45  ;;  %v1003_v22 = vadd.f32 %v968_v13, %v2941_v54 }
 0x2b3   : > { %v2339_v38 = vpop.eup %2338  ;;  %v3009_v4 = vmul.f32 %v915_v40, %v819_v15  ;;  %v999_v49 = vadd.f32 %v998_v34, %v965_v0  ;;  %v3013_v53 = vmul.f32 %v910_v7, %v2925_v56  ;;  %v3016_v59 = vmul.f32 %v914_v17, %v2950_v18 }
 0x2b4   : > { %v2341_v47 = vpop.eup %2340  ;;  %v916_v32 = vadd.f32 1.0, %v2339_v38  ;;  %v970_v35 = vmul.f32 %v2956_v46, %v2956_v46  ;;  %v3021_v42 = vmul.f32 %v917_v62, %v2954_v39  ;;  %v1004_v58 = vadd.f32 %v1003_v22, %v969_v3  ;;  %v2216_v62 = vld [vmem:[#allocation5] sm:$0xff]   ;;  %v2218_v38 = vld [vmem:[#allocation5 + $0x48] sm:$0xff]  }
 0x2b5   : > { %v918_v15 = vadd.f32 1.0, %v2341_v47  ;;  %996 = vadd.xlane.f32.xlu0 %v995_v37  ;;  %v1000_v63 = vadd.f32 %v999_v49, %v966_v27  ;;  %v979_v54 = vmul.f32 %v3009_v4, %v3009_v4  ;;  %v973_v56 = vmul.f32 %v2971_v28, %v2971_v28  ;;  %v2217_v3 = vld [vmem:[#allocation5 + $0x80] sm:$0xff]   ;;  %v2219_v37 = vld [vmem:[#allocation5 + $0xc8] sm:$0xff]  }
 0x2b6   : > { %v3025_v13 = vmul.f32 %v916_v32, %v820_v50  ;;  %v1008_v18 = vadd.f32 %v972_v52, %v971_v30  ;;  %v1005_v7 = vadd.f32 %v1004_v58, %v970_v35  ;;  %v977_v45 = vmul.f32 %v2991_v20, %v2991_v20 }
 0x2b7   : > { %1001 = vadd.xlane.f32.xlu1 %v1000_v63  ;;  %v1013_v39 = vadd.f32 %v976_v33, %v975_v44  ;;  %v3034_v17 = vmul.f32 %v918_v15, %v2962_v60  ;;  %v974_v50 = vmul.f32 %v3013_v53, %v3013_v53  ;;  %v978_v30 = vmul.f32 %v3016_v59, %v3016_v59  ;;  %v2214_v44 = vld [vmem:[#allocation5 + $0x40] sm:$0xff]  }
 0x2b8   : > { %v980_v25 = vmul.f32 %v3025_v13, %v3025_v13  ;;  %v1009_v12 = vadd.f32 %v1008_v18, %v973_v56  ;;  %v981_v2 = vmul.f32 %v3021_v42, %v3021_v42  ;;  %v2215_v33 = vld [vmem:[#allocation5 + $0xc0] sm:$0xff]   ;;  %2002 = vmatprep.subr.bf16.mxu0 %v2214_v44 }
 0x2b9   : > { %1006 = vadd.xlane.f32.xlu0 %v1005_v7  ;;  %v1014_v52 = vadd.f32 %v1013_v39, %v977_v45  ;;  %v982_v60 = vmul.f32 %v3034_v17, %v3034_v17  ;;  %2042 = vmatprep.subr.bf16.mxu1 %v2215_v33 }
 0x2ba   : > { %v1010_v0 = vadd.f32 %v1009_v12, %v974_v50  ;;  %v1018_v40 = vadd.f32 %v980_v25, %v979_v54  ;;  %2003 = vmatpush3.bf16.msra.mxu0 %v2216_v62  ;;  %2043 = vmatpush3.bf16.msra.mxu1 %v2217_v3 }
 0x2bb   : > { %v1015_v9 = vadd.f32 %v1014_v52, %v978_v30  ;;  %2004 = vmatprep.subr.bf16.mxu0 %v2218_v38  ;;  %2044 = vmatprep.subr.bf16.mxu1 %v2219_v37 }
 0x2bc   : > { %1011 = vadd.xlane.f32.xlu1 %v1010_v0  ;;  %v1019_v27 = vadd.f32 %v1018_v40, %v981_v2 }
 0x2bd   : > { %1016 = vadd.xlane.f32.xlu0 %v1015_v9 }
 0x2be   : > { %v1020_v34 = vadd.f32 %v1019_v27, %v982_v60 }
 0x2c0   : > { %1021 = vadd.xlane.f32.xlu1 %v1020_v34 }
 0x33e   : > { %v987_v49 = vpop.xlane.xlu0 %986  ;;  %v992_v47 = vpop.xlane.xlu1 %991 }
 0x33f   : > { %v1024_v22 = vmul.f32 0.001953125, %v987_v49  ;;  %v1025_v32 = vmul.f32 0.001953125, %v992_v47 }
 0x341   : > { %v1032_v35 = vadd.f32 1e-06, %v1024_v22  ;;  %v1033_v15 = vadd.f32 1e-06, %v1025_v32 }
 0x342   : > { %v997_v63 = vpop.xlane.xlu0 %996 }
 0x343   : > { %2342 = vrsqrt.f32 %v1032_v35  ;;  %v1026_v58 = vmul.f32 0.001953125, %v997_v63 }
 0x344   : > { %2344 = vrsqrt.f32 %v1033_v15  ;;  %v1002_v54 = vpop.xlane.xlu1 %1001 }
 0x345   : > { %v1034_v56 = vadd.f32 1e-06, %v1026_v58  ;;  %v1027_v18 = vmul.f32 0.001953125, %v1002_v54 }
 0x346   : > { %v1007_v7 = vpop.xlane.xlu0 %1006 }
 0x347   : > { %2346 = vrsqrt.f32 %v1034_v56  ;;  %v1035_v45 = vadd.f32 1e-06, %v1027_v18  ;;  %v1028_v39 = vmul.f32 0.001953125, %v1007_v7  ;;  %v2221_v18 = vld [vmem:[#allocation5 + $0x88] sm:$0xff]   ;;  %v2222_v7 = vld [vmem:[#allocation5 + $0x50] sm:$0xff]  }
 0x348   : > { %2045 = vmatpush3.bf16.msra.mxu1 %v2221_v18 }
 0x349   : > { %2348 = vrsqrt.f32 %v1035_v45  ;;  %v1036_v25 = vadd.f32 1e-06, %v1028_v39  ;;  %v1012_v50 = vpop.xlane.xlu1 %1011  ;;  %v2224_v45 = vld [vmem:[#allocation5 + $0x10] sm:$0xff]  }
 0x34a   : > { %v1029_v12 = vmul.f32 0.001953125, %v1012_v50  ;;  %v1017_v30 = vpop.xlane.xlu0 %1016  ;;  %v2225_v39 = vld [vmem:[#allocation5 + $0x90] sm:$0xff]   ;;  %v2227_v50 = vld [vmem:[#allocation5 + $0xd8] sm:$0xff]  }
 0x34b   : > { %2350 = vrsqrt.f32 %v1036_v25  ;;  %v1030_v52 = vmul.f32 0.001953125, %v1017_v30  ;;  %v2226_v25 = vld [vmem:[#allocation5 + $0x58] sm:$0xff]  }
 0x34c   : > { %v1037_v0 = vadd.f32 1e-06, %v1029_v12  ;;  %v2228_v12 = vld [vmem:[#allocation5 + $0x18] sm:$0xff]  }
 0x34d   : > { %v2343_v2 = vpop.eup %2342  ;;  %v1038_v40 = vadd.f32 1e-06, %v1030_v52  ;;  %v1022_v9 = vpop.xlane.xlu1 %1021  ;;  %v2229_v30 = vld [vmem:[#allocation5 + $0x98] sm:$0xff]   ;;  %v2230_v52 = vld [vmem:[#allocation5 + $0x60] sm:$0xff]  }
 0x34e   : > { %v2345_v60 = vpop.eup %2344  ;;  %2352 = vrsqrt.f32 %v1037_v0  ;;  %v1031_v27 = vmul.f32 0.001953125, %v1022_v9  ;;  %v3045_v34 = vmul.f32 %v2343_v2, %v2806_v16  ;;  %v3048_v44 = vmul.f32 %v2343_v2, %v2814_v19  ;;  %v2231_v0 = vld [vmem:[#allocation5 + $0xe0] sm:$0xff]   ;;  %v2234_v9 = vld [vmem:[#allocation5 + $0x68] sm:$0xff]  }
 0x34f   : > { %2354 = vrsqrt.f32 %v1038_v40  ;;  %v3051_v33 = vmul.f32 %v2343_v2, %v2821_v21  ;;  %v3054_v62 = vmul.f32 %v2343_v2, %v2834_v24  ;;  %v3057_v3 = vmul.f32 %v2345_v60, %v2824_v29  ;;  %v2232_v2 = vld [vmem:[#allocation5 + $0x20] sm:$0xff]  }
 0x350   : > { %v1039_v38 = vadd.f32 1e-06, %v1031_v27  ;;  %v3060_v37 = vmul.f32 %v2345_v60, %v2846_v1  ;;  %v3063_v16 = vmul.f32 %v2345_v60, %v2841_v48  ;;  %2482 = vmaxabs.init.f32.vacc3 %v3045_v34, %v3048_v44  ;;  %v2233_v40 = vld [vmem:[#allocation5 + $0xa0] sm:$0xff]   ;;  %v2236_v27 = vld [vmem:[#allocation5 + $0x28] sm:$0xff]  }
 0x351   : > { %v2347_v49 = vpop.eup %2346  ;;  %v3068_v19 = vmul.f32 %v2345_v60, %v2864_v11  ;;  %v2235_v60 = vld [vmem:[#allocation5 + $0xe8] sm:$0xff]  }
 0x352   : > { %2356 = vrsqrt.f32 %v1039_v38  ;;  %v3071_v24 = vmul.f32 %v2347_v49, %v2857_v10  ;;  %v3074_v29 = vmul.f32 %v2347_v49, %v2872_v36  ;;  %2479 = vmaxabs.init.f32.vacc2 %v3057_v3, %v3060_v37  ;;  %v2237_v38 = vld [vmem:[#allocation5 + $0xa8] sm:$0xff]  }
 0x353   : > { %v2349_v21 = vpop.eup %2348  ;;  %v3079_v48 = vmul.f32 %v2347_v49, %v2883_v43  ;;  %v3082_v1 = vmul.f32 %v2347_v49, %v2890_v26  ;;  %2483 = vmaxabs.f32.vacc3 %v3051_v33, %v3054_v62  ;;  %v2238_v49 = vld [vmem:[#allocation5 + $0x70] sm:$0xff]  }
 0x354   : > { %v3085_v11 = vmul.f32 %v2349_v21, %v2893_v14  ;;  %v3088_v47 = vmul.f32 %v2349_v21, %v2902_v41  ;;  %2476 = vmaxabs.init.f32.vacc1 %v3071_v24, %v3074_v29  ;;  %v3095_v36 = vmul.f32 %v2349_v21, %v2909_v5 }
 0x355   : > { %v2351_v22 = vpop.eup %2350  ;;  %v2484_v10 = vmovacc.low.even.vacc3  ;;  %v3098_v43 = vmul.f32 %v2349_v21, %v2928_v51  ;;  %2480 = vmaxabs.f32.vacc2 %v3063_v16, %v3068_v19  ;;  %v2239_v21 = vld [vmem:[#allocation5 + $0xf0] sm:$0xff]  }
 0x356   : > { %v3103_v41 = vmul.f32 %v2351_v22, %v2931_v57  ;;  %v3106_v32 = vmul.f32 %v2351_v22, %v2946_v8  ;;  %v3109_v15 = vmul.f32 %v2351_v22, %v2944_v55  ;;  %2473 = vmaxabs.init.f32.vacc0 %v3085_v11, %v3088_v47 }
 0x357   : > { %1115 = vmax.xlane.f32.xlu0 %v2484_v10  ;;  %v2481_v14 = vmovacc.low.even.vacc2  ;;  %v3114_v5 = vmul.f32 %v2351_v22, %v2956_v46  ;;  %2477 = vmaxabs.f32.vacc1 %v3079_v48, %v3082_v1  ;;  %v2240_v22 = vld [vmem:[#allocation5 + $0x30] sm:$0xff]  }
 0x358   : > { %v2353_v26 = vpop.eup %2352  ;;  %2470 = vmaxabs.init.f32.vacc3 %v3103_v41, %v3106_v32  ;;  %2474 = vmaxabs.f32.vacc0 %v3095_v36, %v3098_v43  ;;  %v2241_v10 = vld [vmem:[#allocation5 + $0xb0] sm:$0xff]  }
 0x359   : > { %v2355_v35 = vpop.eup %2354  ;;  %1120 = vmax.xlane.f32.xlu1 %v2481_v14  ;;  %v2478_v51 = vmovacc.low.even.vacc1  ;;  %v3119_v57 = vmul.f32 %v2353_v26, %v2958_v6  ;;  %v3122_v8 = vmul.f32 %v2353_v26, %v2973_v31  ;;  %v3127_v55 = vmul.f32 %v2353_v26, %v2971_v28  ;;  %v2243_v14 = vld [vmem:[#allocation5 + $0xf8] sm:$0xff]  }
 0x35a   : > { %v3130_v46 = vmul.f32 %v2353_v26, %v3013_v53  ;;  %v3133_v58 = vmul.f32 %v2355_v35, %v2985_v23  ;;  %v2475_v6 = vmovacc.low.even.vacc0  ;;  %v3138_v31 = vmul.f32 %v2355_v35, %v2995_v61  ;;  %v2242_v26 = vld [vmem:[#allocation5 + $0x78] sm:$0xff]  }
 0x35b   : > { %1125 = vmax.xlane.f32.xlu0 %v2478_v51  ;;  %2467 = vmaxabs.init.f32.vacc2 %v3119_v57, %v3122_v8  ;;  %v3143_v28 = vmul.f32 %v2355_v35, %v2991_v20  ;;  %v3146_v54 = vmul.f32 %v2355_v35, %v3016_v59  ;;  %2471 = vmaxabs.f32.vacc3 %v3109_v15, %v3114_v5  ;;  %v2244_v35 = vld [vmem:[#allocation5 + $0x38] sm:$0xff]  }
 0x35c   : > { %v2357_v63 = vpop.eup %2356  ;;  %2464 = vmaxabs.init.f32.vacc1 %v3133_v58, %v3138_v31  ;;  %v2245_v51 = vld [vmem:[#allocation5 + $0xb8] sm:$0xff]  }
 0x35d   : > { %1130 = vmax.xlane.f32.xlu1 %v2475_v6  ;;  %v2472_v23 = vmovacc.low.even.vacc3  ;;  %v3151_v53 = vmul.f32 %v2357_v63, %v3009_v4  ;;  %v3154_v61 = vmul.f32 %v2357_v63, %v3025_v13  ;;  %v3159_v20 = vmul.f32 %v2357_v63, %v3021_v42  ;;  %v2220_v13 = vld [vmem:[#allocation5 + $0x8] sm:$0xff]  }
 0x35e   : > { %2468 = vmaxabs.f32.vacc2 %v3127_v55, %v3130_v46  ;;  %v3164_v56 = vmul.f32 %v2357_v63, %v3034_v17  ;;  %2465 = vmaxabs.f32.vacc1 %v3143_v28, %v3146_v54  ;;  %2005 = vmatpush3.bf16.msra.mxu0 %v2220_v13  ;;  %v2223_v17 = vld [vmem:[#allocation5 + $0xd0] sm:$0xff]  }
 0x35f   : > { %1135 = vmax.xlane.f32.xlu0 %v2472_v23  ;;  %2461 = vmaxabs.init.f32.vacc0 %v3151_v53, %v3154_v61  ;;  %2006 = vmatprep.subr.bf16.mxu0 %v2222_v7 }
 0x360   : > { %v2469_v59 = vmovacc.low.even.vacc2  ;;  %v2466_v4 = vmovacc.low.even.vacc1  ;;  %2046 = vmatprep.subr.bf16.mxu1 %v2223_v17 }
 0x361   : > { %2462 = vmaxabs.f32.vacc0 %v3159_v20, %v3164_v56  ;;  %2047 = vmatpush3.bf16.msra.mxu1 %v2225_v39 }
 0x362   : > { %1140 = vmax.xlane.f32.xlu1 %v2469_v59  ;;  %2007 = vmatpush3.bf16.msra.mxu0 %v2224_v45 }
 0x363   : > { %1145 = vmax.xlane.f32.xlu0 %v2466_v4  ;;  %v2463_v42 = vmovacc.low.even.vacc0  ;;  %2008 = vmatprep.subr.bf16.mxu0 %v2226_v25 }
 0x364   : > { %2048 = vmatprep.subr.bf16.mxu1 %v2227_v50 }
 0x365   : > { %2049 = vmatpush3.bf16.msra.mxu1 %v2229_v30 }
 0x366   : > { %1150 = vmax.xlane.f32.xlu1 %v2463_v42  ;;  %2009 = vmatpush3.bf16.msra.mxu0 %v2228_v12 }
 0x367   : > { %2010 = vmatprep.subr.bf16.mxu0 %v2230_v52  ;;  %2050 = vmatprep.subr.bf16.mxu1 %v2231_v0 }
 0x369   : > { %2051 = vmatpush3.bf16.msra.mxu1 %v2233_v40 }
 0x36a   : > { %2011 = vmatpush3.bf16.msra.mxu0 %v2232_v2  ;;  %2052 = vmatprep.subr.bf16.mxu1 %v2235_v60 }
 0x36b   : > { %2012 = vmatprep.subr.bf16.mxu0 %v2234_v9 }
 0x36d   : > { %2053 = vmatpush3.bf16.msra.mxu1 %v2237_v38 }
 0x36e   : > { %2013 = vmatpush3.bf16.msra.mxu0 %v2236_v27  ;;  %2054 = vmatprep.subr.bf16.mxu1 %v2239_v21 }
 0x36f   : > { %2014 = vmatprep.subr.bf16.mxu0 %v2238_v49 }
 0x371   : > { %2055 = vmatpush3.bf16.msra.mxu1 %v2241_v10 }
 0x372   : > { %2015 = vmatpush3.bf16.msra.mxu0 %v2240_v22  ;;  %2056 = vmatprep.subr.bf16.mxu1 %v2243_v14 }
 0x373   : > { %2016 = vmatprep.subr.bf16.mxu0 %v2242_v26 }
 0x375   : > { %2057 = vmatpush3.bf16.msra.mxu1 %v2245_v51 }
 0x376   : > { %2017 = vmatpush3.bf16.msra.mxu0 %v2244_v35 }
 0x3e4   : > { %v3172_v63 = vpop.xlane.xlu0 %1115 }
 0x3e5   : > { %v1152_v6 = vmax.f32 %v3172_v63, 1e-05 }
 0x3e6   : > { %v3175_v23 = vpop.xlane.xlu1 %1120 }
 0x3e7   : > { %2358 = vrcp.f32 %v1152_v6  ;;  %v1153_v59 = vmax.f32 %v3175_v23, 1e-05 }
 0x3e8   : > { %v3182_v4 = vpop.xlane.xlu0 %1125 }
 0x3e9   : > { %2360 = vrcp.f32 %v1153_v59  ;;  %v1154_v13 = vmax.f32 %v3182_v4, 1e-05 }
 0x3ea   : > { %v3185_v18 = vpop.xlane.xlu1 %1130 }
 0x3eb   : > { %v3316_v42 = vmax.f32 %v3185_v18, 1e-05  ;;  %2362 = vrcp.f32 %v1154_v13 }
 0x3ec   : > { %v3190_v7 = vpop.xlane.xlu0 %1135 }
 0x3ed   : > { %2364 = vrcp.f32 %v3316_v42  ;;  %v3315_v17 = vmax.f32 %v3190_v7, 1e-05 }
 0x3ef   : > { %2366 = vrcp.f32 %v3315_v17  ;;  %v3197_v39 = vpop.xlane.xlu1 %1140 }
 0x3f0   : > { %v3314_v50 = vmax.f32 %v3197_v39, 1e-05  ;;  %v3204_v2 = vpop.xlane.xlu0 %1145 }
 0x3f1   : > { %v2359_v45 = vpop.eup %2358  ;;  %v3313_v40 = vmax.f32 %v3204_v2, 1e-05 }
 0x3f2   : > { %v1161_v25 = vmul.f32 127.0, %v2359_v45  ;;  %2368 = vrcp.f32 %v3314_v50 }
 0x3f3   : > { %v2361_v12 = vpop.eup %2360  ;;  %2370 = vrcp.f32 %v3313_v40 }
 0x3f4   : > { %v1176_v30 = vmul.f32 %v1161_v25, %v3045_v34  ;;  %v1178_v52 = vmul.f32 %v1161_v25, %v3051_v33  ;;  %v1163_v0 = vmul.f32 127.0, %v2361_v12  ;;  %v1177_v9 = vmul.f32 %v1161_v25, %v3048_v44  ;;  %v3212_v34 = vpop.xlane.xlu1 %1150 }
 0x3f5   : > { %v2363_v33 = vpop.eup %2362  ;;  %v1179_v10 = vmul.f32 %v1161_v25, %v3054_v62  ;;  %v3317_v44 = vmax.f32 %v3212_v34, 1e-05 }
 0x3f6   : > { %v2090_v60 = vround.rtne.f32 %v1176_v30  ;;  %v2092_v27 = vround.rtne.f32 %v1178_v52  ;;  %v1180_v38 = vmul.f32 %v1163_v0, %v3057_v3  ;;  %v1182_v49 = vmul.f32 %v1163_v0, %v3063_v16 }
 0x3f7   : > { %v2365_v26 = vpop.eup %2364  ;;  %v1181_v35 = vmul.f32 %v1163_v0, %v3060_v37  ;;  %v2091_v51 = vround.rtne.f32 %v1177_v9  ;;  %v1183_v12 = vmul.f32 %v1163_v0, %v3068_v19  ;;  %v1165_v52 = vmul.f32 127.0, %v2363_v33 }
 0x3f8   : > { %v2094_v21 = vround.rtne.f32 %v1180_v38  ;;  %v2096_v22 = vround.rtne.f32 %v1182_v49  ;;  %v1240_v14 = vmax.f32 %v2090_v60, -128.0  ;;  %v1242_v3 = vmax.f32 %v2092_v27, -128.0 }
 0x3f9   : > { %v2367_v30 = vpop.eup %2366  ;;  %2372 = vrcp.f32 %v3317_v44  ;;  %v2095_v38 = vround.rtne.f32 %v1181_v35  ;;  %v1241_v49 = vmax.f32 %v2091_v51, -128.0  ;;  %v1167_v62 = vmul.f32 127.0, %v2365_v26 }
 0x3fa   : > { %v1244_v45 = vmax.f32 %v2094_v21, -128.0  ;;  %v1246_v16 = vmax.f32 %v2096_v22, -128.0  ;;  %v3220_v25 = vmul.f32 127.0, %v2367_v30  ;;  %v2093_v60 = vround.rtne.f32 %v1179_v10 }
 0x3fb   : > { %v2097_v40 = vround.rtne.f32 %v1183_v12  ;;  %v1245_v50 = vmax.f32 %v2095_v38, -128.0  ;;  %v1273_v37 = vmin.f32 %v1241_v49, 127.0  ;;  %v1272_v9 = vmin.f32 %v1240_v14, 127.0 }
 0x3fc   : > { %v1276_v27 = vmin.f32 %v1244_v45, 127.0  ;;  %v2369_v21 = vpop.eup %2368  ;;  %v1243_v22 = vmax.f32 %v2093_v60, -128.0  ;;  %v1274_v19 = vmin.f32 %v1242_v3, 127.0  ;;  %v1278_v0 = vmin.f32 %v1246_v16, 127.0 }
 0x3fd   : > { %v1247_v17 = vmax.f32 %v2097_v40, -128.0  ;;  %v3222_v33 = vmul.f32 127.0, %v2369_v21  ;;  %v1277_v42 = vmin.f32 %v1245_v50, 127.0  ;;  %v1185_v35 = vmul.f32 %v1165_v52, %v3074_v29  ;;  %v2371_v12 = vpop.eup %2370 }
 0x3fe   : > { %v1312_v44 = vpack.c.bf16 %v1276_v27, %v1272_v9  ;;  %v1275_v26 = vmin.f32 %v1243_v22, 127.0  ;;  %v1314_v30 = vpack.c.bf16 %v1278_v0, %v1274_v19  ;;  %v1189_v10 = vmul.f32 %v1167_v62, %v3088_v47 }
 0x3ff   : > { %v1279_v51 = vmin.f32 %v1247_v17, 127.0  ;;  %v1313_v38 = vpack.c.bf16 %v1277_v42, %v1273_v37  ;;  %v2099_v14 = vround.rtne.f32 %v1185_v35  ;;  %v1187_v45 = vmul.f32 %v1165_v52, %v3082_v1 }
 0x400   : > { %v1191_v40 = vmul.f32 %v1167_v62, %v3098_v43  ;;  %v3228_v3 = vmul.f32 127.0, %v2371_v12  ;;  %v2103_v49 = vround.rtne.f32 %v1189_v10  ;;  %v1184_v50 = vmul.f32 %v1165_v52, %v3071_v24 }
 0x401   : > { %v1315_v16 = vpack.c.bf16 %v1279_v51, %v1275_v26  ;;  %1616 = vmatprep.mubr.bf16.mxu0 %v1313_v38  ;;  %v1249_v29 = vmax.f32 %v2099_v14, -128.0  ;;  %v2101_v60 = vround.rtne.f32 %v1187_v45  ;;  %v1188_v9 = vmul.f32 %v1167_v62, %v3085_v11 }
 0x402   : > { %v2105_v17 = vround.rtne.f32 %v1191_v40  ;;  %1617 = vmatmul.mubr.bf16.vlgmr.msra.gmra.mrb[16].mxu0 %v1312_v44  ;;  %v1253_v47 = vmax.f32 %v2103_v49, -128.0  ;;  %v2098_v42 = vround.rtne.f32 %v1184_v50  ;;  %v1186_v1 = vmul.f32 %v1165_v52, %v3079_v48 }
 0x403   : > { %1681 = vmatprep.mubr.bf16.mxu1 %v1315_v16  ;;  %v1190_v43 = vmul.f32 %v1167_v62, %v3095_v36  ;;  %v2373_v37 = vpop.eup %2372  ;;  %v1281_v27 = vmin.f32 %v1249_v29, 127.0  ;;  %v1251_v21 = vmax.f32 %v2101_v60, -128.0  ;;  %v2102_v24 = vround.rtne.f32 %v1188_v9 }
 0x404   : > { %1682 = vmatmul.mubr.bf16.vlgmr.msra.gmra.mrb[16].mxu1 %v1314_v30  ;;  %v1255_v22 = vmax.f32 %v2105_v17, -128.0  ;;  %v3234_v19 = vmul.f32 127.0, %v2373_v37  ;;  %v1285_v0 = vmin.f32 %v1253_v47, 127.0  ;;  %v1248_v35 = vmax.f32 %v2098_v42, -128.0 }
 0x405   : > { %v2100_v26 = vround.rtne.f32 %v1186_v1  ;;  %v1283_v11 = vmin.f32 %v1251_v21, 127.0  ;;  %v1252_v44 = vmax.f32 %v2102_v24, -128.0  ;;  %v2104_v10 = vround.rtne.f32 %v1190_v43 }
 0x406   : > { %v1287_v51 = vmin.f32 %v1255_v22, 127.0  ;;  %v1317_v12 = vpack.c.bf16 %v1285_v0, %v1281_v27  ;;  %v1280_v38 = vmin.f32 %v1248_v35, 127.0  ;;  %v1193_v36 = vmul.f32 %v3220_v25, %v3106_v32 }
 0x407   : > { %v1250_v48 = vmax.f32 %v2100_v26, -128.0  ;;  %v1284_v62 = vmin.f32 %v1252_v44, 127.0  ;;  %v1254_v30 = vmax.f32 %v2104_v10, -128.0  ;;  %v1197_v14 = vmul.f32 %v3222_v33, %v3122_v8 }
 0x408   : > { %v1319_v52 = vpack.c.bf16 %v1287_v51, %v1283_v11  ;;  %1624 = vmatprep.mubr.bf16.mxu0 %v1317_v12  ;;  %v2107_v40 = vround.rtne.f32 %v1193_v36  ;;  %v1195_v16 = vmul.f32 %v3220_v25, %v3114_v5  ;;  %v1199_v49 = vmul.f32 %v3222_v33, %v3130_v46 }
 0x409   : > { %v1282_v45 = vmin.f32 %v1250_v48, 127.0  ;;  %v1316_v50 = vpack.c.bf16 %v1284_v62, %v1280_v38  ;;  %v1286_v29 = vmin.f32 %v1254_v30, 127.0  ;;  %v2111_v60 = vround.rtne.f32 %v1197_v14 }
 0x40a   : > { %1689 = vmatprep.mubr.bf16.mxu1 %v1319_v52  ;;  %v1192_v32 = vmul.f32 %v3220_v25, %v3103_v41  ;;  %v1257_v17 = vmax.f32 %v2107_v40, -128.0  ;;  %v2109_v9 = vround.rtne.f32 %v1195_v16  ;;  %v2113_v47 = vround.rtne.f32 %v1199_v49 }
 0x40b   : > { %v1196_v8 = vmul.f32 %v3222_v33, %v3119_v57  ;;  %1625 = vmatmul.mubr.bf16.gmra.mrb[20].mxu0 %v1316_v50  ;;  %v1318_v42 = vpack.c.bf16 %v1286_v29, %v1282_v45  ;;  %v1261_v1 = vmax.f32 %v2111_v60, -128.0  ;;  %v1194_v46 = vmul.f32 %v3220_v25, %v3109_v15 }
 0x40c   : > { %v2106_v5 = vround.rtne.f32 %v1192_v32  ;;  %v1289_v43 = vmin.f32 %v1257_v17, 127.0  ;;  %v1259_v37 = vmax.f32 %v2109_v9, -128.0  ;;  %v1263_v27 = vmax.f32 %v2113_v47, -128.0 }
 0x40d   : > { %v2110_v21 = vround.rtne.f32 %v1196_v8  ;;  %1690 = vmatmul.mubr.bf16.gmra.mrb[20].mxu1 %v1318_v42  ;;  %v1293_v22 = vmin.f32 %v1261_v1, 127.0  ;;  %v1198_v24 = vmul.f32 %v3222_v33, %v3127_v55  ;;  %v2108_v0 = vround.rtne.f32 %v1194_v46 }
 0x40e   : > { %v1256_v41 = vmax.f32 %v2106_v5, -128.0  ;;  %v1291_v35 = vmin.f32 %v1259_v37, 127.0  ;;  %v1295_v57 = vmin.f32 %v1263_v27, 127.0  ;;  %v1201_v11 = vmul.f32 %v3228_v3, %v3138_v31 }
 0x40f   : > { %v1260_v26 = vmax.f32 %v2110_v21, -128.0  ;;  %v1321_v51 = vpack.c.bf16 %v1293_v22, %v1289_v43  ;;  %v2112_v15 = vround.rtne.f32 %v1198_v24  ;;  %v1258_v25 = vmax.f32 %v2108_v0, -128.0 }
 0x410   : > { %v1288_v44 = vmin.f32 %v1256_v41, 127.0  ;;  %v1323_v10 = vpack.c.bf16 %v1295_v57, %v1291_v35  ;;  %v1205_v38 = vmul.f32 %v3234_v19, %v3154_v61  ;;  %v2115_v48 = vround.rtne.f32 %v1201_v11 }
 0x411   : > { %v1292_v12 = vmin.f32 %v1260_v26, 127.0  ;;  %1632 = vmatprep.mubr.bf16.mxu0 %v1321_v51  ;;  %v1262_v36 = vmax.f32 %v2112_v15, -128.0  ;;  %v1290_v55 = vmin.f32 %v1258_v25, 127.0  ;;  %v1203_v33 = vmul.f32 %v3228_v3, %v3146_v54 }
 0x412   : > { %v1207_v52 = vmul.f32 %v3234_v19, %v3164_v56  ;;  %1697 = vmatprep.mubr.bf16.mxu1 %v1323_v10  ;;  %v2119_v62 = vround.rtne.f32 %v1205_v38  ;;  %v1265_v30 = vmax.f32 %v2115_v48, -128.0  ;;  %v1200_v14 = vmul.f32 %v3228_v3, %v3133_v58 }
 0x413   : > { %v1320_v31 = vpack.c.bf16 %v1292_v12, %v1288_v44  ;;  %v1294_v45 = vmin.f32 %v1262_v36, 127.0  ;;  %v2117_v40 = vround.rtne.f32 %v1203_v33  ;;  %v1204_v16 = vmul.f32 %v3234_v19, %v3151_v53 }
 0x414   : > { %v2121_v61 = vround.rtne.f32 %v1207_v52  ;;  %v1269_v49 = vmax.f32 %v2119_v62, -128.0  ;;  %v1297_v50 = vmin.f32 %v1265_v30, 127.0  ;;  %v2114_v54 = vround.rtne.f32 %v1200_v14 }
 0x415   : > { %1633 = vmatmul.mubr.bf16.gmra.mrb[24].mxu0 %v1320_v31  ;;  %v1202_v56 = vmul.f32 %v3228_v3, %v3143_v28  ;;  %v1322_v29 = vpack.c.bf16 %v1294_v45, %v1290_v55  ;;  %v1267_v60 = vmax.f32 %v2117_v40, -128.0  ;;  %v2118_v17 = vround.rtne.f32 %v1204_v16 }
 0x416   : > { %v1271_v32 = vmax.f32 %v2121_v61, -128.0  ;;  %v1301_v9 = vmin.f32 %v1269_v49, 127.0  ;;  %v1264_v47 = vmax.f32 %v2114_v54, -128.0  ;;  %v1206_v58 = vmul.f32 %v3234_v19, %v3159_v20 }
 0x417   : > { %v2116_v8 = vround.rtne.f32 %v1202_v56  ;;  %1698 = vmatmul.mubr.bf16.gmra.mrb[24].mxu1 %v1322_v29  ;;  %v1299_v42 = vmin.f32 %v1267_v60, 127.0  ;;  %v1268_v1 = vmax.f32 %v2118_v17, -128.0  ;;  %v1304_v19 = vmul.f32 0.007874016, %v1152_v6 }
 0x418   : > { %v1303_v53 = vmin.f32 %v1271_v32, 127.0  ;;  %v1325_v5 = vpack.c.bf16 %v1301_v9, %v1297_v50  ;;  %v2120_v46 = vround.rtne.f32 %v1206_v58  ;;  %v1296_v27 = vmin.f32 %v1264_v47, 127.0 }
 0x419   : > { %v1266_v43 = vmax.f32 %v2116_v8, -128.0  ;;  %v1300_v28 = vmin.f32 %v1268_v1, 127.0  ;;  %v3270_v57 = vstv %s1941_s19  ;;  %v1305_v44 = vmul.f32 0.007874016, %v1153_v59 }
 0x41a   : > { %v1327_v37 = vpack.c.bf16 %v1303_v53, %v1299_v42  ;;  %1640 = vmatprep.mubr.bf16.mxu0 %v1325_v5  ;;  %v1270_v3 = vmax.f32 %v2120_v46, -128.0  ;;  %v1716_v48 = vmul.f32 %v3270_v57, %v1304_v19  ;;  %v1306_v59 = vmul.f32 0.007874016, %v1154_v13 }
 0x41b   : > { %v1324_v21 = vpack.c.bf16 %v1300_v28, %v1296_v27  ;;  %v1298_v22 = vmin.f32 %v1266_v43, 127.0  ;;  %v1717_v36 = vmul.f32 %v3270_v57, %v1305_v44  ;;  %v3322_v16 = vmax.f32 %v3185_v18, 1e-05 }
 0x41c   : > { %1705 = vmatprep.mubr.bf16.mxu1 %v1327_v37  ;;  %v1302_v41 = vmin.f32 %v1270_v3, 127.0  ;;  %v1718_v60 = vmul.f32 %v3270_v57, %v1306_v59  ;;  %v3323_v53 = vmax.f32 %v3190_v7, 1e-05  ;;  %v3324_v28 = vmax.f32 %v3197_v39, 1e-05 }
 0x41d   : > { %1641 = vmatmul.mubr.bf16.gmra.mrb[28].mxu0 %v1324_v21  ;;  %v1307_v49 = vmul.f32 0.007874016, %v3322_v16  ;;  %v3325_v39 = vmax.f32 %v3204_v2, 1e-05 }
 0x41e   : > { %v1326_v24 = vpack.c.bf16 %v1302_v41, %v1298_v22  ;;  %v1308_v1 = vmul.f32 0.007874016, %v3323_v53  ;;  %v1309_v3 = vmul.f32 0.007874016, %v3324_v28 }
 0x41f   : > { %v1719_v4 = vmul.f32 %v3270_v57, %v1307_v49 }
 0x420   : > { %1706 = vmatmul.mubr.bf16.gmra.mrb[28].mxu1 %v1326_v24  ;;  %v1720_v24 = vmul.f32 %v3270_v57, %v1308_v1 }
 0x4d5   : > { %v2018_v20 = vpop.f32.mrb[16].mxu0 }
 0x4d6   : > { %v2019_v35 = vpop.f32.mrb[17].mxu0 }
 0x4d7   : > { %v2058_v0 = vpop.f32.mrb[16].mxu1  ;;  %v2020_v26 = vadd.f32 %v2019_v35, %v2018_v20  ;;  %v2021_v51 = vpop.f32.mrb[18].mxu0 }
 0x4d8   : > { %v2059_v11 = vpop.f32.mrb[17].mxu1  ;;  %v2022_v10 = vpop.f32.mrb[19].mxu0 }
 0x4d9   : > { %v2060_v15 = vadd.f32 %v2059_v11, %v2058_v0  ;;  %v2061_v25 = vpop.f32.mrb[18].mxu1  ;;  %v2023_v12 = vadd.f32 %v2022_v10, %v2021_v51  ;;  %v1721_v0 = vmul.f32 %v3270_v57, %v1309_v3 }
 0x4da   : > { %v2062_v38 = vpop.f32.mrb[19].mxu1 }
 0x4db   : > { %v1684_v63 = vadd.f32 %v2060_v15, %v2020_v26  ;;  %v2063_v6 = vadd.f32 %v2062_v38, %v2061_v25  ;;  %v1310_v25 = vmul.f32 0.007874016, %v3325_v39 }
 0x4dd   : > { %v1724_v55 = vmul.f32 %v1716_v48, %v1684_v63  ;;  %v1687_v33 = vadd.f32 %v2063_v6, %v2023_v12  ;;  %v3326_v6 = vmax.f32 %v3212_v34, 1e-05 }
 0x4de   : > { %v2024_v31 = vpop.f32.mrb[20].mxu0 }
 0x4df   : > { %v1725_v52 = vmul.f32 %v1717_v36, %v1687_v33  ;;  %v2025_v23 = vpop.f32.mrb[21].mxu0  ;;  %v1311_v36 = vmul.f32 0.007874016, %v3326_v6 }
 0x4e0   : > { %v2064_v30 = vpop.f32.mrb[20].mxu1  ;;  %v2026_v14 = vadd.f32 %v2025_v23, %v2024_v31  ;;  %v2027_v45 = vpop.f32.mrb[22].mxu0  ;;  %v1722_v31 = vmul.f32 %v3270_v57, %v1310_v25 }
 0x4e1   : > { %v1979_v62 = vpack.c.bf16 %v1725_v52, %v1724_v55  ;;  %v2065_v40 = vpop.f32.mrb[21].mxu1  ;;  %v2028_v61 = vpop.f32.mrb[23].mxu0  ;;  %v1723_v2 = vmul.f32 %v3270_v57, %v1311_v36 }
 0x4e2   : > { %v2066_v50 = vadd.f32 %v2065_v40, %v2064_v30  ;;  %v2067_v54 = vpop.f32.mrb[22].mxu1  ;;  %v2029_v56 = vadd.f32 %v2028_v61, %v2027_v45 }
 0x4e3   : > { %1980 = vst [vmem:[%s3281_s12] sm:$0xff] %v1979_v62   ;;  %v2068_v29 = vpop.f32.mrb[23].mxu1 }
 0x4e4   : > { %v1692_v32 = vadd.f32 %v2066_v50, %v2026_v14  ;;  %v2069_v17 = vadd.f32 %v2068_v29, %v2067_v54 }
 0x4e6   : > { %v1726_v13 = vmul.f32 %v1718_v60, %v1692_v32  ;;  %v1695_v9 = vadd.f32 %v2069_v17, %v2029_v56 }
 0x4e8   : > { %v2030_v47 = vpop.f32.mrb[24].mxu0  ;;  %v1727_v58 = vmul.f32 %v1719_v4, %v1695_v9 }
 0x4e9   : > { %v2031_v8 = vpop.f32.mrb[25].mxu0 }
 0x4ea   : > { %v2032_v42 = vadd.f32 %v2031_v8, %v2030_v47  ;;  %v2033_v18 = vpop.f32.mrb[26].mxu0  ;;  %v1984_v5 = vpack.c.bf16 %v1727_v58, %v1726_v13  ;;  %v2070_v46 = vpop.f32.mrb[24].mxu1 }
 0x4eb   : > { %v2034_v43 = vpop.f32.mrb[27].mxu0  ;;  %v2071_v37 = vpop.f32.mrb[25].mxu1 }
 0x4ec   : > { %v2035_v27 = vadd.f32 %v2034_v43, %v2033_v18  ;;  %1999 = vst [vmem:[%s3281_s12 + $0x8] sm:$0xff] %v1984_v5   ;;  %v2072_v21 = vadd.f32 %v2071_v37, %v2070_v46  ;;  %v2073_v22 = vpop.f32.mrb[26].mxu1 }
 0x4ed   : > { %v2074_v41 = vpop.f32.mrb[27].mxu1 }
 0x4ee   : > { %v1700_v20 = vadd.f32 %v2072_v21, %v2032_v42  ;;  %v2075_v19 = vadd.f32 %v2074_v41, %v2073_v22 }
 0x4f0   : > { %v1728_v7 = vmul.f32 %v1720_v24, %v1700_v20  ;;  %v1703_v35 = vadd.f32 %v2075_v19, %v2035_v27  ;;  %v2036_v26 = vpop.f32.mrb[28].mxu0 }
 0x4f1   : > { %v2037_v11 = vpop.f32.mrb[29].mxu0 }
 0x4f2   : > { %v1729_v51 = vmul.f32 %v1721_v0, %v1703_v35  ;;  %v2038_v44 = vadd.f32 %v2037_v11, %v2036_v26  ;;  %v2039_v15 = vpop.f32.mrb[30].mxu0 }
 0x4f3   : > { %v2076_v10 = vpop.f32.mrb[28].mxu1  ;;  %v2040_v12 = vpop.f32.mrb[31].mxu0 }
 0x4f4   : > { %v1989_v38 = vpack.c.bf16 %v1729_v51, %v1728_v7  ;;  %v2077_v48 = vpop.f32.mrb[29].mxu1  ;;  %v2041_v63 = vadd.f32 %v2040_v12, %v2039_v15 }
 0x4f5   : > { %v2078_v55 = vadd.f32 %v2077_v48, %v2076_v10  ;;  %v2079_v33 = vpop.f32.mrb[30].mxu1 }
 0x4f6   : > { %2000 = vst [vmem:[%s3281_s12 + $0x10] sm:$0xff] %v1989_v38   ;;  %v2080_v52 = vpop.f32.mrb[31].mxu1 }
 0x4f7   : > { %v1708_v23 = vadd.f32 %v2078_v55, %v2038_v44  ;;  %v2081_v59 = vadd.f32 %v2080_v52, %v2079_v33 }
 0x4f9   : > { %v1730_v62 = vmul.f32 %v1722_v31, %v1708_v23  ;;  %v1711_v30 = vadd.f32 %v2081_v59, %v2041_v63 }
 0x4fb   : > { %v1731_v14 = vmul.f32 %v1723_v2, %v1711_v30 }
 0x4fd   : > { %v1994_v45 = vpack.c.bf16 %v1731_v14, %v1730_v62 }
 0x4ff   : > { %2001 = vst [vmem:[%s3281_s12 + $0x18] sm:$0xff] %v1994_v45  }
 0x500 PF: > { %s17_s15 = sadd.s32 1, %s2487_s15  }
 0x501   : > { %p14_p2 = scmp.ge.s32.totalorder %s17_s15, 4  }
 0x503   :  { %16 = sbr.rel (!%p14_p2) target bundleno = 3 (0x3), region = 80 }
 0x50a   :  { %1794 = vsyncpa [#allocation3], 1 }
 0x50b   :  { %1796 = vsyncpa [#allocation3 + $0x1], 1 }
 0x50c   :  { %1797 = vsyncpa [#allocation6], 1 }
 0x50d   :  { %1798 = vsyncpa [#allocation4], 1 }
 0x50e   :  { %1800 = vsyncpa [#allocation4 + $0x1], 1 }

</bundles_post_ra>
